<compile_context>
chip_gen: v7x
topology: tpu7x:2x2x1
jax: 0.10.0
libtpu: 0.0.40
codegen_flags: <defaults>
</compile_context>

<pallas_src>
import math
from functools import partial

import jax
import jax.numpy as jnp
from jax.experimental import pallas as pl
from jax.experimental.pallas import tpu as pltpu


def _conv_relu_kernel(x_ref, w_ref, o_ref, xp_ref, patch_ref, *, K, pad):
    """One batch-block (NB images) per grid step.

    x_ref    : (NB, Cin, H, W)          raw input tile (input dtype)
    w_ref    : (Cout, K*K*Cin + 1)      flattened weights (kh,kw,c order) with
                                        the bias appended as the last column
    o_ref    : (NB, Cout, Ho*Wo)        lane-dense, NCHW-flattened output
    xp_ref   : (NB, Cin, Hp, Wp)        VMEM scratch: zero-padded images
    patch_ref: (K*K*Cin + 1, NB*Ho*Wo)  VMEM scratch: im2col patch matrix
    """
    NB, Cin, H, W = x_ref.shape
    Hp, Wp = xp_ref.shape[2], xp_ref.shape[3]
    Ho, Wo = Hp - K + 1, Wp - K + 1
    HoWo = Ho * Wo
    kkc = K * K * Cin
    cdt = xp_ref.dtype

    # Zero only the thin pad border (the interior is fully overwritten below).
    # Done every step (cheap) so correctness never depends on persistent
    # scratch state -> safe under "parallel" scheduling on multi-core chips.
    if pad > 0:
        xp_ref[:, :, :pad, :] = jnp.zeros((NB, Cin, pad, Wp), cdt)
        xp_ref[:, :, pad + H:, :] = jnp.zeros((NB, Cin, pad, Wp), cdt)
        xp_ref[:, :, :, :pad] = jnp.zeros((NB, Cin, Hp, pad), cdt)
        xp_ref[:, :, :, pad + W:] = jnp.zeros((NB, Cin, Hp, pad), cdt)

    # Copy (and cast) this step's images into the padded-scratch interior.
    xp_ref[:, :, pad:pad + H, pad:pad + W] = x_ref[...].astype(cdt)

    # Ones row of the patch matrix: the bias is folded into the matmul as an
    # extra contraction row, so there is no separate broadcast + VPU add.
    patch_ref[kkc:kkc + 1, :] = jnp.ones((1, NB * HoWo), cdt)

    # im2col: write each shifted window directly into the lane-dense patch
    # matrix (rows ordered (kh, kw, c) to match the weight flattening) —
    # no concatenate + global-reshape intermediate is materialized.
    for n in range(NB):
        xpi = xp_ref[n]                                      # (Cin, Hp, Wp)
        col0 = n * HoWo
        for kh in range(K):
            for kw in range(K):
                r0 = (kh * K + kw) * Cin
                win = xpi[:, kh:kh + Ho, kw:kw + Wo]         # (Cin, Ho, Wo)
                patch_ref[r0:r0 + Cin, col0:col0 + HoWo] = win.reshape(Cin, HoWo)

    # One deep MXU matmul (bias included), f32 accumulation, then ReLU in f32.
    acc = jnp.dot(w_ref[...], patch_ref[...], preferred_element_type=jnp.float32)
    acc = jnp.maximum(acc, 0.0)

    # Per-image, 256-lane-aligned slices -> (NB, Cout, Ho*Wo) lane-dense output.
    for n in range(NB):
        o_ref[n] = acc[:, n * HoWo:(n + 1) * HoWo].astype(o_ref.dtype)


def conv2d_relu_pallas(x_nchw, weight_oihw, bias, padding, *,
                       compute_dtype=jnp.float32, out_dtype=None, grid_steps=1):
    """Forward pass of Conv2dReLU (stride=1, zero padding). NCHW in / NCHW out.

    compute_dtype: dtype of the matmul operands (jnp.bfloat16 recommended on
                   v6e/v7x, keep f32 on v5e); accumulation + ReLU are f32.
    out_dtype    : output dtype (defaults to the input dtype).
    grid_steps   : number of grid steps the batch is split into. Default 1
                   (whole batch folded into lanes, best on single-TC chips);
                   use 2 on v7x so both TensorCores are busy.
    """
    N, Cin, H, W = x_nchw.shape
    Cout, Cin_w, K, K2 = weight_oihw.shape
    assert Cin == Cin_w and K == K2
    assert N % grid_steps == 0, "grid_steps must divide the batch size"
    NB = N // grid_steps

    Hp, Wp = H + 2 * padding, W + 2 * padding
    Ho, Wo = Hp - K + 1, Wp - K + 1
    HoWo = Ho * Wo
    kkc = K * K * Cin
    kc = kkc + 1                        # +1 contraction row for the folded bias

    if out_dtype is None:
        out_dtype = x_nchw.dtype

    # Tiny, weight-sized wrapper glue only; x is passed to the kernel raw.
    w_flat = jnp.transpose(weight_oihw, (0, 2, 3, 1)).reshape(Cout, kkc)
    w_aug = jnp.concatenate([w_flat, bias.reshape(Cout, 1)],
                            axis=1).astype(compute_dtype)

    flops = 2 * N * HoWo * kc * Cout
    bytes_accessed = (x_nchw.size * x_nchw.dtype.itemsize
                      + w_aug.size * w_aug.dtype.itemsize
                      + N * Cout * HoWo * jnp.dtype(out_dtype).itemsize)

    out_flat = pl.pallas_call(
        partial(_conv_relu_kernel, K=K, pad=padding),
        out_shape=jax.ShapeDtypeStruct((N, Cout, HoWo), out_dtype),
        grid_spec=pltpu.PrefetchScalarGridSpec(
            num_scalar_prefetch=0,
            grid=(grid_steps,),
            in_specs=[
                pl.BlockSpec((NB, Cin, H, W), lambda g: (g, 0, 0, 0)),
                pl.BlockSpec((Cout, kc), lambda g: (0, 0)),
            ],
            out_specs=pl.BlockSpec((NB, Cout, HoWo), lambda g: (g, 0, 0)),
            scratch_shapes=[
                pltpu.VMEM((NB, Cin, Hp, Wp), compute_dtype),
                pltpu.VMEM((kc, NB * HoWo), compute_dtype),
            ],
        ),
        compiler_params=pltpu.CompilerParams(
            dimension_semantics=("parallel",)),
        cost_estimate=pl.CostEstimate(
            flops=flops, transcendentals=0, bytes_accessed=bytes_accessed),
    )(x_nchw, w_aug)

    # (N, Cout, Ho*Wo) -> (N, Cout, Ho, Wo): metadata-only split, no transpose.
    return out_flat.reshape(N, Cout, Ho, Wo)


def _reference_conv_relu(x_nchw, weight_oihw, bias, padding):
    out = jax.lax.conv_general_dilated(
        x_nchw, weight_oihw,
        window_strides=(1, 1),
        padding=[(padding, padding), (padding, padding)],
        dimension_numbers=("NCHW", "OIHW", "NCHW"))
    out = out + bias[None, :, None, None]
    return jnp.maximum(out, 0.0)


if __name__ == "__main__":
    # Shapes consistent with the module: Conv2dReLU(in_chnl=4, out_chnl=8,
    # kernel_size=3, padding=1) applied to x of shape (2, 4, 16, 16).
    N, Cin, H, W = 2, 4, 16, 16
    Cout, K, padding = 8, 3, 1

    key = jax.random.PRNGKey(0)
    kx, kw, kb = jax.random.split(key, 3)

    x = jax.random.normal(kx, (N, Cin, H, W), dtype=jnp.float32)

    # Deterministic parameter init mimicking nn.Conv2d default
    # (kaiming-uniform: U(-1/sqrt(fan_in), 1/sqrt(fan_in))).
    fan_in = Cin * K * K
    bound = 1.0 / math.sqrt(fan_in)
    weight = jax.random.uniform(kw, (Cout, Cin, K, K), jnp.float32, -bound, bound)
    bias = jax.random.uniform(kb, (Cout,), jnp.float32, -bound, bound)

    ref = _reference_conv_relu(x, weight, bias, padding)

    # f32, single grid step (whole batch folded into lanes): exact-ish match.
    out = jax.block_until_ready(conv2d_relu_pallas(x, weight, bias, padding))
    assert out.shape == (N, Cout, H, W), out.shape
    assert jnp.allclose(out, ref, atol=5e-5, rtol=1e-5), "f32 mismatch vs reference conv"

    # f32, 2 grid steps (v7x-style two-TensorCore split): same result.
    out2 = jax.block_until_ready(
        conv2d_relu_pallas(x, weight, bias, padding, grid_steps=2))
    assert out2.shape == (N, Cout, H, W), out2.shape
    assert jnp.allclose(out2, ref, atol=5e-5, rtol=1e-5), "f32 (grid_steps=2) mismatch"

    # bf16 matmul operands / f32 accumulate (v6e/v7x MXU-native): loose tolerance.
    out_bf16 = jax.block_until_ready(
        conv2d_relu_pallas(x, weight, bias, padding, compute_dtype=jnp.bfloat16))
    assert out_bf16.shape == (N, Cout, H, W), out_bf16.shape
    assert jnp.allclose(out_bf16, ref, atol=5e-2, rtol=5e-2), "bf16 mismatch vs reference conv"

    print("KERNEL_OK")
</pallas_src>

<mosaic_0001>
module attributes {stable_mosaic.version = 11 : i64} {
  func.func @_conv_relu_kernel(%arg0: i32, %arg1: memref<2x4x16x16xf32, #tpu.memory_space<vmem>>, %arg2: memref<8x37xf32, #tpu.memory_space<vmem>>, %arg3: memref<2x8x256xf32, #tpu.memory_space<vmem>>, %arg4: memref<2x4x18x18xf32, #tpu.memory_space<vmem>>, %arg5: memref<37x512xf32, #tpu.memory_space<vmem>>) attributes {dimension_semantics = [#tpu.dimension_semantics<parallel>], iteration_bounds = array<i64: 1>, scalar_prefetch = 0 : i64, scratch_operands = 2 : i64, tpu.core_type = #tpu.core_type<tc>, window_params = [{transform_indices = @transform_0, window_bounds = array<i64: 2, 4, 16, 16>}, {pipeline_mode = #tpu.pipeline_mode<synchronous>, transform_indices = @transform_1, window_bounds = array<i64: 8, 37>}, {transform_indices = @transform_2, window_bounds = array<i64: 2, 8, 256>}]} {
    %cst = arith.constant 0.000000e+00 : f32
    %0 = vector.broadcast %cst : f32 to vector<2x4x1x18xf32>
    %c0 = arith.constant 0 : index
    %c0_0 = arith.constant 0 : index
    %c0_1 = arith.constant 0 : index
    %c0_2 = arith.constant 0 : index
    %1 = vector.load %arg4[%c0, %c0_0, %c0_1, %c0_2] : memref<2x4x18x18xf32, #tpu.memory_space<vmem>>, vector<2x4x1x18xf32>
    tpu.vector_store %arg4[%c0, %c0_0, %c0_1, %c0_2], %0 {strides = array<i32>} : memref<2x4x18x18xf32, #tpu.memory_space<vmem>>, vector<2x4x1x18xf32>,
    %cst_3 = arith.constant 0.000000e+00 : f32
    %2 = vector.broadcast %cst_3 : f32 to vector<2x4x1x18xf32>
    %c0_4 = arith.constant 0 : index
    %c0_5 = arith.constant 0 : index
    %c17 = arith.constant 17 : index
    %c0_6 = arith.constant 0 : index
    %3 = vector.load %arg4[%c0_4, %c0_5, %c17, %c0_6] : memref<2x4x18x18xf32, #tpu.memory_space<vmem>>, vector<2x4x1x18xf32>
    tpu.vector_store %arg4[%c0_4, %c0_5, %c17, %c0_6], %2 {strides = array<i32>} : memref<2x4x18x18xf32, #tpu.memory_space<vmem>>, vector<2x4x1x18xf32>,
    %cst_7 = arith.constant 0.000000e+00 : f32
    %4 = vector.broadcast %cst_7 : f32 to vector<2x4x18x1xf32>
    %c0_8 = arith.constant 0 : index
    %c0_9 = arith.constant 0 : index
    %c0_10 = arith.constant 0 : index
    %c0_11 = arith.constant 0 : index
    %5 = vector.load %arg4[%c0_8, %c0_9, %c0_10, %c0_11] : memref<2x4x18x18xf32, #tpu.memory_space<vmem>>, vector<2x4x18x1xf32>
    tpu.vector_store %arg4[%c0_8, %c0_9, %c0_10, %c0_11], %4 {strides = array<i32>} : memref<2x4x18x18xf32, #tpu.memory_space<vmem>>, vector<2x4x18x1xf32>,
    %cst_12 = arith.constant 0.000000e+00 : f32
    %6 = vector.broadcast %cst_12 : f32 to vector<2x4x18x1xf32>
    %c0_13 = arith.constant 0 : index
    %c0_14 = arith.constant 0 : index
    %c0_15 = arith.constant 0 : index
    %c17_16 = arith.constant 17 : index
    %7 = vector.load %arg4[%c0_13, %c0_14, %c0_15, %c17_16] : memref<2x4x18x18xf32, #tpu.memory_space<vmem>>, vector<2x4x18x1xf32>
    tpu.vector_store %arg4[%c0_13, %c0_14, %c0_15, %c17_16], %6 {strides = array<i32>} : memref<2x4x18x18xf32, #tpu.memory_space<vmem>>, vector<2x4x18x1xf32>,
    %c0_17 = arith.constant 0 : index
    %c0_18 = arith.constant 0 : index
    %c0_19 = arith.constant 0 : index
    %c0_20 = arith.constant 0 : index
    %8 = vector.load %arg1[%c0_17, %c0_18, %c0_19, %c0_20] : memref<2x4x16x16xf32, #tpu.memory_space<vmem>>, vector<2x4x16x16xf32>
    %c0_21 = arith.constant 0 : index
    %c0_22 = arith.constant 0 : index
    %c1 = arith.constant 1 : index
    %c1_23 = arith.constant 1 : index
    %9 = vector.load %arg4[%c0_21, %c0_22, %c1, %c1_23] : memref<2x4x18x18xf32, #tpu.memory_space<vmem>>, vector<2x4x16x16xf32>
    tpu.vector_store %arg4[%c0_21, %c0_22, %c1, %c1_23], %8 {strides = array<i32>} : memref<2x4x18x18xf32, #tpu.memory_space<vmem>>, vector<2x4x16x16xf32>,
    %cst_24 = arith.constant 1.000000e+00 : f32
    %10 = vector.broadcast %cst_24 : f32 to vector<1x512xf32>
    %c36 = arith.constant 36 : index
    %c0_25 = arith.constant 0 : index
    %11 = vector.load %arg5[%c36, %c0_25] : memref<37x512xf32, #tpu.memory_space<vmem>>, vector<1x512xf32>
    tpu.vector_store %arg5[%c36, %c0_25], %10 {strides = array<i32>} : memref<37x512xf32, #tpu.memory_space<vmem>>, vector<1x512xf32>,
    %c0_26 = arith.constant 0 : index
    %c0_27 = arith.constant 0 : index
    %c0_28 = arith.constant 0 : index
    %c0_29 = arith.constant 0 : index
    %12 = vector.load %arg4[%c0_26, %c0_27, %c0_28, %c0_29] : memref<2x4x18x18xf32, #tpu.memory_space<vmem>>, vector<1x4x18x18xf32>
    %13 = vector.shape_cast %12 : vector<1x4x18x18xf32> to vector<4x18x18xf32>
    %14 = vector.extract_strided_slice %13 {offsets = [0, 0, 0], sizes = [4, 16, 16], strides = [1, 1, 1]} : vector<4x18x18xf32> to vector<4x16x16xf32>
    %15 = vector.shape_cast %14 : vector<4x16x16xf32> to vector<4x256xf32>
    %c0_30 = arith.constant 0 : index
    %c0_31 = arith.constant 0 : index
    %16 = vector.load %arg5[%c0_30, %c0_31] : memref<37x512xf32, #tpu.memory_space<vmem>>, vector<4x256xf32>
    tpu.vector_store %arg5[%c0_30, %c0_31], %15 {strides = array<i32>} : memref<37x512xf32, #tpu.memory_space<vmem>>, vector<4x256xf32>,
    %17 = vector.extract_strided_slice %13 {offsets = [0, 0, 1], sizes = [4, 16, 16], strides = [1, 1, 1]} : vector<4x18x18xf32> to vector<4x16x16xf32>
    %18 = vector.shape_cast %17 : vector<4x16x16xf32> to vector<4x256xf32>
    %c4 = arith.constant 4 : index
    %c0_32 = arith.constant 0 : index
    %19 = vector.load %arg5[%c4, %c0_32] : memref<37x512xf32, #tpu.memory_space<vmem>>, vector<4x256xf32>
    tpu.vector_store %arg5[%c4, %c0_32], %18 {strides = array<i32>} : memref<37x512xf32, #tpu.memory_space<vmem>>, vector<4x256xf32>,
    %20 = vector.extract_strided_slice %13 {offsets = [0, 0, 2], sizes = [4, 16, 16], strides = [1, 1, 1]} : vector<4x18x18xf32> to vector<4x16x16xf32>
    %21 = vector.shape_cast %20 : vector<4x16x16xf32> to vector<4x256xf32>
    %c8 = arith.constant 8 : index
    %c0_33 = arith.constant 0 : index
    %22 = vector.load %arg5[%c8, %c0_33] : memref<37x512xf32, #tpu.memory_space<vmem>>, vector<4x256xf32>
    tpu.vector_store %arg5[%c8, %c0_33], %21 {strides = array<i32>} : memref<37x512xf32, #tpu.memory_space<vmem>>, vector<4x256xf32>,
    %23 = vector.extract_strided_slice %13 {offsets = [0, 1, 0], sizes = [4, 16, 16], strides = [1, 1, 1]} : vector<4x18x18xf32> to vector<4x16x16xf32>
    %24 = vector.shape_cast %23 : vector<4x16x16xf32> to vector<4x256xf32>
    %c12 = arith.constant 12 : index
    %c0_34 = arith.constant 0 : index
    %25 = vector.load %arg5[%c12, %c0_34] : memref<37x512xf32, #tpu.memory_space<vmem>>, vector<4x256xf32>
    tpu.vector_store %arg5[%c12, %c0_34], %24 {strides = array<i32>} : memref<37x512xf32, #tpu.memory_space<vmem>>, vector<4x256xf32>,
    %26 = vector.extract_strided_slice %13 {offsets = [0, 1, 1], sizes = [4, 16, 16], strides = [1, 1, 1]} : vector<4x18x18xf32> to vector<4x16x16xf32>
    %27 = vector.shape_cast %26 : vector<4x16x16xf32> to vector<4x256xf32>
    %c16 = arith.constant 16 : index
    %c0_35 = arith.constant 0 : index
    %28 = vector.load %arg5[%c16, %c0_35] : memref<37x512xf32, #tpu.memory_space<vmem>>, vector<4x256xf32>
    tpu.vector_store %arg5[%c16, %c0_35], %27 {strides = array<i32>} : memref<37x512xf32, #tpu.memory_space<vmem>>, vector<4x256xf32>,
    %29 = vector.extract_strided_slice %13 {offsets = [0, 1, 2], sizes = [4, 16, 16], strides = [1, 1, 1]} : vector<4x18x18xf32> to vector<4x16x16xf32>
    %30 = vector.shape_cast %29 : vector<4x16x16xf32> to vector<4x256xf32>
    %c20 = arith.constant 20 : index
    %c0_36 = arith.constant 0 : index
    %31 = vector.load %arg5[%c20, %c0_36] : memref<37x512xf32, #tpu.memory_space<vmem>>, vector<4x256xf32>
    tpu.vector_store %arg5[%c20, %c0_36], %30 {strides = array<i32>} : memref<37x512xf32, #tpu.memory_space<vmem>>, vector<4x256xf32>,
    %32 = vector.extract_strided_slice %13 {offsets = [0, 2, 0], sizes = [4, 16, 16], strides = [1, 1, 1]} : vector<4x18x18xf32> to vector<4x16x16xf32>
    %33 = vector.shape_cast %32 : vector<4x16x16xf32> to vector<4x256xf32>
    %c24 = arith.constant 24 : index
    %c0_37 = arith.constant 0 : index
    %34 = vector.load %arg5[%c24, %c0_37] : memref<37x512xf32, #tpu.memory_space<vmem>>, vector<4x256xf32>
    tpu.vector_store %arg5[%c24, %c0_37], %33 {strides = array<i32>} : memref<37x512xf32, #tpu.memory_space<vmem>>, vector<4x256xf32>,
    %35 = vector.extract_strided_slice %13 {offsets = [0, 2, 1], sizes = [4, 16, 16], strides = [1, 1, 1]} : vector<4x18x18xf32> to vector<4x16x16xf32>
    %36 = vector.shape_cast %35 : vector<4x16x16xf32> to vector<4x256xf32>
    %c28 = arith.constant 28 : index
    %c0_38 = arith.constant 0 : index
    %37 = vector.load %arg5[%c28, %c0_38] : memref<37x512xf32, #tpu.memory_space<vmem>>, vector<4x256xf32>
    tpu.vector_store %arg5[%c28, %c0_38], %36 {strides = array<i32>} : memref<37x512xf32, #tpu.memory_space<vmem>>, vector<4x256xf32>,
    %38 = vector.extract_strided_slice %13 {offsets = [0, 2, 2], sizes = [4, 16, 16], strides = [1, 1, 1]} : vector<4x18x18xf32> to vector<4x16x16xf32>
    %39 = vector.shape_cast %38 : vector<4x16x16xf32> to vector<4x256xf32>
    %c32 = arith.constant 32 : index
    %c0_39 = arith.constant 0 : index
    %40 = vector.load %arg5[%c32, %c0_39] : memref<37x512xf32, #tpu.memory_space<vmem>>, vector<4x256xf32>
    tpu.vector_store %arg5[%c32, %c0_39], %39 {strides = array<i32>} : memref<37x512xf32, #tpu.memory_space<vmem>>, vector<4x256xf32>,
    %c1_40 = arith.constant 1 : index
    %c0_41 = arith.constant 0 : index
    %c0_42 = arith.constant 0 : index
    %c0_43 = arith.constant 0 : index
    %41 = vector.load %arg4[%c1_40, %c0_41, %c0_42, %c0_43] : memref<2x4x18x18xf32, #tpu.memory_space<vmem>>, vector<1x4x18x18xf32>
    %42 = vector.shape_cast %41 : vector<1x4x18x18xf32> to vector<4x18x18xf32>
    %43 = vector.extract_strided_slice %42 {offsets = [0, 0, 0], sizes = [4, 16, 16], strides = [1, 1, 1]} : vector<4x18x18xf32> to vector<4x16x16xf32>
    %44 = vector.shape_cast %43 : vector<4x16x16xf32> to vector<4x256xf32>
    %c0_44 = arith.constant 0 : index
    %c256 = arith.constant 256 : index
    %45 = vector.load %arg5[%c0_44, %c256] : memref<37x512xf32, #tpu.memory_space<vmem>>, vector<4x256xf32>
    tpu.vector_store %arg5[%c0_44, %c256], %44 {strides = array<i32>} : memref<37x512xf32, #tpu.memory_space<vmem>>, vector<4x256xf32>,
    %46 = vector.extract_strided_slice %42 {offsets = [0, 0, 1], sizes = [4, 16, 16], strides = [1, 1, 1]} : vector<4x18x18xf32> to vector<4x16x16xf32>
    %47 = vector.shape_cast %46 : vector<4x16x16xf32> to vector<4x256xf32>
    %c4_45 = arith.constant 4 : index
    %c256_46 = arith.constant 256 : index
    %48 = vector.load %arg5[%c4_45, %c256_46] : memref<37x512xf32, #tpu.memory_space<vmem>>, vector<4x256xf32>
    tpu.vector_store %arg5[%c4_45, %c256_46], %47 {strides = array<i32>} : memref<37x512xf32, #tpu.memory_space<vmem>>, vector<4x256xf32>,
    %49 = vector.extract_strided_slice %42 {offsets = [0, 0, 2], sizes = [4, 16, 16], strides = [1, 1, 1]} : vector<4x18x18xf32> to vector<4x16x16xf32>
    %50 = vector.shape_cast %49 : vector<4x16x16xf32> to vector<4x256xf32>
    %c8_47 = arith.constant 8 : index
    %c256_48 = arith.constant 256 : index
    %51 = vector.load %arg5[%c8_47, %c256_48] : memref<37x512xf32, #tpu.memory_space<vmem>>, vector<4x256xf32>
    tpu.vector_store %arg5[%c8_47, %c256_48], %50 {strides = array<i32>} : memref<37x512xf32, #tpu.memory_space<vmem>>, vector<4x256xf32>,
    %52 = vector.extract_strided_slice %42 {offsets = [0, 1, 0], sizes = [4, 16, 16], strides = [1, 1, 1]} : vector<4x18x18xf32> to vector<4x16x16xf32>
    %53 = vector.shape_cast %52 : vector<4x16x16xf32> to vector<4x256xf32>
    %c12_49 = arith.constant 12 : index
    %c256_50 = arith.constant 256 : index
    %54 = vector.load %arg5[%c12_49, %c256_50] : memref<37x512xf32, #tpu.memory_space<vmem>>, vector<4x256xf32>
    tpu.vector_store %arg5[%c12_49, %c256_50], %53 {strides = array<i32>} : memref<37x512xf32, #tpu.memory_space<vmem>>, vector<4x256xf32>,
    %55 = vector.extract_strided_slice %42 {offsets = [0, 1, 1], sizes = [4, 16, 16], strides = [1, 1, 1]} : vector<4x18x18xf32> to vector<4x16x16xf32>
    %56 = vector.shape_cast %55 : vector<4x16x16xf32> to vector<4x256xf32>
    %c16_51 = arith.constant 16 : index
    %c256_52 = arith.constant 256 : index
    %57 = vector.load %arg5[%c16_51, %c256_52] : memref<37x512xf32, #tpu.memory_space<vmem>>, vector<4x256xf32>
    tpu.vector_store %arg5[%c16_51, %c256_52], %56 {strides = array<i32>} : memref<37x512xf32, #tpu.memory_space<vmem>>, vector<4x256xf32>,
    %58 = vector.extract_strided_slice %42 {offsets = [0, 1, 2], sizes = [4, 16, 16], strides = [1, 1, 1]} : vector<4x18x18xf32> to vector<4x16x16xf32>
    %59 = vector.shape_cast %58 : vector<4x16x16xf32> to vector<4x256xf32>
    %c20_53 = arith.constant 20 : index
    %c256_54 = arith.constant 256 : index
    %60 = vector.load %arg5[%c20_53, %c256_54] : memref<37x512xf32, #tpu.memory_space<vmem>>, vector<4x256xf32>
    tpu.vector_store %arg5[%c20_53, %c256_54], %59 {strides = array<i32>} : memref<37x512xf32, #tpu.memory_space<vmem>>, vector<4x256xf32>,
    %61 = vector.extract_strided_slice %42 {offsets = [0, 2, 0], sizes = [4, 16, 16], strides = [1, 1, 1]} : vector<4x18x18xf32> to vector<4x16x16xf32>
    %62 = vector.shape_cast %61 : vector<4x16x16xf32> to vector<4x256xf32>
    %c24_55 = arith.constant 24 : index
    %c256_56 = arith.constant 256 : index
    %63 = vector.load %arg5[%c24_55, %c256_56] : memref<37x512xf32, #tpu.memory_space<vmem>>, vector<4x256xf32>
    tpu.vector_store %arg5[%c24_55, %c256_56], %62 {strides = array<i32>} : memref<37x512xf32, #tpu.memory_space<vmem>>, vector<4x256xf32>,
    %64 = vector.extract_strided_slice %42 {offsets = [0, 2, 1], sizes = [4, 16, 16], strides = [1, 1, 1]} : vector<4x18x18xf32> to vector<4x16x16xf32>
    %65 = vector.shape_cast %64 : vector<4x16x16xf32> to vector<4x256xf32>
    %c28_57 = arith.constant 28 : index
    %c256_58 = arith.constant 256 : index
    %66 = vector.load %arg5[%c28_57, %c256_58] : memref<37x512xf32, #tpu.memory_space<vmem>>, vector<4x256xf32>
    tpu.vector_store %arg5[%c28_57, %c256_58], %65 {strides = array<i32>} : memref<37x512xf32, #tpu.memory_space<vmem>>, vector<4x256xf32>,
    %67 = vector.extract_strided_slice %42 {offsets = [0, 2, 2], sizes = [4, 16, 16], strides = [1, 1, 1]} : vector<4x18x18xf32> to vector<4x16x16xf32>
    %68 = vector.shape_cast %67 : vector<4x16x16xf32> to vector<4x256xf32>
    %c32_59 = arith.constant 32 : index
    %c256_60 = arith.constant 256 : index
    %69 = vector.load %arg5[%c32_59, %c256_60] : memref<37x512xf32, #tpu.memory_space<vmem>>, vector<4x256xf32>
    tpu.vector_store %arg5[%c32_59, %c256_60], %68 {strides = array<i32>} : memref<37x512xf32, #tpu.memory_space<vmem>>, vector<4x256xf32>,
    %c0_61 = arith.constant 0 : index
    %c0_62 = arith.constant 0 : index
    %70 = vector.load %arg2[%c0_61, %c0_62] : memref<8x37xf32, #tpu.memory_space<vmem>>, vector<8x37xf32>
    %c0_63 = arith.constant 0 : index
    %c0_64 = arith.constant 0 : index
    %71 = vector.load %arg5[%c0_63, %c0_64] : memref<37x512xf32, #tpu.memory_space<vmem>>, vector<37x512xf32>
    %cst_65 = arith.constant dense<0.000000e+00> : vector<8x512xf32>
    %72 = tpu.matmul %70, %71, %cst_65 {dimension_numbers = #tpu.dot_dimension_numbers<[1], [0], [0], [1], [0, 0, 1, 1], [], []>} : vector<8x37xf32>, vector<37x512xf32>, vector<8x512xf32> -> vector<8x512xf32>
    %cst_66 = arith.constant 0.000000e+00 : f32
    %73 = vector.broadcast %cst_66 : f32 to vector<8x512xf32>
    %74 = arith.maximumf %72, %73 : vector<8x512xf32>
    %75 = vector.extract_strided_slice %74 {offsets = [0, 0], sizes = [8, 256], strides = [1, 1]} : vector<8x512xf32> to vector<8x256xf32>
    %c0_67 = arith.constant 0 : index
    %c0_68 = arith.constant 0 : index
    %c0_69 = arith.constant 0 : index
    %76 = vector.load %arg3[%c0_67, %c0_68, %c0_69] : memref<2x8x256xf32, #tpu.memory_space<vmem>>, vector<1x8x256xf32>
    %77 = vector.shape_cast %76 : vector<1x8x256xf32> to vector<8x256xf32>
    %78 = vector.shape_cast %75 : vector<8x256xf32> to vector<1x8x256xf32>
    tpu.vector_store %arg3[%c0_67, %c0_68, %c0_69], %78 {strides = array<i32>} : memref<2x8x256xf32, #tpu.memory_space<vmem>>, vector<1x8x256xf32>,
    %79 = vector.extract_strided_slice %74 {offsets = [0, 256], sizes = [8, 256], strides = [1, 1]} : vector<8x512xf32> to vector<8x256xf32>
    %c1_70 = arith.constant 1 : index
    %c0_71 = arith.constant 0 : index
    %c0_72 = arith.constant 0 : index
    %80 = vector.load %arg3[%c1_70, %c0_71, %c0_72] : memref<2x8x256xf32, #tpu.memory_space<vmem>>, vector<1x8x256xf32>
    %81 = vector.shape_cast %80 : vector<1x8x256xf32> to vector<8x256xf32>
    %82 = vector.shape_cast %79 : vector<8x256xf32> to vector<1x8x256xf32>
    tpu.vector_store %arg3[%c1_70, %c0_71, %c0_72], %82 {strides = array<i32>} : memref<2x8x256xf32, #tpu.memory_space<vmem>>, vector<1x8x256xf32>,
    return
  }
  func.func @transform_0(%arg0: i32) -> (i32, i32, i32, i32) {
    %c0_i32 = arith.constant 0 : i32
    %c0_i32_0 = arith.constant 0 : i32
    %c0_i32_1 = arith.constant 0 : i32
    %c0_i32_2 = arith.constant 0 : i32
    return %arg0, %c0_i32, %c0_i32_0, %c0_i32_1 : i32, i32, i32, i32
  }
  func.func @transform_1(%arg0: i32) -> (i32, i32) {
    %c0_i32 = arith.constant 0 : i32
    %c0_i32_0 = arith.constant 0 : i32
    %c0_i32_1 = arith.constant 0 : i32
    return %c0_i32, %c0_i32_0 : i32, i32
  }
  func.func @transform_2(%arg0: i32) -> (i32, i32, i32) {
    %c0_i32 = arith.constant 0 : i32
    %c0_i32_0 = arith.constant 0 : i32
    %c0_i32_1 = arith.constant 0 : i32
    return %arg0, %c0_i32, %c0_i32_0 : i32, i32, i32
  }
}

</mosaic_0001>

<bundles_post_ra>
// kernel: tpu_custom_call.1
= control target key start
LH: loop header
LB: loop body
LE: loop exit
PB: predicated region body
PF: predicated region fallthrough
CT: control target
= control target key end

     0   :  { %7 = vsyncpa [#allocation5], 0  ;;  %s7481_s0 = inlined_call_operand.hbm [shape: f32[2,4,16,16], index: 0, kind: input, shape index: {}]   ;;  %s7482_s1 = inlined_call_operand.hbm [shape: f32[8,37], index: 1, kind: input, shape index: {}]   ;;  %s7483_s2 = inlined_call_operand.hbm [shape: f32[2,8,256], index: 2, kind: output, shape index: {}]  }
   0x1   :  { %8 = vsyncpa [#allocation8], 0 }
   0x2   :  { %9 = vsyncpa [#allocation6], 0  ;;  %s4796_s9 = smov [#allocation4]   ;;  %s4724_s13 = scalar_lea.hbm %s7481_s0, 2048 }
   0x3   :  { %s15_s10 = sshll.u32 %s4796_s9, 4  ;;  %p4725_p0 = scmp.ne.s32.totalorder %s7481_s0, %s4724_s13  ;;  %s16_s10 = int_to_ptr.vmem [resolvable:$true] %s15_s10 }
   0x4   :  { %p4728_p1 = scmp.lt.u32.totalorder %s4724_s13, %s7481_s0 }
   0x6   :  { %p4730_p2 = pnand %p4728_p1, %p4725_p0 }
   0x8   :  { %4733 = shalt.err (!%p4730_p2)
}
   0x9   :  { %s4734_s18 = scalar_lea.vmem %s16_s10, 2048  ;;  %p4739_p4 = scmp.lt.s32.totalorder %s16_s10, %s16_s10 }
   0xa   :  { %p4735_p3 = scmp.ne.s32.totalorder %s16_s10, %s4734_s18  ;;  %p4740_p5 = scmp.lt.s32.totalorder %s4734_s18, %s4734_s18 }
   0xc   :  { %p4741_p6 = por %p4740_p5, %p4739_p4 }
   0xe   :  { %p4742_p7 = pnand %p4741_p6, %p4735_p3 }
  0x10   :  { %4745 = shalt.err (!%p4742_p7)
}
  0x11   :  { %s4797_s19 = smov 128   ;;  %s4798_s20 = smov 8  }
  0x12   :  { %21 = dma.hbm_to_vmem [thread:$0]  %s7481_s0, 2048, %s16_s10, [#allocation5], %s4797_s19, %s4797_s19, %s4798_s20  }
  0x13   :  { %s4799_s23 = smov [#allocation7]   ;;  %s4746_s27 = scalar_lea.hbm %s7482_s1, 128 }
  0x14   :  { %s28_s24 = sshll.u32 %s4799_s23, 4  ;;  %p4747_p8 = scmp.ne.s32.totalorder %s7482_s1, %s4746_s27  ;;  %s29_s24 = int_to_ptr.vmem [resolvable:$true] %s28_s24 }
  0x15   :  { %p4750_p9 = scmp.lt.u32.totalorder %s4746_s27, %s7482_s1 }
  0x17   :  { %p4752_p10 = pnand %p4750_p9, %p4747_p8 }
  0x19   :  { %4755 = shalt.err (!%p4752_p10)
}
  0x1a   :  { %s4756_s4 = scalar_lea.vmem %s29_s24, 128  ;;  %p4761_p12 = scmp.lt.s32.totalorder %s29_s24, %s29_s24 }
  0x1b   :  { %p4757_p11 = scmp.ne.s32.totalorder %s29_s24, %s4756_s4  ;;  %p4762_p13 = scmp.lt.s32.totalorder %s4756_s4, %s4756_s4 }
  0x1d   :  { %p4763_p0 = por %p4762_p13, %p4761_p12 }
  0x1f   :  { %p4764_p1 = pnand %p4763_p0, %p4757_p11 }
  0x21   :  { %4767 = shalt.err (!%p4764_p1)
}
  0x22   :  { %31 = dma.hbm_to_vmem [thread:$0]  %s7482_s1, 128, %s29_s24, [#allocation8]  }
  0x23   :  { %4790 = dma.done.wait [#allocation5], 2048  }
  0x24   :  { %4791 = vsyncadd [#allocation5], 4294965248 }
  0x25   :  { %4792 = dma.done.wait [#allocation8], 128  }
  0x26   :  { %4793 = vsyncadd [#allocation8], 4294967168  ;;  %vm38_vm0 = vcmask 139264   ;;  %vm55_vm1 = vcmask 7168   ;;  %vm81_vm2 = vcmask 146568   ;;  %v7485_v0 = vmov 0.0  }
  0x27   :  { %40 = vst.msk [vmem:[#allocation2 + $0x18] sm:$0x1] %vm38_vm0, %v7485_v0  ;;  %39 = vst.msk [vmem:[#allocation2] sm:$0x1] %vm38_vm0, %v7485_v0  ;;  %vm58_vm3 = vcmask 1024   ;;  %vm84_vm4 = vcmask 140424   ;;  %4563 = vmatprep.mubr.f32.mxu0 %v7485_v0  ;;  %4634 = vmatprep.mubr.f32.mxu1 %v7485_v0 }
  0x28   :  { %61 = vst.msk [vmem:[#allocation2 + $0x20] sm:$0xff] %vm55_vm1, %v7485_v0  ;;  %57 = vst.msk [vmem:[#allocation2 + $0x8] sm:$0xff] %vm55_vm1, %v7485_v0  ;;  %v109_v1 = vld [vmem:[#allocation4 + $0x10] sm:$0xff]  ;;  %v107_v2 = vld [vmem:[#allocation4] sm:$0xff]  ;;  %s4801_s1 = smov 1   ;;  %vm187_vm5 = vcmask 138248  }
  0x29   :  { %41 = vst.msk [vmem:[#allocation2 + $0x30] sm:$0x1] %vm38_vm0, %v7485_v0  ;;  %42 = vst.msk [vmem:[#allocation2 + $0x48] sm:$0x1] %vm38_vm0, %v7485_v0  ;;  %143 = vrot.lane.b32.xlu1 %v109_v1, %s4801_s1  ;;  %139 = vrot.lane.b32.xlu0 %v107_v2, %s4801_s1  ;;  %v110_v3 = vld [vmem:[#allocation4 + $0x18] sm:$0xff]  ;;  %v108_v4 = vld [vmem:[#allocation4 + $0x8] sm:$0xff] }
  0x2a   :  { %43 = vst.msk [vmem:[#allocation2 + $0x60] sm:$0x1] %vm38_vm0, %v7485_v0  ;;  %44 = vst.msk [vmem:[#allocation2 + $0x78] sm:$0x1] %vm38_vm0, %v7485_v0  ;;  %v112_v5 = vld [vmem:[#allocation4 + $0x28] sm:$0xff]  ;;  %v111_v6 = vld [vmem:[#allocation4 + $0x20] sm:$0xff] }
  0x2b   :  { %45 = vst.msk [vmem:[#allocation2 + $0x90] sm:$0x1] %vm38_vm0, %v7485_v0  ;;  %46 = vst.msk [vmem:[#allocation2 + $0xa8] sm:$0x1] %vm38_vm0, %v7485_v0  ;;  %v114_v7 = vld [vmem:[#allocation4 + $0x38] sm:$0xff]  ;;  %v113_v8 = vld [vmem:[#allocation4 + $0x30] sm:$0xff] }
  0x2c   :  { %47 = vst.msk [vmem:[#allocation2 + $0x11] sm:$0x1] %vm38_vm0, %v7485_v0  ;;  %48 = vst.msk [vmem:[#allocation2 + $0x29] sm:$0x1] %vm38_vm0, %v7485_v0  ;;  %v116_v9 = vld [vmem:[#allocation4 + $0x48] sm:$0xff]  ;;  %v115_v10 = vld [vmem:[#allocation4 + $0x40] sm:$0xff] }
  0x2d   :  { %49 = vst.msk [vmem:[#allocation2 + $0x41] sm:$0x1] %vm38_vm0, %v7485_v0  ;;  %50 = vst.msk [vmem:[#allocation2 + $0x59] sm:$0x1] %vm38_vm0, %v7485_v0  ;;  %145 = vrot.lane.b32.xlu1 %v110_v3, %s4801_s1  ;;  %141 = vrot.lane.b32.xlu0 %v108_v4, %s4801_s1  ;;  %v118_v11 = vld [vmem:[#allocation4 + $0x58] sm:$0xff]  ;;  %v117_v12 = vld [vmem:[#allocation4 + $0x50] sm:$0xff] }
  0x2e   :  { %51 = vst.msk [vmem:[#allocation2 + $0x71] sm:$0x1] %vm38_vm0, %v7485_v0  ;;  %52 = vst.msk [vmem:[#allocation2 + $0x89] sm:$0x1] %vm38_vm0, %v7485_v0  ;;  %v120_v13 = vld [vmem:[#allocation4 + $0x68] sm:$0xff]  ;;  %v119_v14 = vld [vmem:[#allocation4 + $0x60] sm:$0xff] }
  0x2f   :  { %53 = vst.msk [vmem:[#allocation2 + $0xa1] sm:$0x1] %vm38_vm0, %v7485_v0  ;;  %54 = vst.msk [vmem:[#allocation2 + $0xb9] sm:$0x1] %vm38_vm0, %v7485_v0  ;;  %v122_v15 = vld [vmem:[#allocation4 + $0x78] sm:$0xff]  ;;  %v121_v16 = vld [vmem:[#allocation4 + $0x70] sm:$0xff] }
  0x30   :  { %64 = vst.msk [vmem:[#allocation2 + $0x38] sm:$0xff] %vm55_vm1, %v7485_v0  ;;  %67 = vst.msk [vmem:[#allocation2 + $0x50] sm:$0xff] %vm55_vm1, %v7485_v0  ;;  %s4802_s6 = smov 127   ;;  %vm1633_vm6 = vcmask 1045504   ;;  %s4803_s7 = smov 126   ;;  %vm920_vm7 = vcmask 1046528  }
  0x31   :  { %70 = vst.msk [vmem:[#allocation2 + $0x68] sm:$0xff] %vm55_vm1, %v7485_v0  ;;  %73 = vst.msk [vmem:[#allocation2 + $0x80] sm:$0xff] %vm55_vm1, %v7485_v0  ;;  %149 = vrot.lane.b32.xlu1 %v112_v5, %s4801_s1  ;;  %147 = vrot.lane.b32.xlu0 %v111_v6, %s4801_s1  ;;  %s4806_s8 = smov 32   ;;  %s4807_s9 = smov 64   ;;  %vm415_vm8 = vcmask 130048   ;;  %vm417_vm9 = vcmask 261120  }
  0x32   :  { %76 = vst.msk [vmem:[#allocation2 + $0x98] sm:$0xff] %vm55_vm1, %v7485_v0  ;;  %79 = vst.msk [vmem:[#allocation2 + $0xb0] sm:$0xff] %vm55_vm1, %v7485_v0  ;;  %s4808_s10 = smov 96   ;;  %s4809_s11 = smov 16   ;;  %vm419_vm10 = vcmask 392192   ;;  %vm421_vm11 = vcmask 523264  }
  0x33   :  { %60 = vst.msk [vmem:[#allocation2 + $0x18] sm:$0xff] %vm55_vm1, %v7485_v0  ;;  %56 = vst.msk [vmem:[#allocation2] sm:$0xff] %vm55_vm1, %v7485_v0  ;;  %s4810_s12 = smov 48   ;;  %s4811_s13 = smov 80   ;;  %vm423_vm12 = vcmask 654336   ;;  %vm425_vm13 = vcmask 785408  }
  0x34   :  { %87 = vst.msk [vmem:[#allocation2 + $0x20] sm:$0xff] %vm81_vm2, %v7485_v0  ;;  %83 = vst.msk [vmem:[#allocation2 + $0x8] sm:$0xff] %vm81_vm2, %v7485_v0  ;;  %s4812_s14 = smov 112   ;;  %vm427_vm14 = vcmask 916480   ;;  %vm4486_vm0 = vcmask 1044480   ;;  %s4814_s15 = smov [#allocation9]  }
  0x35   :  { %63 = vst.msk [vmem:[#allocation2 + $0x30] sm:$0xff] %vm55_vm1, %v7485_v0  ;;  %66 = vst.msk [vmem:[#allocation2 + $0x48] sm:$0xff] %vm55_vm1, %v7485_v0  ;;  %153 = vrot.lane.b32.xlu1 %v114_v7, %s4801_s1  ;;  %151 = vrot.lane.b32.xlu0 %v113_v8, %s4801_s1  ;;  %s4655_s16 = sshll.u32 %s4814_s15, 4  ;;  %s4656_s16 = int_to_ptr.vmem [resolvable:$true] %s4655_s16 }
  0x36   :  { %69 = vst.msk [vmem:[#allocation2 + $0x60] sm:$0xff] %vm55_vm1, %v7485_v0  ;;  %72 = vst.msk [vmem:[#allocation2 + $0x78] sm:$0xff] %vm55_vm1, %v7485_v0  ;;  %s4768_s17 = scalar_lea.vmem %s4656_s16, 512  ;;  %p4773_p3 = scmp.lt.s32.totalorder %s4656_s16, %s4656_s16 }
  0x37   :  { %75 = vst.msk [vmem:[#allocation2 + $0x90] sm:$0xff] %vm55_vm1, %v7485_v0  ;;  %78 = vst.msk [vmem:[#allocation2 + $0xa8] sm:$0xff] %vm55_vm1, %v7485_v0  ;;  %vm4482_vm1 = vcmask 302080   ;;  %p4769_p2 = scmp.ne.s32.totalorder %s4656_s16, %s4768_s17  ;;  %p4774_p4 = scmp.lt.s32.totalorder %s4768_s17, %s4768_s17 }
  0x38   :  { %90 = vst.msk [vmem:[#allocation2 + $0x38] sm:$0xff] %vm81_vm2, %v7485_v0  ;;  %93 = vst.msk [vmem:[#allocation2 + $0x50] sm:$0xff] %vm81_vm2, %v7485_v0 }
  0x39   :  { %96 = vst.msk [vmem:[#allocation2 + $0x68] sm:$0xff] %vm81_vm2, %v7485_v0  ;;  %99 = vst.msk [vmem:[#allocation2 + $0x80] sm:$0xff] %vm81_vm2, %v7485_v0  ;;  %157 = vrot.lane.b32.xlu1 %v116_v9, %s4801_s1  ;;  %155 = vrot.lane.b32.xlu0 %v115_v10, %s4801_s1  ;;  %p4775_p5 = por %p4774_p4, %p4773_p3 }
  0x3a   :  { %102 = vst.msk [vmem:[#allocation2 + $0x98] sm:$0xff] %vm81_vm2, %v7485_v0  ;;  %105 = vst.msk [vmem:[#allocation2 + $0xb0] sm:$0xff] %vm81_vm2, %v7485_v0 }
  0x3b   :  { %62 = vst.msk [vmem:[#allocation2 + $0x28] sm:$0x3] %vm58_vm3, %v7485_v0  ;;  %59 = vst.msk [vmem:[#allocation2 + $0x10] sm:$0x3] %vm58_vm3, %v7485_v0  ;;  %p4776_p6 = pnand %p4775_p5, %p4769_p2 }
  0x3c   :  { %65 = vst.msk [vmem:[#allocation2 + $0x40] sm:$0x3] %vm58_vm3, %v7485_v0  ;;  %68 = vst.msk [vmem:[#allocation2 + $0x58] sm:$0x3] %vm58_vm3, %v7485_v0 }
  0x3d   :  { %71 = vst.msk [vmem:[#allocation2 + $0x70] sm:$0x3] %vm58_vm3, %v7485_v0  ;;  %74 = vst.msk [vmem:[#allocation2 + $0x88] sm:$0x3] %vm58_vm3, %v7485_v0  ;;  %161 = vrot.lane.b32.xlu1 %v118_v11, %s4801_s1  ;;  %159 = vrot.lane.b32.xlu0 %v117_v12, %s4801_s1 }
  0x3e   :  { %77 = vst.msk [vmem:[#allocation2 + $0xa0] sm:$0x3] %vm58_vm3, %v7485_v0  ;;  %80 = vst.msk [vmem:[#allocation2 + $0xb8] sm:$0x3] %vm58_vm3, %v7485_v0 }
  0x3f   :  { %86 = vst.msk [vmem:[#allocation2 + $0x18] sm:$0xff] %vm81_vm2, %v7485_v0  ;;  %82 = vst.msk [vmem:[#allocation2] sm:$0xff] %vm81_vm2, %v7485_v0 }
  0x40   :  { %88 = vst.msk [vmem:[#allocation2 + $0x28] sm:$0x3] %vm84_vm4, %v7485_v0  ;;  %85 = vst.msk [vmem:[#allocation2 + $0x10] sm:$0x3] %vm84_vm4, %v7485_v0 }
  0x41   :  { %89 = vst.msk [vmem:[#allocation2 + $0x30] sm:$0xff] %vm81_vm2, %v7485_v0  ;;  %92 = vst.msk [vmem:[#allocation2 + $0x48] sm:$0xff] %vm81_vm2, %v7485_v0  ;;  %165 = vrot.lane.b32.xlu1 %v120_v13, %s4801_s1  ;;  %163 = vrot.lane.b32.xlu0 %v119_v14, %s4801_s1 }
  0x42   :  { %95 = vst.msk [vmem:[#allocation2 + $0x60] sm:$0xff] %vm81_vm2, %v7485_v0  ;;  %98 = vst.msk [vmem:[#allocation2 + $0x78] sm:$0xff] %vm81_vm2, %v7485_v0 }
  0x43   :  { %101 = vst.msk [vmem:[#allocation2 + $0x90] sm:$0xff] %vm81_vm2, %v7485_v0  ;;  %104 = vst.msk [vmem:[#allocation2 + $0xa8] sm:$0xff] %vm81_vm2, %v7485_v0 }
  0x44   :  { %91 = vst.msk [vmem:[#allocation2 + $0x40] sm:$0x3] %vm84_vm4, %v7485_v0  ;;  %94 = vst.msk [vmem:[#allocation2 + $0x58] sm:$0x3] %vm84_vm4, %v7485_v0 }
  0x45   :  { %97 = vst.msk [vmem:[#allocation2 + $0x70] sm:$0x3] %vm84_vm4, %v7485_v0  ;;  %100 = vst.msk [vmem:[#allocation2 + $0x88] sm:$0x3] %vm84_vm4, %v7485_v0  ;;  %169 = vrot.lane.b32.xlu1 %v122_v15, %s4801_s1  ;;  %167 = vrot.lane.b32.xlu0 %v121_v16, %s4801_s1 }
  0x46   :  { %103 = vst.msk [vmem:[#allocation2 + $0xa0] sm:$0x3] %vm84_vm4, %v7485_v0  ;;  %106 = vst.msk [vmem:[#allocation2 + $0xb8] sm:$0x3] %vm84_vm4, %v7485_v0 }
  0x9b   :  { %v144_v17 = vpop.permute.xlu1 %143  ;;  %v140_v18 = vpop.permute.xlu0 %139 }
  0x9c   :  { %190 = vst.msk [vmem:[#allocation2 + $0x19] sm:$0xff] %vm187_vm5, %v144_v17  ;;  %188 = vst.msk [vmem:[#allocation2 + $0x1] sm:$0xff] %vm187_vm5, %v140_v18  ;;  %v7484_v18 = vlaneseq }
  0x9f   :  { %v146_v19 = vpop.permute.xlu1 %145  ;;  %v142_v20 = vpop.permute.xlu0 %141 }
  0xa0   :  { %191 = vst.msk [vmem:[#allocation2 + $0x21] sm:$0xff] %vm187_vm5, %v146_v19  ;;  %189 = vst.msk [vmem:[#allocation2 + $0x9] sm:$0xff] %vm187_vm5, %v142_v20  ;;  %v4804_v19 = vmov 1983009808  }
  0xa1   :  { %v226_v20 = vunpack.c.l.s4 %v4804_v19 }
  0xa3   :  { %v150_v21 = vpop.permute.xlu1 %149  ;;  %v148_v22 = vpop.permute.xlu0 %147  ;;  %v4989_v23 = vld [vmem:[#allocation2] sm:$0xff]  ;;  %v4991_v24 = vld [vmem:[#allocation2 + $0x18] sm:$0xff] }
  0xa4   :  { %193 = vst.msk [vmem:[#allocation2 + $0x39] sm:$0xff] %vm187_vm5, %v150_v21  ;;  %192 = vst.msk [vmem:[#allocation2 + $0x31] sm:$0xff] %vm187_vm5, %v148_v22  ;;  %446 = vrot.lane.b32.xlu0 %v4989_v23, %s4802_s6  ;;  %v1639_v25 = vrot.slane %v4991_v24, 2  ;;  %v1634_v31 = vrot.slane %v4989_v23, 2  ;;  %v921_v1 = vrot.slane %v4989_v23, 1  ;;  %v926_v5 = vrot.slane %v4991_v24, 1 }
  0xa7   :  { %v154_v26 = vpop.permute.xlu1 %153  ;;  %v152_v27 = vpop.permute.xlu0 %151  ;;  %v4998_v28 = vld [vmem:[#allocation2 + $0x8] sm:$0xff]  ;;  %v5000_v29 = vld [vmem:[#allocation2 + $0x20] sm:$0xff]  ;;  %v5002_v30 = vld [vmem:[#allocation2 + $0x10] sm:$0x3] }
  0xa8   :  { %195 = vst.msk [vmem:[#allocation2 + $0x51] sm:$0xff] %vm187_vm5, %v154_v26  ;;  %194 = vst.msk [vmem:[#allocation2 + $0x49] sm:$0xff] %vm187_vm5, %v152_v27  ;;  %448 = vrot.lane.b32.xlu1 %v4998_v28, %s4802_s6  ;;  %v1635_v32 = vrot.slane %v4998_v28, 2  ;;  %450 = vrot.lane.b32.xlu0 %v4991_v24, %s4802_s6  ;;  %v1640_v33 = vrot.slane %v5000_v29, 2  ;;  %v5013_v34 = vld [vmem:[#allocation2 + $0x28] sm:$0x3]  ;;  %v227_v26 = vunpack.c.0.s8 %v226_v20 }
  0xa9   :  { %v1637_v35 = vrot.slane %v5002_v30, 2  ;;  %v1642_v36 = vrot.slane %v5013_v34, 2  ;;  %v922_v63 = vrot.slane %v4998_v28, 1  ;;  %v924_v4 = vrot.slane %v5002_v30, 1 }
  0xaa   :  { %v5018_v37 = vsel %vm1633_vm6, %v1634_v31, %v1635_v32  ;;  %v5021_v38 = vsel %vm1633_vm6, %v1639_v25, %v1640_v33  ;;  %v927_v6 = vrot.slane %v5000_v29, 1  ;;  %v929_v7 = vrot.slane %v5013_v34, 1 }
  0xab   :  { %v5023_v39 = vld [vmem:[#allocation2 + $0x30] sm:$0xff]  ;;  %v5025_v40 = vld [vmem:[#allocation2 + $0x38] sm:$0xff]  ;;  %v5028_v41 = vsel %vm1633_vm6, %v1635_v32, %v1637_v35  ;;  %v5031_v42 = vsel %vm1633_vm6, %v1640_v33, %v1642_v36  ;;  %v5033_v43 = vld [vmem:[#allocation2 + $0x40] sm:$0x3]  ;;  %v158_v44 = vpop.permute.xlu1 %157  ;;  %v156_v45 = vpop.permute.xlu0 %155  ;;  %v5091_v3 = vsel %vm920_vm7, %v921_v1, %v922_v63  ;;  %v5105_v9 = vsel %vm920_vm7, %v922_v63, %v924_v4 }
  0xac   :  { %452 = vrot.lane.b32.xlu1 %v5000_v29, %s4802_s6  ;;  %v1644_v46 = vrot.slane %v5023_v39, 2  ;;  %454 = vrot.lane.b32.xlu0 %v5023_v39, %s4802_s6  ;;  %v1645_v47 = vrot.slane %v5025_v40, 2  ;;  %197 = vst.msk [vmem:[#allocation2 + $0x69] sm:$0xff] %vm187_vm5, %v158_v44  ;;  %196 = vst.msk [vmem:[#allocation2 + $0x61] sm:$0xff] %vm187_vm5, %v156_v45  ;;  %v1647_v48 = vrot.slane %v5033_v43, 2  ;;  %v5108_v10 = vsel %vm920_vm7, %v926_v5, %v927_v6 }
  0xad   :  { %v931_v11 = vrot.slane %v5023_v39, 1  ;;  %v932_v12 = vrot.slane %v5025_v40, 1  ;;  %v5117_v13 = vsel %vm920_vm7, %v927_v6, %v929_v7  ;;  %v934_v15 = vrot.slane %v5033_v43, 1 }
  0xae   :  { %v5045_v49 = vsel %vm1633_vm6, %v1644_v46, %v1645_v47  ;;  %v5052_v52 = vsel %vm1633_vm6, %v1645_v47, %v1647_v48  ;;  %v229_v27 = vshrl.u32 %v7484_v18, 7  ;;  %v4805_v30 = vmov 1934713408  }
  0xaf   :  { %v5047_v50 = vld [vmem:[#allocation2 + $0x48] sm:$0xff]  ;;  %v5049_v51 = vld [vmem:[#allocation2 + $0x50] sm:$0xff]  ;;  %v5054_v53 = vld [vmem:[#allocation2 + $0x58] sm:$0x3]  ;;  %v162_v54 = vpop.permute.xlu1 %161  ;;  %v160_v55 = vpop.permute.xlu0 %159  ;;  %v5120_v14 = vsel %vm920_vm7, %v931_v11, %v932_v12  ;;  %v5130_v21 = vsel %vm920_vm7, %v932_v12, %v934_v15  ;;  %v258_v31 = vunpack.c.l.s4 %v4805_v30  ;;  %v291_v35 = vcombine.low %v4998_v28, %v5025_v40 }
  0xb0   :  { %456 = vrot.lane.b32.xlu1 %v5025_v40, %s4802_s6  ;;  %458 = vrot.lane.b32.xlu0 %v5047_v50, %s4802_s6  ;;  %v1650_v56 = vrot.slane %v5049_v51, 2  ;;  %199 = vst.msk [vmem:[#allocation2 + $0x81] sm:$0xff] %vm187_vm5, %v162_v54  ;;  %198 = vst.msk [vmem:[#allocation2 + $0x79] sm:$0xff] %vm187_vm5, %v160_v55  ;;  %v1652_v57 = vrot.slane %v5054_v53, 2  ;;  %v1649_v2 = vrot.slane %v5047_v50, 2  ;;  %v936_v16 = vrot.slane %v5047_v50, 1 }
  0xb1   :  { %v937_v17 = vrot.slane %v5049_v51, 1  ;;  %v939_v25 = vrot.slane %v5054_v53, 1  ;;  %v307_v32 = vcombine.low %v5000_v29, %v5049_v51  ;;  %v5150_v34 = vsub.s32 %v227_v26, %v229_v27 }
  0xb2   :  { %v5065_v58 = vsel %vm1633_vm6, %v1650_v56, %v1652_v57  ;;  %v5102_v8 = vsel %vm1633_vm6, %v1649_v2, %v1650_v56  ;;  %v259_v36 = vunpack.c.0.s8 %v258_v31  ;;  %v308_v44 = vcombine.high %v5000_v29, %v5049_v51 }
  0xb3   :  { %v166_v59 = vpop.permute.xlu1 %165  ;;  %v164_v60 = vpop.permute.xlu0 %163  ;;  %v5133_v22 = vsel %vm920_vm7, %v936_v16, %v937_v17  ;;  %v5144_v33 = vsel %vm920_vm7, %v937_v17, %v939_v25  ;;  %v315_v43 = vrot.slane %v307_v32, %v5150_v34  ;;  %v239_v45 = vcombine.low %v4991_v24, %v5047_v50 }
  0xb4   :  { %460 = vrot.lane.b32.xlu1 %v5049_v51, %s4802_s6  ;;  %684 = vrot.lane.b32.xlu0 %v4989_v23, %s4803_s7  ;;  %201 = vst.msk [vmem:[#allocation2 + $0x99] sm:$0xff] %vm187_vm5, %v166_v59  ;;  %200 = vst.msk [vmem:[#allocation2 + $0x91] sm:$0xff] %vm187_vm5, %v164_v60  ;;  %v299_v46 = vrot.slane %v291_v35, %v5150_v34  ;;  %v292_v47 = vcombine.high %v4998_v28, %v5025_v40 }
  0xb5   :  { %v223_v48 = vcombine.low %v4989_v23, %v5023_v39  ;;  %v5168_v53 = vsub.s32 %v259_v36, %v229_v27  ;;  %v247_v54 = vrot.slane %v239_v45, %v5150_v34  ;;  %v240_v55 = vcombine.high %v4991_v24, %v5047_v50 }
  0xb6   :  { %v224_v56 = vcombine.high %v4989_v23, %v5023_v39  ;;  %v323_v1 = vcombine.low %v299_v46, %v315_v43  ;;  %v1033_v15 = vcombine.low %v5117_v13, %v5144_v33  ;;  %v1017_v19 = vcombine.low %v5105_v9, %v5130_v21 }
  0xb7   :  { %v170_v61 = vpop.permute.xlu1 %169  ;;  %v168_v62 = vpop.permute.xlu0 %167  ;;  %v965_v25 = vcombine.low %v5108_v10, %v5133_v22  ;;  %v1034_v26 = vcombine.high %v5117_v13, %v5144_v33  ;;  %v949_v32 = vcombine.low %v5091_v3, %v5120_v14  ;;  %v1018_v35 = vcombine.high %v5105_v9, %v5130_v21 }
  0xb8   :  { %686 = vrot.lane.b32.xlu1 %v4998_v28, %s4803_s7  ;;  %688 = vrot.lane.b32.xlu0 %v4991_v24, %s4803_s7  ;;  %203 = vst.msk [vmem:[#allocation2 + $0xb1] sm:$0xff] %vm187_vm5, %v170_v61  ;;  %202 = vst.msk [vmem:[#allocation2 + $0xa9] sm:$0xff] %vm187_vm5, %v168_v62  ;;  %v306_v28 = vrot.slane %v292_v47, %v5150_v34  ;;  %v254_v61 = vrot.slane %v240_v55, %v5150_v34 }
  0xb9   :  { %v238_v24 = vrot.slane %v224_v56, %v5150_v34  ;;  %v5203_v12 = vrot.slane %v323_v1, %v5168_v53  ;;  %v1041_v20 = vrot.slane %v1033_v15, %v5150_v34  ;;  %v1025_v31 = vrot.slane %v1017_v19, %v5150_v34 }
  0xba   :  { %v973_v45 = vrot.slane %v965_v25, %v5150_v34 }
  0xbb   :  { %v271_v23 = vcombine.low %v238_v24, %v254_v61  ;;  %v272_v5 = vcombine.high %v238_v24, %v254_v61  ;;  %v355_v16 = vcombine.high %v5203_v12, %v7485_v0  ;;  %v1050_v36 = vcombine.high %v1025_v31, %v1041_v20 }
  0xbc   :  { %690 = vrot.lane.b32.xlu1 %v5000_v29, %s4803_s7  ;;  %692 = vrot.lane.b32.xlu0 %v5023_v39, %s4803_s7  ;;  %v324_v29 = vcombine.high %v299_v46, %v315_v43  ;;  %v1048_v46 = vrot.slane %v1034_v26, %v5150_v34 }
  0xbd   :  { %v279_v4 = vrot.slane %v271_v23, %v5168_v53  ;;  %v286_v7 = vrot.slane %v272_v5, %v5168_v53 }
  0xbe   :  { %v338_v57 = vrot.slane %v324_v29, %v5168_v53 }
  0xbf   :  { %v289_v30 = vcombine.high %v279_v4, %v7485_v0 }
  0xc0   :  { %694 = vrot.lane.b32.xlu1 %v5025_v40, %s4803_s7  ;;  %696 = vrot.lane.b32.xlu0 %v5047_v50, %s4803_s7  ;;  %v231_v40 = vrot.slane %v223_v48, %v5150_v34  ;;  %v356_v27 = vcombine.high %v338_v57, %v7485_v0  ;;  %v1064_v48 = vrot.slane %v1050_v36, %v5168_v53 }
  0xc2   :  { %v256_v60 = vcombine.high %v231_v40, %v247_v54  ;;  %v255_v39 = vcombine.low %v231_v40, %v247_v54  ;;  %v1082_v1 = vcombine.high %v1064_v48, %v7485_v0 }
  0xc4   :  { %698 = vrot.lane.b32.xlu1 %v5049_v51, %s4803_s7  ;;  %1163 = vrot.lane.b32.xlu0 %v5091_v3, %s4802_s6  ;;  %v322_v51 = vrot.slane %v308_v44, %v5150_v34  ;;  %v270_v63 = vrot.slane %v256_v60, %v5168_v53  ;;  %v5195_v6 = vrot.slane %v255_v39, %v5168_v53 }
  0xc5   :  { %v290_v44 = vcombine.high %v286_v7, %v7485_v0 }
  0xc6   :  { %v339_v59 = vcombine.low %v306_v28, %v322_v51  ;;  %v340_v50 = vcombine.high %v306_v28, %v322_v51  ;;  %v287_v11 = vcombine.high %v5195_v6, %v7485_v0  ;;  %v288_v17 = vcombine.high %v270_v63, %v7485_v0 }
  0xc8   :  { %1165 = vrot.lane.b32.xlu1 %v5105_v9, %s4802_s6  ;;  %1167 = vrot.lane.b32.xlu0 %v5108_v10, %s4802_s6  ;;  %v347_v62 = vrot.slane %v339_v59, %v5168_v53  ;;  %v354_v2 = vrot.slane %v340_v50, %v5168_v53 }
  0xca   :  { %v357_v43 = vcombine.high %v347_v62, %v7485_v0  ;;  %v358_v47 = vcombine.high %v354_v2, %v7485_v0 }
  0xcc   :  { %1169 = vrot.lane.b32.xlu1 %v5117_v13, %s4802_s6  ;;  %1171 = vrot.lane.b32.xlu0 %v5120_v14, %s4802_s6 }
  0xd0   :  { %1173 = vrot.lane.b32.xlu1 %v5130_v21, %s4802_s6  ;;  %1175 = vrot.lane.b32.xlu0 %v5133_v22, %s4802_s6 }
  0xd4   :  { %1177 = vrot.lane.b32.xlu1 %v5144_v33, %s4802_s6  ;;  %1395 = vrot.lane.b32.xlu0 %v5091_v3, %s4803_s7 }
  0xd8   :  { %1397 = vrot.lane.b32.xlu1 %v5105_v9, %s4803_s7  ;;  %1399 = vrot.lane.b32.xlu0 %v5108_v10, %s4803_s7  ;;  %v950_v9 = vcombine.high %v5091_v3, %v5120_v14 }
  0xda   :  { %v964_v3 = vrot.slane %v950_v9, %v5150_v34 }
  0xdc   :  { %1401 = vrot.lane.b32.xlu1 %v5117_v13, %s4803_s7  ;;  %1403 = vrot.lane.b32.xlu0 %v5120_v14, %s4803_s7  ;;  %v966_v13 = vcombine.high %v5108_v10, %v5133_v22  ;;  %v1032_v10 = vrot.slane %v1018_v35, %v5150_v34 }
  0xde   :  { %v1065_v51 = vcombine.low %v1032_v10, %v1048_v46  ;;  %v980_v54 = vrot.slane %v966_v13, %v5150_v34  ;;  %v1066_v56 = vcombine.high %v1032_v10, %v1048_v46 }
  0xe0   :  { %1405 = vrot.lane.b32.xlu1 %v5130_v21, %s4803_s7  ;;  %392 = vrot.lane.b32.xlu0 %v338_v57, %s4806_s8  ;;  %v957_v21 = vrot.slane %v949_v32, %v5150_v34  ;;  %v1073_v28 = vrot.slane %v1065_v51, %v5168_v53  ;;  %v997_v40 = vcombine.low %v964_v3, %v980_v54 }
  0xe1   :  { %v1049_v57 = vcombine.low %v1025_v31, %v1041_v20  ;;  %v1080_v60 = vrot.slane %v1066_v56, %v5168_v53  ;;  %v998_v61 = vcombine.high %v964_v3, %v980_v54 }
  0xe2   :  { %v982_v29 = vcombine.high %v957_v21, %v973_v45  ;;  %v981_v14 = vcombine.low %v957_v21, %v973_v45  ;;  %v1005_v59 = vrot.slane %v997_v40, %v5168_v53 }
  0xe3   :  { %v1012_v50 = vrot.slane %v998_v61, %v5168_v53 }
  0xe4   :  { %400 = vrot.lane.b32.xlu0 %v347_v62, %s4807_s9  ;;  %364 = vrot.lane.b32.xlu1 %v270_v63, %s4806_s8  ;;  %v996_v55 = vrot.slane %v982_v29, %v5168_v53  ;;  %v5255_v24 = vrot.slane %v981_v14, %v5168_v53  ;;  %v5263_v63 = vrot.slane %v1049_v57, %v5168_v53 }
  0xe5   :  { %v1016_v5 = vcombine.high %v1012_v50, %v7485_v0 }
  0xe6   :  { %v1013_v62 = vcombine.high %v5255_v24, %v7485_v0  ;;  %v1081_v23 = vcombine.high %v5263_v63, %v7485_v0  ;;  %v1014_v39 = vcombine.high %v996_v55, %v7485_v0 }
  0xe8   :  { %408 = vrot.lane.b32.xlu0 %v354_v2, %s4808_s10  ;;  %372 = vrot.lane.b32.xlu1 %v279_v4, %s4807_s9  ;;  %v1015_v2 = vcombine.high %v1005_v59, %v7485_v0  ;;  %v1083_v4 = vcombine.high %v1073_v28, %v7485_v0 }
  0xec   :  { %380 = vrot.lane.b32.xlu1 %v286_v7, %s4808_s10  ;;  %360 = vrot.lane.b32.xlu0 %v287_v11, %s4809_s11  ;;  %v1084_v11 = vcombine.high %v1080_v60, %v7485_v0 }
  0xf0   :  { %388 = vrot.lane.b32.xlu1 %v355_v16, %s4809_s11  ;;  %368 = vrot.lane.b32.xlu0 %v288_v17, %s4810_s12 }
  0xf4   :  { %396 = vrot.lane.b32.xlu1 %v356_v27, %s4810_s12  ;;  %376 = vrot.lane.b32.xlu0 %v289_v30, %s4811_s13 }
  0xf8   :  { %404 = vrot.lane.b32.xlu1 %v357_v43, %s4811_s13  ;;  %384 = vrot.lane.b32.xlu0 %v290_v44, %s4812_s14 }
  0xfc   :  { %412 = vrot.lane.b32.xlu1 %v358_v47, %s4812_s14  ;;  %1118 = vrot.lane.b32.xlu0 %v1064_v48, %s4806_s8 }
 0x100   :  { %1090 = vrot.lane.b32.xlu1 %v996_v55, %s4806_s8  ;;  %1126 = vrot.lane.b32.xlu0 %v1073_v28, %s4807_s9 }
 0x104   :  { %1098 = vrot.lane.b32.xlu1 %v1005_v59, %s4807_s9  ;;  %1134 = vrot.lane.b32.xlu0 %v1080_v60, %s4808_s10 }
 0x108   :  { %1106 = vrot.lane.b32.xlu1 %v1012_v50, %s4808_s10  ;;  %1086 = vrot.lane.b32.xlu0 %v1013_v62, %s4809_s11 }
 0x10c   :  { %1114 = vrot.lane.b32.xlu1 %v1081_v23, %s4809_s11  ;;  %1094 = vrot.lane.b32.xlu0 %v1014_v39, %s4810_s12 }
 0x110   :  { %1122 = vrot.lane.b32.xlu1 %v1082_v1, %s4810_s12  ;;  %1102 = vrot.lane.b32.xlu0 %v1015_v2, %s4811_s13 }
 0x114   :  { %1130 = vrot.lane.b32.xlu1 %v1083_v4, %s4811_s13  ;;  %1110 = vrot.lane.b32.xlu0 %v1016_v5, %s4812_s14 }
 0x116   :  { %v447_v7 = vpop.permute.xlu0 %446 }
 0x118   :  { %1138 = vrot.lane.b32.xlu1 %v1084_v11, %s4812_s14  ;;  %1407 = vrot.lane.b32.xlu0 %v5133_v22, %s4803_s7 }
 0x11a   :  { %v449_v15 = vpop.permute.xlu1 %448  ;;  %v451_v16 = vpop.permute.xlu0 %450 }
 0x11c   :  { %1409 = vrot.lane.b32.xlu1 %v5144_v33, %s4803_s7 }
 0x11e   :  { %v453_v17 = vpop.permute.xlu1 %452  ;;  %v455_v19 = vpop.permute.xlu0 %454 }
 0x11f   :  { %v470_v20 = vcombine.low %v447_v7, %v455_v19  ;;  %v471_v27 = vcombine.high %v447_v7, %v455_v19 }
 0x121   :  { %v5287_v32 = vrot.slane %v470_v20, %v5150_v34  ;;  %v485_v33 = vrot.slane %v471_v27, %v5150_v34 }
 0x122   :  { %v457_v25 = vpop.permute.xlu1 %456  ;;  %v459_v26 = vpop.permute.xlu0 %458 }
 0x123   :  { %v486_v30 = vcombine.low %v451_v16, %v459_v26  ;;  %v487_v31 = vcombine.high %v451_v16, %v459_v26  ;;  %v538_v35 = vcombine.low %v449_v15, %v457_v25  ;;  %v539_v9 = vcombine.high %v449_v15, %v457_v25 }
 0x125   :  { %v5290_v13 = vrot.slane %v486_v30, %v5150_v34  ;;  %v501_v22 = vrot.slane %v487_v31, %v5150_v34  ;;  %v5297_v21 = vrot.slane %v538_v35, %v5150_v34  ;;  %v553_v14 = vrot.slane %v539_v9, %v5150_v34 }
 0x126   :  { %v461_v36 = vpop.permute.xlu1 %460  ;;  %v685_v43 = vpop.permute.xlu0 %684 }
 0x127   :  { %v554_v44 = vcombine.low %v453_v17, %v461_v36  ;;  %v555_v45 = vcombine.high %v453_v17, %v461_v36  ;;  %v503_v46 = vcombine.high %v5287_v32, %v5290_v13  ;;  %v518_v48 = vcombine.low %v485_v33, %v501_v22 }
 0x128   :  { %v519_v40 = vcombine.high %v485_v33, %v501_v22 }
 0x129   :  { %v562_v10 = vrot.slane %v554_v44, %v5150_v34  ;;  %v5301_v47 = vrot.slane %v503_v46, %v5168_v53  ;;  %v569_v29 = vrot.slane %v555_v45, %v5150_v34  ;;  %v5309_v55 = vrot.slane %v518_v48, %v5168_v53 }
 0x12a   :  { %v687_v51 = vpop.permute.xlu1 %686  ;;  %v689_v54 = vpop.permute.xlu0 %688  ;;  %v5319_v61 = vrot.slane %v519_v40, %v5168_v53 }
 0x12b   :  { %611 = vrot.lane.b32.xlu1 %v5301_v47, %s4806_s8  ;;  %v571_v3 = vcombine.high %v5297_v21, %v562_v10  ;;  %v586_v59 = vcombine.low %v553_v14, %v569_v29  ;;  %v587_v39 = vcombine.high %v553_v14, %v569_v29  ;;  %v570_v9 = vcombine.low %v5297_v21, %v562_v10 }
 0x12c   :  { %v502_v10 = vcombine.low %v5287_v32, %v5290_v13 }
 0x12d   :  { %v5312_v28 = vrot.slane %v571_v3, %v5168_v53  ;;  %v594_v23 = vrot.slane %v586_v59, %v5168_v53  ;;  %v601_v19 = vrot.slane %v587_v39, %v5168_v53  ;;  %v5368_v21 = vrot.slane %v570_v9, %v5168_v53 }
 0x12e   :  { %v691_v56 = vpop.permute.xlu1 %690  ;;  %v693_v57 = vpop.permute.xlu0 %692  ;;  %v5388_v13 = vrot.slane %v502_v10, %v5168_v53 }
 0x12f   :  { %619 = vrot.lane.b32.xlu1 %v5309_v55, %s4807_s9  ;;  %639 = vrot.lane.b32.xlu0 %v5312_v28, %s4806_s8  ;;  %v708_v60 = vcombine.low %v685_v43, %v693_v57  ;;  %v709_v1 = vcombine.high %v685_v43, %v693_v57 }
 0x131   :  { %v5326_v5 = vrot.slane %v708_v60, %v5150_v34  ;;  %v723_v20 = vrot.slane %v709_v1, %v5150_v34  ;;  %v603_v1 = vcombine.high %v5312_v28, %v7485_v0  ;;  %v535_v28 = vcombine.high %v5301_v47, %v7485_v0 }
 0x132   :  { %v695_v50 = vpop.permute.xlu1 %694  ;;  %v697_v62 = vpop.permute.xlu0 %696 }
 0x133   :  { %v724_v2 = vcombine.low %v689_v54, %v697_v62  ;;  %v725_v4 = vcombine.high %v689_v54, %v697_v62  ;;  %627 = vrot.lane.b32.xlu1 %v5319_v61, %s4808_s10  ;;  %647 = vrot.lane.b32.xlu0 %v594_v23, %s4807_s9  ;;  %v776_v7 = vcombine.low %v687_v51, %v695_v50 }
 0x134   :  { %v777_v30 = vcombine.high %v687_v51, %v695_v50  ;;  %v602_v50 = vcombine.high %v5368_v21, %v7485_v0 }
 0x135   :  { %v5329_v11 = vrot.slane %v724_v2, %v5150_v34  ;;  %v739_v15 = vrot.slane %v725_v4, %v5150_v34  ;;  %v784_v31 = vrot.slane %v776_v7, %v5150_v34  ;;  %v534_v7 = vcombine.high %v5388_v13, %v7485_v0 }
 0x136   :  { %v699_v16 = vpop.permute.xlu1 %698  ;;  %v5332_v17 = vpop.permute.xlu0 %1163  ;;  %v791_v46 = vrot.slane %v777_v30, %v5150_v34 }
 0x137   :  { %v792_v25 = vcombine.low %v691_v56, %v699_v16  ;;  %v793_v26 = vcombine.high %v691_v56, %v699_v16  ;;  %v741_v27 = vcombine.high %v5326_v5, %v5329_v11  ;;  %655 = vrot.lane.b32.xlu0 %v601_v19, %s4808_s10  ;;  %v756_v36 = vcombine.low %v723_v20, %v739_v15 }
 0x138   :  { %v757_v51 = vcombine.high %v723_v20, %v739_v15  ;;  %v604_v16 = vcombine.high %v594_v23, %v7485_v0  ;;  %v740_v30 = vcombine.low %v5326_v5, %v5329_v11 }
 0x139   :  { %v800_v35 = vrot.slane %v792_v25, %v5150_v34  ;;  %v5342_v22 = vrot.slane %v741_v27, %v5168_v53  ;;  %v807_v43 = vrot.slane %v793_v26, %v5150_v34  ;;  %v5354_v48 = vrot.slane %v756_v36, %v5168_v53 }
 0x13a   :  { %v5345_v33 = vpop.permute.xlu1 %1165  ;;  %v5347_v44 = vpop.permute.xlu0 %1167  ;;  %v5365_v40 = vrot.slane %v757_v51, %v5168_v53  ;;  %v605_v26 = vcombine.high %v601_v19, %v7485_v0  ;;  %v5430_v5 = vrot.slane %v740_v30, %v5168_v53 }
 0x13b   :  { %849 = vrot.lane.b32.xlu1 %v5342_v22, %s4806_s8  ;;  %v809_v45 = vcombine.high %v784_v31, %v800_v35  ;;  %v824_v14 = vcombine.low %v791_v46, %v807_v43  ;;  %v825_v60 = vcombine.high %v791_v46, %v807_v43  ;;  %v808_v15 = vcombine.low %v784_v31, %v800_v35 }
 0x13c   :  { %v536_v35 = vcombine.high %v5309_v55, %v7485_v0  ;;  %v537_v43 = vcombine.high %v5319_v61, %v7485_v0  ;;  %v772_v9 = vcombine.high %v5430_v5, %v7485_v0  ;;  %v773_v10 = vcombine.high %v5342_v22, %v7485_v0 }
 0x13d   :  { %v823_v29 = vrot.slane %v809_v45, %v5168_v53  ;;  %v832_v59 = vrot.slane %v824_v14, %v5168_v53  ;;  %v839_v32 = vrot.slane %v825_v60, %v5168_v53  ;;  %v5413_v27 = vrot.slane %v808_v15, %v5168_v53 }
 0x13e   :  { %v5357_v54 = vpop.permute.xlu1 %1169  ;;  %v5359_v3 = vpop.permute.xlu0 %1171 }
 0x13f   :  { %857 = vrot.lane.b32.xlu1 %v5354_v48, %s4807_s9  ;;  %877 = vrot.lane.b32.xlu0 %v823_v29, %s4806_s8  ;;  %v840_v47 = vcombine.high %v5413_v27, %v7485_v0  ;;  %v841_v55 = vcombine.high %v823_v29, %v7485_v0  ;;  %v1187_v61 = vcombine.low %v5332_v17, %v5359_v3 }
 0x140   :  { %v842_v14 = vcombine.high %v832_v59, %v7485_v0 }
 0x141   :  { %v5458_v15 = vrot.slane %v1187_v61, %v5150_v34 }
 0x142   :  { %v5372_v56 = vpop.permute.xlu1 %1173  ;;  %v5374_v57 = vpop.permute.xlu0 %1175 }
 0x143   :  { %865 = vrot.lane.b32.xlu1 %v5365_v40, %s4808_s10  ;;  %885 = vrot.lane.b32.xlu0 %v832_v59, %s4807_s9  ;;  %v1203_v11 = vcombine.low %v5347_v44, %v5374_v57  ;;  %v1204_v29 = vcombine.high %v5347_v44, %v5374_v57  ;;  %v1255_v22 = vcombine.low %v5345_v33, %v5372_v56 }
 0x144   :  { %v774_v59 = vcombine.high %v5354_v48, %v7485_v0  ;;  %v1256_v48 = vcombine.high %v5345_v33, %v5372_v56 }
 0x145   :  { %v5448_v51 = vrot.slane %v1203_v11, %v5150_v34  ;;  %v1218_v57 = vrot.slane %v1204_v29, %v5150_v34 }
 0x146   :  { %v5382_v62 = vpop.permute.xlu1 %1177  ;;  %v5384_v39 = vpop.permute.xlu0 %1395 }
 0x147   :  { %635 = vrot.lane.b32.xlu1 %v602_v50, %s4809_s11  ;;  %893 = vrot.lane.b32.xlu0 %v839_v32, %s4808_s10  ;;  %v1271_v60 = vcombine.low %v5357_v54, %v5382_v62 }
 0x14a   :  { %v5394_v2 = vpop.permute.xlu1 %1397  ;;  %v5396_v4 = vpop.permute.xlu0 %1399 }
 0x14b   :  { %643 = vrot.lane.b32.xlu1 %v603_v1, %s4810_s12  ;;  %607 = vrot.lane.b32.xlu0 %v534_v7, %s4809_s11  ;;  %v1188_v7 = vcombine.high %v5332_v17, %v5359_v3  ;;  %v1220_v17 = vcombine.high %v5458_v15, %v5448_v51  ;;  %v843_v3 = vcombine.high %v839_v32, %v7485_v0 }
 0x14e   :  { %v5403_v20 = vpop.permute.xlu1 %1401  ;;  %v5405_v25 = vpop.permute.xlu0 %1403 }
 0x14f   :  { %651 = vrot.lane.b32.xlu1 %v604_v16, %s4811_s13  ;;  %615 = vrot.lane.b32.xlu0 %v535_v28, %s4810_s12  ;;  %v5475_v16 = vrot.slane %v1271_v60, %v5150_v34 }
 0x152   :  { %v5417_v23 = vpop.permute.xlu1 %1405  ;;  %v393_v31 = vpop.permute.xlu0 %392 }
 0x153   :  { %659 = vrot.lane.b32.xlu1 %v605_v26, %s4812_s14  ;;  %623 = vrot.lane.b32.xlu0 %v536_v35, %s4811_s13  ;;  %v1202_v35 = vrot.slane %v1188_v7, %v5150_v34 }
 0x156   :  { %v5425_v19 = vpop.permute.xlu0 %400  ;;  %v365_v36 = vpop.permute.xlu1 %364 }
 0x157   :  { %873 = vrot.lane.b32.xlu1 %v840_v47, %s4809_s11  ;;  %631 = vrot.lane.b32.xlu0 %v537_v43, %s4812_s14 }
 0x15a   :  { %v5437_v45 = vpop.permute.xlu0 %408  ;;  %v373_v46 = vpop.permute.xlu1 %372 }
 0x15b   :  { %881 = vrot.lane.b32.xlu1 %v841_v55, %s4810_s12  ;;  %845 = vrot.lane.b32.xlu0 %v772_v9, %s4809_s11 }
 0x15e   :  { %v381_v50 = vpop.permute.xlu1 %380  ;;  %v361_v1 = vpop.permute.xlu0 %360 }
 0x15f   :  { %v416_v44 = vsel %vm415_vm8, %v5195_v6, %v361_v1  ;;  %889 = vrot.lane.b32.xlu1 %v842_v14, %s4811_s13  ;;  %853 = vrot.lane.b32.xlu0 %v773_v10, %s4810_s12  ;;  %v1272_v6 = vcombine.high %v5357_v54, %v5382_v62  ;;  %v5486_v54 = vrot.slane %v1255_v22, %v5150_v34 }
 0x160   :  { %v418_v26 = vsel %vm417_vm9, %v416_v44, %v365_v36  ;;  %v1235_v62 = vcombine.low %v1202_v35, %v1218_v57  ;;  %v775_v36 = vcombine.high %v5365_v40, %v7485_v0  ;;  %v1270_v40 = vrot.slane %v1256_v48, %v5150_v34 }
 0x161   :  { %v1286_v43 = vrot.slane %v1272_v6, %v5150_v34  ;;  %v1288_v55 = vcombine.high %v5486_v54, %v5475_v16  ;;  %v1236_v14 = vcombine.high %v1202_v35, %v1218_v57 }
 0x162   :  { %v389_v28 = vpop.permute.xlu1 %388  ;;  %v369_v30 = vpop.permute.xlu0 %368 }
 0x163   :  { %v429_v47 = vsel %vm415_vm8, %v5203_v12, %v389_v28  ;;  %v420_v32 = vsel %vm419_vm10, %v418_v26, %v369_v30  ;;  %897 = vrot.lane.b32.xlu1 %v843_v3, %s4812_s14  ;;  %861 = vrot.lane.b32.xlu0 %v774_v59, %s4811_s13  ;;  %v5492_v12 = vrot.slane %v1220_v17, %v5168_v53 }
 0x164   :  { %v430_v33 = vsel %vm417_vm9, %v429_v47, %v393_v31  ;;  %v422_v11 = vsel %vm421_vm11, %v420_v32, %v373_v46  ;;  %v5506_v31 = vrot.slane %v1235_v62, %v5168_v53  ;;  %v1303_v10 = vcombine.low %v1270_v40, %v1286_v43 }
 0x165   :  { %v5512_v44 = vrot.slane %v1288_v55, %v5168_v53  ;;  %v1304_v57 = vcombine.high %v1270_v40, %v1286_v43 }
 0x166   :  { %v397_v56 = vpop.permute.xlu1 %396  ;;  %v377_v9 = vpop.permute.xlu0 %376  ;;  %v5526_v6 = vrot.slane %v1303_v10, %v5168_v53 }
 0x167   :  { %v431_v61 = vsel %vm419_vm10, %v430_v33, %v397_v56  ;;  %v424_v29 = vsel %vm423_vm12, %v422_v11, %v377_v9  ;;  %1328 = vrot.lane.b32.xlu1 %v5492_v12, %s4806_s8  ;;  %869 = vrot.lane.b32.xlu0 %v775_v36, %s4812_s14  ;;  %v5534_v35 = vrot.slane %v1304_v57, %v5168_v53 }
 0x168   :  { %v432_v46 = vsel %vm421_vm11, %v431_v61, %v5425_v19  ;;  %v426_v1 = vsel %vm425_vm13, %v424_v29, %v381_v50  ;;  %v5521_v19 = vrot.slane %v1236_v14, %v5168_v53 }
 0x16a   :  { %v405_v60 = vpop.permute.xlu1 %404  ;;  %v385_v7 = vpop.permute.xlu0 %384 }
 0x16b   :  { %v433_v22 = vsel %vm423_vm12, %v432_v46, %v405_v60  ;;  %v428_v17 = vsel %vm427_vm14, %v426_v1, %v385_v7  ;;  %1336 = vrot.lane.b32.xlu1 %v5506_v31, %s4807_s9  ;;  %1356 = vrot.lane.b32.xlu0 %v5512_v44, %s4806_s8 }
 0x16c   :  { %436 = vst [vmem:[#allocation3] sm:$0xf] %v428_v17  ;;  %v434_v50 = vsel %vm425_vm13, %v433_v22, %v5437_v45  ;;  %v1419_v22 = vcombine.low %v5384_v39, %v5405_v25 }
 0x16e   :  { %v413_v3 = vpop.permute.xlu1 %412  ;;  %v1119_v59 = vpop.permute.xlu0 %1118 }
 0x16f   :  { %v435_v28 = vsel %vm427_vm14, %v434_v50, %v413_v3  ;;  %1344 = vrot.lane.b32.xlu1 %v5521_v19, %s4808_s10  ;;  %1364 = vrot.lane.b32.xlu0 %v5526_v6, %s4807_s9  ;;  %v1420_v3 = vcombine.high %v5384_v39, %v5405_v25 }
 0x170   :  { %437 = vst [vmem:[#allocation3 + $0x8] sm:$0xf] %v435_v28 }
 0x171   :  { %v1434_v39 = vrot.slane %v1420_v3, %v5150_v34  ;;  %v1253_v3 = vcombine.high %v5506_v31, %v7485_v0 }
 0x172   :  { %v1091_v26 = vpop.permute.xlu1 %1090  ;;  %v1127_v30 = vpop.permute.xlu0 %1126 }
 0x173   :  { %1372 = vrot.lane.b32.xlu0 %v5534_v35, %s4808_s10 }
 0x176   :  { %v1099_v45 = vpop.permute.xlu1 %1098  ;;  %v1135_v47 = vpop.permute.xlu0 %1134 }
 0x17a   :  { %v1107_v32 = vpop.permute.xlu1 %1106  ;;  %v1087_v48 = vpop.permute.xlu0 %1086 }
 0x17b   :  { %v1141_v62 = vsel %vm415_vm8, %v5255_v24, %v1087_v48 }
 0x17c   :  { %v1142_v43 = vsel %vm417_vm9, %v1141_v62, %v1091_v26 }
 0x17e   :  { %v1115_v36 = vpop.permute.xlu1 %1114  ;;  %v1095_v55 = vpop.permute.xlu0 %1094 }
 0x17f   :  { %v1148_v33 = vsel %vm415_vm8, %v5263_v63, %v1115_v36  ;;  %v1143_v56 = vsel %vm419_vm10, %v1142_v43, %v1095_v55  ;;  %v1488_v36 = vcombine.high %v5394_v2, %v5417_v23 }
 0x180   :  { %v1149_v9 = vsel %vm417_vm9, %v1148_v33, %v1119_v59  ;;  %v1144_v61 = vsel %vm421_vm11, %v1143_v56, %v1099_v45  ;;  %v1427_v45 = vrot.slane %v1419_v22, %v5150_v34 }
 0x182   :  { %v1123_v11 = vpop.permute.xlu1 %1122  ;;  %v1103_v29 = vpop.permute.xlu0 %1102 }
 0x183   :  { %v1150_v40 = vsel %vm419_vm10, %v1149_v9, %v1123_v11  ;;  %v1145_v14 = vsel %vm423_vm12, %v1144_v61, %v1103_v29  ;;  %v1502_v61 = vrot.slane %v1488_v36, %v5150_v34 }
 0x184   :  { %v1151_v10 = vsel %vm421_vm11, %v1150_v40, %v1127_v30  ;;  %v1146_v46 = vsel %vm425_vm13, %v1145_v14, %v1107_v32  ;;  %v1219_v40 = vcombine.low %v5458_v15, %v5448_v51 }
 0x186   :  { %v1131_v24 = vpop.permute.xlu1 %1130  ;;  %v1111_v60 = vpop.permute.xlu0 %1110 }
 0x187   :  { %v1152_v63 = vsel %vm423_vm12, %v1151_v10, %v1131_v24  ;;  %v1147_v1 = vsel %vm427_vm14, %v1146_v46, %v1111_v60 }
 0x188   :  { %v1157_v7 = vrot.slane %v1147_v1, 4  ;;  %v1153_v57 = vsel %vm425_vm13, %v1152_v63, %v1135_v47  ;;  %v1487_v47 = vcombine.low %v5394_v2, %v5417_v23  ;;  %v1287_v2 = vcombine.low %v5486_v54, %v5475_v16 }
 0x189   :  { %v5592_v54 = vrot.slane %v1219_v40, %v5168_v53  ;;  %v1320_v1 = vcombine.high %v5512_v44, %v7485_v0  ;;  %v1322_v44 = vcombine.high %v5534_v35, %v7485_v0 }
 0x18a   :  { %1161 = vst [vmem:[#allocation3 + $0x20] sm:$0xf0] %v1157_v7  ;;  %v1139_v17 = vpop.permute.xlu1 %1138  ;;  %v1408_v50 = vpop.permute.xlu0 %1407  ;;  %v1495_v56 = vrot.slane %v1487_v47, %v5150_v34  ;;  %v5588_v46 = vrot.slane %v1287_v2, %v5168_v53  ;;  %v1252_v7 = vcombine.high %v5492_v12, %v7485_v0 }
 0x18b   :  { %v1154_v59 = vsel %vm427_vm14, %v1153_v57, %v1139_v17  ;;  %v1435_v28 = vcombine.low %v5396_v4, %v1408_v50  ;;  %v1436_v26 = vcombine.high %v5396_v4, %v1408_v50  ;;  %v1251_v60 = vcombine.high %v5592_v54, %v7485_v0 }
 0x18c   :  { %v1158_v30 = vrot.slane %v1154_v59, 4  ;;  %v1319_v15 = vcombine.high %v5588_v46, %v7485_v0  ;;  %v1321_v57 = vcombine.high %v5526_v6, %v7485_v0  ;;  %v1254_v6 = vcombine.high %v5521_v19, %v7485_v0 }
 0x18d   :  { %v1443_v32 = vrot.slane %v1435_v28, %v5150_v34  ;;  %v1450_v48 = vrot.slane %v1436_v26, %v5150_v34 }
 0x18e   :  { %1162 = vst [vmem:[#allocation3 + $0x28] sm:$0xf0] %v1158_v30  ;;  %v1410_v62 = vpop.permute.xlu1 %1409 }
 0x18f   :  { %v1452_v25 = vcombine.high %v1427_v45, %v1443_v32  ;;  %v1503_v4 = vcombine.low %v5403_v20, %v1410_v62  ;;  %v1504_v43 = vcombine.high %v5403_v20, %v1410_v62  ;;  %v1467_v55 = vcombine.low %v1434_v39, %v1450_v48 }
 0x190   :  { %v1468_v23 = vcombine.high %v1434_v39, %v1450_v48  ;;  %v1451_v50 = vcombine.low %v1427_v45, %v1443_v32  ;;  %v1678_v62 = vcombine.low %v5021_v38, %v5102_v8 }
 0x191   :  { %v1466_v33 = vrot.slane %v1452_v25, %v5168_v53  ;;  %v1511_v11 = vrot.slane %v1503_v4, %v5150_v34  ;;  %v1518_v9 = vrot.slane %v1504_v43, %v5150_v34  ;;  %v1475_v20 = vrot.slane %v1467_v55, %v5168_v53 }
 0x192   :  { %v5585_v10 = vrot.slane %v1468_v23, %v5168_v53  ;;  %v5631_v26 = vrot.slane %v1451_v50, %v5168_v53  ;;  %v1662_v25 = vcombine.low %v5018_v37, %v5045_v49  ;;  %v1686_v55 = vrot.slane %v1678_v62, %v5150_v34 }
 0x193   :  { %1560 = vrot.lane.b32.xlu1 %v1466_v33, %s4806_s8  ;;  %v1520_v29 = vcombine.high %v1495_v56, %v1511_v11  ;;  %v1535_v14 = vcombine.low %v1502_v61, %v1518_v9  ;;  %v1519_v17 = vcombine.low %v1495_v56, %v1511_v11  ;;  %v1536_v19 = vcombine.high %v1502_v61, %v1518_v9 }
 0x194   :  { %v1483_v45 = vcombine.high %v5631_v26, %v7485_v0  ;;  %v1484_v39 = vcombine.high %v1466_v33, %v7485_v0  ;;  %v1679_v56 = vcombine.high %v5021_v38, %v5102_v8  ;;  %v1485_v33 = vcombine.high %v1475_v20, %v7485_v0 }
 0x195   :  { %v1534_v24 = vrot.slane %v1520_v29, %v5168_v53  ;;  %v1543_v16 = vrot.slane %v1535_v14, %v5168_v53  ;;  %v5626_v28 = vrot.slane %v1519_v17, %v5168_v53  ;;  %v1550_v43 = vrot.slane %v1536_v19, %v5168_v53 }
 0x196   :  { %v1670_v9 = vrot.slane %v1662_v25, %v5150_v34  ;;  %v1663_v61 = vcombine.high %v5018_v37, %v5045_v49  ;;  %v1693_v40 = vrot.slane %v1679_v56, %v5150_v34  ;;  %v1746_v14 = vcombine.low %v5031_v42, %v5065_v58 }
 0x197   :  { %1568 = vrot.lane.b32.xlu1 %v1475_v20, %s4807_s9  ;;  %1588 = vrot.lane.b32.xlu0 %v1534_v24, %s4806_s8  ;;  %v1551_v35 = vcombine.high %v5626_v28, %v7485_v0  ;;  %v1552_v47 = vcombine.high %v1534_v24, %v7485_v0  ;;  %v1553_v4 = vcombine.high %v1543_v16, %v7485_v0 }
 0x198   :  { %v1554_v2 = vcombine.high %v1550_v43, %v7485_v0  ;;  %v1695_v23 = vcombine.high %v1670_v9, %v1686_v55  ;;  %v1754_v50 = vrot.slane %v1746_v14, %v5150_v34 }
 0x19b   :  { %1576 = vrot.lane.b32.xlu1 %v5585_v10, %s4808_s10  ;;  %1596 = vrot.lane.b32.xlu0 %v1543_v16, %s4807_s9  ;;  %v1486_v16 = vcombine.high %v5585_v10, %v7485_v0 }
 0x19d   :  { %v5597_v51 = vpop.permute.xlu1 %611 }
 0x19f   :  { %1352 = vrot.lane.b32.xlu1 %v1319_v15, %s4809_s11  ;;  %1324 = vrot.lane.b32.xlu0 %v1251_v60, %s4809_s11  ;;  %v1694_v15 = vcombine.low %v1670_v9, %v1686_v55  ;;  %v1677_v60 = vrot.slane %v1663_v61, %v5150_v34 }
 0x1a1   :  { %v640_v63 = vpop.permute.xlu0 %639  ;;  %v5609_v22 = vpop.permute.xlu1 %619  ;;  %v1711_v62 = vcombine.high %v1677_v60, %v1693_v40 }
 0x1a3   :  { %1360 = vrot.lane.b32.xlu1 %v1320_v1, %s4810_s12  ;;  %1332 = vrot.lane.b32.xlu0 %v1252_v7, %s4810_s12  ;;  %v1730_v1 = vcombine.low %v5028_v41, %v5052_v52 }
 0x1a5   :  { %v5617_v59 = vpop.permute.xlu0 %647  ;;  %v5621_v12 = vpop.permute.xlu1 %627 }
 0x1a7   :  { %1368 = vrot.lane.b32.xlu1 %v1321_v57, %s4811_s13  ;;  %1340 = vrot.lane.b32.xlu0 %v1253_v3, %s4811_s13  ;;  %v1710_v57 = vcombine.low %v1677_v60, %v1693_v40 }
 0x1a9   :  { %v5635_v31 = vpop.permute.xlu0 %655 }
 0x1ab   :  { %1376 = vrot.lane.b32.xlu1 %v1322_v44, %s4812_s14  ;;  %1348 = vrot.lane.b32.xlu0 %v1254_v6, %s4812_s14  ;;  %v5692_v44 = vrot.slane %v1694_v15, %v5168_v53 }
 0x1ad   :  { %v5637_v30 = vpop.permute.xlu1 %849 }
 0x1af   :  { %1584 = vrot.lane.b32.xlu1 %v1551_v35, %s4809_s11  ;;  %1556 = vrot.lane.b32.xlu0 %v1483_v45, %s4809_s11  ;;  %v1738_v35 = vrot.slane %v1730_v1, %v5150_v34 }
 0x1b1   :  { %v5645_v32 = vpop.permute.xlu1 %857  ;;  %v5647_v48 = vpop.permute.xlu0 %877  ;;  %v1763_v56 = vcombine.high %v1738_v35, %v1754_v50 }
 0x1b3   :  { %1592 = vrot.lane.b32.xlu1 %v1552_v47, %s4810_s12  ;;  %1564 = vrot.lane.b32.xlu0 %v1484_v39, %s4810_s12  ;;  %v1718_v47 = vrot.slane %v1710_v57, %v5168_v53  ;;  %v1762_v39 = vcombine.low %v1738_v35, %v1754_v50  ;;  %v1777_v1 = vrot.slane %v1763_v56, %v5168_v53 }
 0x1b5   :  { %v5657_v36 = vpop.permute.xlu1 %865  ;;  %v5664_v11 = vpop.permute.xlu0 %885  ;;  %v5718_v61 = vrot.slane %v1762_v39, %v5168_v53  ;;  %v1728_v57 = vcombine.high %v1718_v47, %v7485_v0  ;;  %v1795_v35 = vcombine.high %v1777_v1, %v7485_v0 }
 0x1b7   :  { %1600 = vrot.lane.b32.xlu1 %v1553_v4, %s4811_s13  ;;  %1572 = vrot.lane.b32.xlu0 %v1485_v33, %s4811_s13  ;;  %v1794_v60 = vcombine.high %v5718_v61, %v7485_v0 }
 0x1b9   :  { %v636_v29 = vpop.permute.xlu1 %635  ;;  %v5678_v24 = vpop.permute.xlu0 %893 }
 0x1ba   :  { %v669_v20 = vsel %vm415_vm8, %v5368_v21, %v636_v29  ;;  %v1709_v21 = vrot.slane %v1695_v23, %v5168_v53 }
 0x1bb   :  { %1608 = vrot.lane.b32.xlu1 %v1554_v2, %s4812_s14  ;;  %1580 = vrot.lane.b32.xlu0 %v1486_v16, %s4812_s14  ;;  %v670_v17 = vsel %vm417_vm9, %v669_v20, %v640_v63  ;;  %v1747_v63 = vcombine.high %v5031_v42, %v5065_v58 }
 0x1bc   :  { %v1727_v14 = vcombine.high %v1709_v21, %v7485_v0 }
 0x1bd   :  { %v644_v7 = vpop.permute.xlu1 %643  ;;  %v608_v3 = vpop.permute.xlu0 %607  ;;  %v1761_v29 = vrot.slane %v1747_v63, %v5150_v34 }
 0x1be   :  { %v671_v10 = vsel %vm419_vm10, %v670_v17, %v644_v7  ;;  %v662_v6 = vsel %vm415_vm8, %v5388_v13, %v608_v3 }
 0x1bf   :  { %1803 = vrot.lane.b32.xlu1 %v1709_v21, %s4806_s8  ;;  %1604 = vrot.lane.b32.xlu0 %v1550_v43, %s4808_s10  ;;  %v672_v19 = vsel %vm421_vm11, %v671_v10, %v5617_v59  ;;  %v663_v13 = vsel %vm417_vm9, %v662_v6, %v5597_v51  ;;  %v1726_v43 = vcombine.high %v5692_v44, %v7485_v0 }
 0x1c0   :  { %v1731_v59 = vcombine.high %v5028_v41, %v5052_v52  ;;  %v1725_v51 = vrot.slane %v1711_v62, %v5168_v53 }
 0x1c1   :  { %v652_v45 = vpop.permute.xlu1 %651  ;;  %v616_v4 = vpop.permute.xlu0 %615 }
 0x1c2   :  { %v673_v25 = vsel %vm423_vm12, %v672_v19, %v652_v45  ;;  %v664_v55 = vsel %vm419_vm10, %v663_v13, %v616_v4  ;;  %v1729_v19 = vcombine.high %v1725_v51, %v7485_v0 }
 0x1c3   :  { %1811 = vrot.lane.b32.xlu1 %v1718_v47, %s4807_s9  ;;  %1799 = vrot.lane.b32.xlu0 %v1726_v43, %s4809_s11  ;;  %v674_v9 = vsel %vm425_vm13, %v673_v25, %v5635_v31  ;;  %v665_v23 = vsel %vm421_vm11, %v664_v55, %v5609_v22  ;;  %v1745_v31 = vrot.slane %v1731_v59, %v5150_v34 }
 0x1c5   :  { %v660_v33 = vpop.permute.xlu1 %659  ;;  %v624_v40 = vpop.permute.xlu0 %623  ;;  %v1778_v22 = vcombine.low %v1745_v31, %v1761_v29  ;;  %v1779_v63 = vcombine.high %v1745_v31, %v1761_v29 }
 0x1c6   :  { %v675_v2 = vsel %vm427_vm14, %v674_v9, %v660_v33  ;;  %v666_v16 = vsel %vm423_vm12, %v665_v23, %v624_v40 }
 0x1c7   :  { %v679_v20 = vrot.slane %v675_v2, 4  ;;  %1819 = vrot.lane.b32.xlu1 %v1725_v51, %s4808_s10  ;;  %1807 = vrot.lane.b32.xlu0 %v1727_v14, %s4810_s12  ;;  %v667_v17 = vsel %vm425_vm13, %v666_v16, %v5621_v12  ;;  %v1793_v25 = vrot.slane %v1779_v63, %v5168_v53 }
 0x1c9   :  { %683 = vst [vmem:[#allocation3 + $0x8] sm:$0xf0] %v679_v20  ;;  %v874_v15 = vpop.permute.xlu1 %873  ;;  %v632_v21 = vpop.permute.xlu0 %631  ;;  %v1797_v59 = vcombine.high %v1793_v25, %v7485_v0 }
 0x1ca   :  { %v907_v7 = vsel %vm415_vm8, %v5413_v27, %v874_v15  ;;  %v668_v50 = vsel %vm427_vm14, %v667_v17, %v632_v21  ;;  %v1786_v27 = vrot.slane %v1778_v22, %v5168_v53 }
 0x1cb   :  { %1827 = vrot.lane.b32.xlu1 %v1794_v60, %s4809_s11  ;;  %v678_v10 = vrot.slane %v668_v50, 4  ;;  %1815 = vrot.lane.b32.xlu0 %v1728_v57, %s4811_s13  ;;  %v908_v6 = vsel %vm417_vm9, %v907_v7, %v5647_v48 }
 0x1cc   :  { %v1796_v39 = vcombine.high %v1786_v27, %v7485_v0 }
 0x1cd   :  { %v882_v3 = vpop.permute.xlu1 %881  ;;  %682 = vst [vmem:[#allocation3] sm:$0xf0] %v678_v10  ;;  %v846_v45 = vpop.permute.xlu0 %845 }
 0x1ce   :  { %v909_v12 = vsel %vm419_vm10, %v908_v6, %v882_v3  ;;  %v900_v47 = vsel %vm415_vm8, %v5430_v5, %v846_v45 }
 0x1cf   :  { %1835 = vrot.lane.b32.xlu1 %v1795_v35, %s4810_s12  ;;  %1823 = vrot.lane.b32.xlu0 %v1729_v19, %s4812_s14  ;;  %v910_v48 = vsel %vm421_vm11, %v909_v12, %v5664_v11  ;;  %v901_v4 = vsel %vm417_vm9, %v900_v47, %v5637_v30 }
 0x1d1   :  { %v890_v62 = vpop.permute.xlu1 %889  ;;  %v854_v43 = vpop.permute.xlu0 %853 }
 0x1d2   :  { %v911_v13 = vsel %vm423_vm12, %v910_v48, %v890_v62  ;;  %v902_v5 = vsel %vm419_vm10, %v901_v4, %v854_v43 }
 0x1d3   :  { %1843 = vrot.lane.b32.xlu1 %v1796_v39, %s4811_s13  ;;  %1831 = vrot.lane.b32.xlu0 %v1777_v1, %s4806_s8  ;;  %v912_v11 = vsel %vm425_vm13, %v911_v13, %v5678_v24  ;;  %v903_v33 = vsel %vm421_vm11, %v902_v5, %v5645_v32  ;;  %v4463_v32 = vld [vmem:[#allocation3 + $0x8] sm:$0xff] }
 0x1d5   :  { %v898_v55 = vpop.permute.xlu1 %897  ;;  %v862_v9 = vpop.permute.xlu0 %861 }
 0x1d6   :  { %v913_v56 = vsel %vm427_vm14, %v912_v11, %v898_v55  ;;  %v904_v30 = vsel %vm423_vm12, %v903_v33, %v862_v9 }
 0x1d7   :  { %915 = vst [vmem:[#allocation3 + $0x28] sm:$0xf] %v913_v56  ;;  %1851 = vrot.lane.b32.xlu1 %v1797_v59, %s4812_s14  ;;  %1839 = vrot.lane.b32.xlu0 %v1786_v27, %s4807_s9  ;;  %v905_v51 = vsel %vm425_vm13, %v904_v30, %v5657_v36  ;;  %v4462_v36 = vld [vmem:[#allocation3] sm:$0xff] }
 0x1d9   :  { %v870_v29 = vpop.permute.xlu0 %869  ;;  %v1329_v20 = vpop.permute.xlu1 %1328 }
 0x1da   :  { %v906_v24 = vsel %vm427_vm14, %v905_v51, %v870_v29 }
 0x1db   :  { %1872 = vrot.lane.b32.xlu1 %v5028_v41, %s4802_s6  ;;  %914 = vst [vmem:[#allocation3 + $0x20] sm:$0xf] %v906_v24  ;;  %1847 = vrot.lane.b32.xlu0 %v1793_v25, %s4808_s10 }
 0x1dd   :  { %v1357_v16 = vpop.permute.xlu0 %1356  ;;  %v1337_v31 = vpop.permute.xlu1 %1336 }
 0x1de   :  { %v4467_v2 = vld [vmem:[#allocation3 + $0x28] sm:$0xff] }
 0x1df   :  { %1876 = vrot.lane.b32.xlu1 %v5031_v42, %s4802_s6  ;;  %v4674_v23 = vpack.c.bf16 %v4467_v2, %v4463_v32  ;;  %1870 = vrot.lane.b32.xlu0 %v5018_v37, %s4802_s6 }
 0x1e1   :  { %4675 = vmatprep.subr.bf16.mxu0 %v4674_v23  ;;  %v1365_v15 = vpop.permute.xlu0 %1364  ;;  %v1345_v60 = vpop.permute.xlu1 %1344 }
 0x1e2   :  { %v4466_v40 = vld [vmem:[#allocation3 + $0x20] sm:$0xff] }
 0x1e3   :  { %1880 = vrot.lane.b32.xlu1 %v5052_v52, %s4802_s6  ;;  %1874 = vrot.lane.b32.xlu0 %v5021_v38, %s4802_s6  ;;  %v4676_v14 = vpack.c.bf16 %v4466_v40, %v4462_v36 }
 0x1e5   :  { %4677 = vmatpush1.bf16.msra.mxu0 %v4676_v14  ;;  %v1373_v22 = vpop.permute.xlu0 %1372 }
 0x1e7   :  { %1884 = vrot.lane.b32.xlu1 %v5065_v58, %s4802_s6  ;;  %1878 = vrot.lane.b32.xlu0 %v5045_v49, %s4802_s6 }
 0x1eb   :  { %1882 = vrot.lane.b32.xlu0 %v5102_v8, %s4802_s6 }
 0x205   :  { %v1561_v1 = vpop.permute.xlu1 %1560 }
 0x209   :  { %v1569_v7 = vpop.permute.xlu1 %1568  ;;  %v1589_v17 = vpop.permute.xlu0 %1588 }
 0x20d   :  { %v1577_v21 = vpop.permute.xlu1 %1576  ;;  %v1597_v57 = vpop.permute.xlu0 %1596 }
 0x211   :  { %v1353_v50 = vpop.permute.xlu1 %1352  ;;  %v1325_v3 = vpop.permute.xlu0 %1324 }
 0x212   :  { %v1386_v10 = vsel %vm415_vm8, %v5588_v46, %v1353_v50  ;;  %v1379_v6 = vsel %vm415_vm8, %v5592_v54, %v1325_v3 }
 0x213   :  { %v1387_v27 = vsel %vm417_vm9, %v1386_v10, %v1357_v16  ;;  %v1380_v12 = vsel %vm417_vm9, %v1379_v6, %v1329_v20 }
 0x215   :  { %v1361_v35 = vpop.permute.xlu1 %1360  ;;  %v1333_v45 = vpop.permute.xlu0 %1332 }
 0x216   :  { %v1388_v63 = vsel %vm419_vm10, %v1387_v27, %v1361_v35  ;;  %v1381_v19 = vsel %vm419_vm10, %v1380_v12, %v1333_v45 }
 0x217   :  { %v1389_v62 = vsel %vm421_vm11, %v1388_v63, %v1365_v15  ;;  %v1382_v46 = vsel %vm421_vm11, %v1381_v19, %v1337_v31 }
 0x219   :  { %v1369_v47 = vpop.permute.xlu1 %1368  ;;  %v1341_v39 = vpop.permute.xlu0 %1340 }
 0x21a   :  { %v1390_v48 = vsel %vm423_vm12, %v1389_v62, %v1369_v47  ;;  %v1383_v54 = vsel %vm423_vm12, %v1382_v46, %v1341_v39 }
 0x21b   :  { %v1391_v13 = vsel %vm425_vm13, %v1390_v48, %v1373_v22  ;;  %v1384_v43 = vsel %vm425_vm13, %v1383_v54, %v1345_v60 }
 0x21d   :  { %v1377_v25 = vpop.permute.xlu1 %1376  ;;  %v1349_v5 = vpop.permute.xlu0 %1348 }
 0x21e   :  { %v1392_v4 = vsel %vm427_vm14, %v1391_v13, %v1377_v25  ;;  %v1385_v55 = vsel %vm427_vm14, %v1384_v43, %v1349_v5 }
 0x21f   :  { %1394 = vst [vmem:[#allocation3 + $0x48] sm:$0xf] %v1392_v4  ;;  %1393 = vst [vmem:[#allocation3 + $0x40] sm:$0xf] %v1385_v55 }
 0x221   :  { %v1585_v11 = vpop.permute.xlu1 %1584  ;;  %v1557_v59 = vpop.permute.xlu0 %1556 }
 0x222   :  { %v1611_v56 = vsel %vm415_vm8, %v5631_v26, %v1557_v59  ;;  %v1618_v24 = vsel %vm415_vm8, %v5626_v28, %v1585_v11 }
 0x223   :  { %v1612_v9 = vsel %vm417_vm9, %v1611_v56, %v1561_v1  ;;  %v1619_v36 = vsel %vm417_vm9, %v1618_v24, %v1589_v17 }
 0x225   :  { %v1593_v33 = vpop.permute.xlu1 %1592  ;;  %v1565_v30 = vpop.permute.xlu0 %1564 }
 0x226   :  { %v1613_v51 = vsel %vm419_vm10, %v1612_v9, %v1565_v30  ;;  %v1620_v26 = vsel %vm419_vm10, %v1619_v36, %v1593_v33 }
 0x227   :  { %v1614_v32 = vsel %vm421_vm11, %v1613_v51, %v1569_v7  ;;  %v1621_v15 = vsel %vm421_vm11, %v1620_v26, %v1597_v57 }
 0x229   :  { %v1601_v29 = vpop.permute.xlu1 %1600  ;;  %v1573_v2 = vpop.permute.xlu0 %1572 }
 0x22a   :  { %v1615_v23 = vsel %vm423_vm12, %v1614_v32, %v1573_v2  ;;  %v1622_v28 = vsel %vm423_vm12, %v1621_v15, %v1601_v29 }
 0x22b   :  { %v1616_v14 = vsel %vm425_vm13, %v1615_v23, %v1577_v21 }
 0x22d   :  { %v1609_v40 = vpop.permute.xlu1 %1608  ;;  %v1581_v20 = vpop.permute.xlu0 %1580 }
 0x22e   :  { %v1617_v16 = vsel %vm427_vm14, %v1616_v14, %v1581_v20 }
 0x22f   :  { %v1627_v31 = vrot.slane %v1617_v16, 4 }
 0x231   :  { %v1804_v60 = vpop.permute.xlu1 %1803  ;;  %1631 = vst [vmem:[#allocation3 + $0x40] sm:$0xf0] %v1627_v31  ;;  %v1605_v1 = vpop.permute.xlu0 %1604 }
 0x232   :  { %v1623_v22 = vsel %vm425_vm13, %v1622_v28, %v1605_v1 }
 0x233   :  { %v1624_v7 = vsel %vm427_vm14, %v1623_v22, %v1609_v40 }
 0x234   :  { %v1628_v17 = vrot.slane %v1624_v7, 4 }
 0x235   :  { %v1812_v50 = vpop.permute.xlu1 %1811  ;;  %v1800_v10 = vpop.permute.xlu0 %1799 }
 0x236   :  { %1632 = vst [vmem:[#allocation3 + $0x48] sm:$0xf0] %v1628_v17  ;;  %v1854_v21 = vsel %vm415_vm8, %v5692_v44, %v1800_v10 }
 0x237   :  { %v1855_v6 = vsel %vm417_vm9, %v1854_v21, %v1804_v60 }
 0x239   :  { %v1820_v3 = vpop.permute.xlu1 %1819  ;;  %v1808_v57 = vpop.permute.xlu0 %1807 }
 0x23a   :  { %v1856_v35 = vsel %vm419_vm10, %v1855_v6, %v1808_v57 }
 0x23b   :  { %v1857_v63 = vsel %vm421_vm11, %v1856_v35, %v1812_v50 }
 0x23d   :  { %v1828_v27 = vpop.permute.xlu1 %1827  ;;  %v1816_v12 = vpop.permute.xlu0 %1815 }
 0x23e   :  { %v1858_v45 = vsel %vm423_vm12, %v1857_v63, %v1816_v12  ;;  %v1861_v46 = vsel %vm415_vm8, %v5718_v61, %v1828_v27 }
 0x23f   :  { %v1859_v47 = vsel %vm425_vm13, %v1858_v45, %v1820_v3 }
 0x241   :  { %v1836_v19 = vpop.permute.xlu1 %1835  ;;  %v1824_v62 = vpop.permute.xlu0 %1823 }
 0x242   :  { %v1860_v48 = vsel %vm427_vm14, %v1859_v47, %v1824_v62 }
 0x243   :  { %1868 = vst [vmem:[#allocation3 + $0x60] sm:$0xf] %v1860_v48 }
 0x245   :  { %v1844_v44 = vpop.permute.xlu1 %1843  ;;  %v1832_v39 = vpop.permute.xlu0 %1831 }
 0x246   :  { %v1862_v54 = vsel %vm417_vm9, %v1861_v46, %v1832_v39 }
 0x247   :  { %v1863_v13 = vsel %vm419_vm10, %v1862_v54, %v1836_v19 }
 0x249   :  { %v1852_v25 = vpop.permute.xlu1 %1851  ;;  %v1840_v4 = vpop.permute.xlu0 %1839 }
 0x24a   :  { %v1864_v43 = vsel %vm421_vm11, %v1863_v13, %v1840_v4 }
 0x24b   :  { %v1865_v55 = vsel %vm423_vm12, %v1864_v43, %v1844_v44 }
 0x24d   :  { %v1873_v5 = vpop.permute.xlu1 %1872  ;;  %v1848_v11 = vpop.permute.xlu0 %1847 }
 0x24e   :  { %v1866_v59 = vsel %vm425_vm13, %v1865_v55, %v1848_v11 }
 0x24f   :  { %v1867_v56 = vsel %vm427_vm14, %v1866_v59, %v1852_v25 }
 0x250   :  { %1869 = vst [vmem:[#allocation3 + $0x68] sm:$0xf] %v1867_v56 }
 0x251   :  { %v1877_v33 = vpop.permute.xlu1 %1876  ;;  %v1871_v61 = vpop.permute.xlu0 %1870 }
 0x255   :  { %v1875_v9 = vpop.permute.xlu0 %1874  ;;  %v1881_v30 = vpop.permute.xlu1 %1880 }
 0x256   :  { %v1962_v16 = vcombine.low %v1873_v5, %v1881_v30  ;;  %v1963_v57 = vcombine.high %v1873_v5, %v1881_v30 }
 0x258   :  { %v1970_v17 = vrot.slane %v1962_v16, %v5150_v34  ;;  %v1977_v19 = vrot.slane %v1963_v57, %v5150_v34 }
 0x259   :  { %v1879_v51 = vpop.permute.xlu0 %1878  ;;  %v1885_v24 = vpop.permute.xlu1 %1884 }
 0x25a   :  { %v1894_v29 = vcombine.low %v1871_v61, %v1879_v51  ;;  %v1895_v2 = vcombine.high %v1871_v61, %v1879_v51  ;;  %v1978_v40 = vcombine.low %v1877_v33, %v1885_v24  ;;  %v1979_v10 = vcombine.high %v1877_v33, %v1885_v24 }
 0x25c   :  { %v1902_v26 = vrot.slane %v1894_v29, %v5150_v34  ;;  %v1909_v31 = vrot.slane %v1895_v2, %v5150_v34  ;;  %v1986_v28 = vrot.slane %v1978_v40, %v5150_v34  ;;  %v1993_v27 = vrot.slane %v1979_v10, %v5150_v34 }
 0x25d   :  { %v1883_v32 = vpop.permute.xlu0 %1882 }
 0x25e   :  { %v1910_v23 = vcombine.low %v1875_v9, %v1883_v32  ;;  %v1911_v36 = vcombine.high %v1875_v9, %v1883_v32  ;;  %v1994_v21 = vcombine.low %v1970_v17, %v1986_v28  ;;  %v1995_v63 = vcombine.high %v1970_v17, %v1986_v28 }
 0x25f   :  { %v2010_v62 = vcombine.low %v1977_v19, %v1993_v27  ;;  %v2011_v39 = vcombine.high %v1977_v19, %v1993_v27 }
 0x260   :  { %v1918_v14 = vrot.slane %v1910_v23, %v5150_v34  ;;  %v1925_v20 = vrot.slane %v1911_v36, %v5150_v34  ;;  %v2002_v45 = vrot.slane %v1994_v21, %v5168_v53  ;;  %v2009_v44 = vrot.slane %v1995_v63, %v5168_v53 }
 0x261   :  { %v2018_v25 = vrot.slane %v2010_v62, %v5168_v53  ;;  %v2025_v4 = vrot.slane %v2011_v39, %v5168_v53  ;;  %v5945_v39 = vld [vmem:[#allocation2 + $0xb0] sm:$0xff] }
 0x262   :  { %v1926_v15 = vcombine.low %v1902_v26, %v1918_v14  ;;  %v1927_v60 = vcombine.high %v1902_v26, %v1918_v14  ;;  %v1942_v1 = vcombine.low %v1909_v31, %v1925_v20  ;;  %v1943_v3 = vcombine.high %v1909_v31, %v1925_v20 }
 0x263   :  { %v2026_v48 = vcombine.high %v2002_v45, %v7485_v0  ;;  %v2027_v54 = vcombine.high %v2009_v44, %v7485_v0  ;;  %v2028_v13 = vcombine.high %v2018_v25, %v7485_v0  ;;  %v2029_v43 = vcombine.high %v2025_v4, %v7485_v0 }
 0x264   :  { %v1941_v22 = vrot.slane %v1927_v60, %v5168_v53  ;;  %v1934_v7 = vrot.slane %v1926_v15, %v5168_v53  ;;  %v1950_v6 = vrot.slane %v1942_v1, %v5168_v53  ;;  %v1957_v12 = vrot.slane %v1943_v3, %v5168_v53 }
 0x266   :  { %2035 = vrot.lane.b32.xlu1 %v1941_v22, %s4806_s8  ;;  %v1958_v50 = vcombine.high %v1934_v7, %v7485_v0  ;;  %v1959_v35 = vcombine.high %v1941_v22, %v7485_v0  ;;  %v1960_v47 = vcombine.high %v1950_v6, %v7485_v0  ;;  %v1961_v46 = vcombine.high %v1957_v12, %v7485_v0 }
 0x268   :  { %2031 = vrot.lane.b32.xlu0 %v1958_v50, %s4809_s11  ;;  %v4470_v50 = vld [vmem:[#allocation3 + $0x40] sm:$0xff] }
 0x26a   :  { %2043 = vrot.lane.b32.xlu1 %v1950_v6, %s4807_s9 }
 0x26c   :  { %2039 = vrot.lane.b32.xlu0 %v1959_v35, %s4810_s12 }
 0x26e   :  { %2051 = vrot.lane.b32.xlu1 %v1957_v12, %s4808_s10 }
 0x270   :  { %2047 = vrot.lane.b32.xlu0 %v1960_v47, %s4811_s13  ;;  %v5927_v47 = vld [vmem:[#allocation2 + $0x68] sm:$0xff] }
 0x272   :  { %2059 = vrot.lane.b32.xlu1 %v2026_v48, %s4809_s11  ;;  %v5933_v48 = vld [vmem:[#allocation2 + $0x98] sm:$0xff] }
 0x274   :  { %2055 = vrot.lane.b32.xlu0 %v1961_v46, %s4812_s14  ;;  %v5941_v46 = vld [vmem:[#allocation2 + $0x60] sm:$0xff] }
 0x276   :  { %2067 = vrot.lane.b32.xlu1 %v2027_v54, %s4810_s12  ;;  %v5949_v54 = vld [vmem:[#allocation2 + $0x90] sm:$0xff] }
 0x278   :  { %2063 = vrot.lane.b32.xlu0 %v2009_v44, %s4806_s8  ;;  %v5937_v44 = vld [vmem:[#allocation2 + $0x80] sm:$0xff] }
 0x27a   :  { %2075 = vrot.lane.b32.xlu1 %v2028_v13, %s4811_s13  ;;  %v5959_v13 = vld [vmem:[#allocation2 + $0xa8] sm:$0xff] }
 0x27c   :  { %2071 = vrot.lane.b32.xlu0 %v2018_v25, %s4807_s9  ;;  %v5953_v25 = vld [vmem:[#allocation2 + $0x78] sm:$0xff] }
 0x27e   :  { %2083 = vrot.lane.b32.xlu1 %v2029_v43, %s4812_s14  ;;  %v3044_v43 = vrot.slane %v5927_v47, 1 }
 0x280   :  { %2079 = vrot.lane.b32.xlu0 %v2025_v4, %s4808_s10  ;;  %v2343_v4 = vld [vmem:[#allocation2 + $0x70] sm:$0x3] }
 0x282   :  { %2110 = vrot.lane.b32.xlu1 %v5028_v41, %s4803_s7 }
 0x284   :  { %2108 = vrot.lane.b32.xlu0 %v5018_v37, %s4803_s7 }
 0x286   :  { %2114 = vrot.lane.b32.xlu1 %v5031_v42, %s4803_s7 }
 0x288   :  { %2112 = vrot.lane.b32.xlu0 %v5021_v38, %s4803_s7 }
 0x28a   :  { %2118 = vrot.lane.b32.xlu1 %v5052_v52, %s4803_s7 }
 0x28c   :  { %2116 = vrot.lane.b32.xlu0 %v5045_v49, %s4803_s7 }
 0x28e   :  { %2122 = vrot.lane.b32.xlu1 %v5065_v58, %s4803_s7 }
 0x290   :  { %2120 = vrot.lane.b32.xlu0 %v5102_v8, %s4803_s7 }
 0x2d8   :  { %v2036_v41 = vpop.permute.xlu1 %2035 }
 0x2da   :  { %v2032_v37 = vpop.permute.xlu0 %2031 }
 0x2db   :  { %v2086_v5 = vsel %vm415_vm8, %v1934_v7, %v2032_v37  ;;  %v4471_v7 = vld [vmem:[#allocation3 + $0x48] sm:$0xff]  ;;  %v2349_v37 = vld [vmem:[#allocation2 + $0xa0] sm:$0x3] }
 0x2dc   :  { %v2044_v42 = vpop.permute.xlu1 %2043  ;;  %v2087_v55 = vsel %vm417_vm9, %v2086_v5, %v2036_v41  ;;  %v3046_v41 = vrot.slane %v2343_v4, 1  ;;  %v2346_v5 = vld [vmem:[#allocation2 + $0x88] sm:$0x3] }
 0x2de   :  { %v2040_v38 = vpop.permute.xlu0 %2039 }
 0x2df   :  { %v2088_v11 = vsel %vm419_vm10, %v2087_v55, %v2040_v38  ;;  %v3054_v55 = vrot.slane %v5933_v48, 1  ;;  %v3056_v38 = vrot.slane %v2349_v37, 1 }
 0x2e0   :  { %v2052_v52 = vpop.permute.xlu1 %2051  ;;  %v2089_v59 = vsel %vm421_vm11, %v2088_v11, %v2044_v42  ;;  %v5977_v42 = vsel %vm920_vm7, %v3044_v43, %v3046_v41  ;;  %v3049_v11 = vrot.slane %v5937_v44, 1 }
 0x2e2   :  { %v2048_v49 = vpop.permute.xlu0 %2047 }
 0x2e3   :  { %v2090_v56 = vsel %vm423_vm12, %v2089_v59, %v2048_v49  ;;  %v2352_v59 = vld [vmem:[#allocation2 + $0xb8] sm:$0x3]  ;;  %v5986_v49 = vsel %vm920_vm7, %v3054_v55, %v3056_v38 }
 0x2e4   :  { %v2060_v58 = vpop.permute.xlu1 %2059  ;;  %v2091_v33 = vsel %vm425_vm13, %v2090_v56, %v2052_v52  ;;  %v3051_v52 = vrot.slane %v2346_v5, 1  ;;  %v3756_v56 = vrot.slane %v5927_v47, 2 }
 0x2e5   :  { %v2093_v51 = vsel %vm415_vm8, %v2002_v45, %v2060_v58  ;;  %v3758_v58 = vrot.slane %v2343_v4, 2 }
 0x2e6   :  { %v2056_v8 = vpop.permute.xlu0 %2055 }
 0x2e7   :  { %v2092_v61 = vsel %vm427_vm14, %v2091_v33, %v2056_v8  ;;  %v5992_v33 = vsel %vm920_vm7, %v3049_v11, %v3051_v52  ;;  %v3059_v8 = vrot.slane %v5945_v39, 1 }
 0x2e8   :  { %v2102_v9 = vrot.slane %v2092_v61, 4  ;;  %v2068_v30 = vpop.permute.xlu1 %2067  ;;  %v3061_v61 = vrot.slane %v2352_v59, 1 }
 0x2ea   :  { %2106 = vst [vmem:[#allocation3 + $0x60] sm:$0xf0] %v2102_v9  ;;  %v2064_v29 = vpop.permute.xlu0 %2063  ;;  %v5998_v9 = vsel %vm1633_vm6, %v3756_v56, %v3758_v58 }
 0x2eb   :  { %v2094_v24 = vsel %vm417_vm9, %v2093_v51, %v2064_v29  ;;  %v3768_v51 = vrot.slane %v2349_v37, 2  ;;  %v6004_v29 = vsel %vm920_vm7, %v3059_v8, %v3061_v61 }
 0x2ec   :  { %v2076_v32 = vpop.permute.xlu1 %2075  ;;  %v2095_v2 = vsel %vm419_vm10, %v2094_v24, %v2068_v30  ;;  %v3766_v30 = vrot.slane %v5933_v48, 2  ;;  %v3761_v24 = vrot.slane %v5937_v44, 2 }
 0x2ee   :  { %v2072_v23 = vpop.permute.xlu0 %2071 }
 0x2ef   :  { %v2096_v36 = vsel %vm421_vm11, %v2095_v2, %v2072_v23  ;;  %v6010_v2 = vsel %vm1633_vm6, %v3766_v30, %v3768_v51  ;;  %v3043_v23 = vrot.slane %v5941_v46, 1 }
 0x2f0   :  { %v2097_v40 = vsel %vm423_vm12, %v2096_v36, %v2076_v32  ;;  %v2084_v14 = vpop.permute.xlu1 %2083  ;;  %v3763_v32 = vrot.slane %v2346_v5, 2 }
 0x2f1   :  { %v4474_v22 = vld [vmem:[#allocation3 + $0x60] sm:$0xff] }
 0x2f2   :  { %v2080_v26 = vpop.permute.xlu0 %2079  ;;  %v4680_v10 = vpack.c.bf16 %v4474_v22, %v4470_v50  ;;  %v6016_v36 = vsel %vm1633_vm6, %v3761_v24, %v3763_v32  ;;  %v3755_v22 = vrot.slane %v5941_v46, 2 }
 0x2f3   :  { %v2098_v20 = vsel %vm425_vm13, %v2097_v40, %v2080_v26  ;;  %7523 = vst [vmem:[#allocation18_spill] sm:$0xff] %v6016_v36  ;;  %v3771_v40 = vrot.slane %v5945_v39, 2  ;;  %v3773_v26 = vrot.slane %v2352_v59, 2 }
 0x2f4   :  { %v2099_v16 = vsel %vm427_vm14, %v2098_v20, %v2084_v14  ;;  %v6022_v14 = vsel %vm920_vm7, %v3043_v23, %v3044_v43  ;;  %v3053_v20 = vrot.slane %v5949_v54, 1  ;;  %v6046_v50 = vsel %vm1633_vm6, %v3755_v22, %v3756_v56 }
 0x2f5   :  { %v2103_v31 = vrot.slane %v2099_v16, 4  ;;  %v6028_v16 = vsel %vm1633_vm6, %v3771_v40, %v3773_v26 }
 0x2f6   :  { %v5905_v15 = vpop.permute.xlu0 %2108 }
 0x2f7   :  { %7518 = vst [vmem:[#allocation13_spill] sm:$0xff] %v5905_v15  ;;  %2107 = vst [vmem:[#allocation3 + $0x68] sm:$0xf0] %v2103_v31  ;;  %v3048_v31 = vrot.slane %v5953_v25, 1 }
 0x2fa   :  { %v5907_v60 = vpop.permute.xlu0 %2112 }
 0x2fb   :  { %7519 = vst [vmem:[#allocation14_spill] sm:$0xff] %v5907_v60 }
 0x2fe   :  { %v5909_v28 = vpop.permute.xlu0 %2116  ;;  %v4475_v1 = vld [vmem:[#allocation3 + $0x68] sm:$0xff] }
 0x2ff   :  { %7520 = vst [vmem:[#allocation15_spill] sm:$0xff] %v5909_v28  ;;  %v4678_v17 = vpack.c.bf16 %v4475_v1, %v4471_v7  ;;  %v2132_v21 = vcombine.low %v5905_v15, %v5909_v28  ;;  %v6034_v1 = vsel %vm920_vm7, %v3053_v20, %v3054_v55  ;;  %v6040_v7 = vsel %vm920_vm7, %v3048_v31, %v3049_v11 }
 0x300   :  { %v3071_v20 = vcombine.low %v6022_v14, %v6034_v1 }
 0x301   :  { %4679 = vmatprep.subr.bf16.mxu0 %v4678_v17  ;;  %v2140_v57 = vrot.slane %v2132_v21, %v5150_v34  ;;  %v3058_v17 = vrot.slane %v5959_v13, 1 }
 0x302   :  { %v5913_v3 = vpop.permute.xlu0 %2120  ;;  %4681 = vmatpush1.bf16.msra.mxu0 %v4680_v10  ;;  %v3765_v10 = vrot.slane %v5949_v54, 2 }
 0x303   :  { %7521 = vst [vmem:[#allocation16_spill] sm:$0xff] %v5913_v3  ;;  %v2148_v6 = vcombine.low %v5907_v60, %v5913_v3  ;;  %v6052_v21 = vsel %vm920_vm7, %v3058_v17, %v3059_v8  ;;  %v2353_v3 = vcombine.low %v5941_v46, %v5949_v54 }
 0x304   :  { %v3087_v31 = vcombine.low %v6040_v7, %v6052_v21 }
 0x305   :  { %v2156_v35 = vrot.slane %v2148_v6, %v5150_v34  ;;  %v3760_v6 = vrot.slane %v5953_v25, 2 }
 0x307   :  { %v2164_v27 = vcombine.low %v2140_v57, %v2156_v35  ;;  %v2165_v63 = vcombine.high %v2140_v57, %v2156_v35  ;;  %v6058_v57 = vsel %vm1633_vm6, %v3765_v10, %v3766_v30  ;;  %v6063_v35 = vsel %vm1633_vm6, %v3760_v6, %v3761_v24 }
 0x309   :  { %v2179_v12 = vrot.slane %v2165_v63, %v5168_v53  ;;  %v5921_v45 = vrot.slane %v2164_v27, %v5168_v53  ;;  %v3770_v27 = vrot.slane %v5959_v13, 2 }
 0x30b   :  { %7522 = vst [vmem:[#allocation17_spill] sm:$0xff] %v5921_v45  ;;  %2273 = vrot.lane.b32.xlu1 %v2179_v12, %s4806_s8  ;;  %v2196_v19 = vcombine.high %v5921_v45, %v7485_v0  ;;  %v2197_v62 = vcombine.high %v2179_v12, %v7485_v0  ;;  %v6071_v63 = vsel %vm1633_vm6, %v3770_v27, %v3771_v40 }
 0x30c   :  { %v3139_v12 = vcombine.low %v5977_v42, %v5986_v49 }
 0x30d   :  { %2269 = vrot.lane.b32.xlu0 %v2196_v19, %s4809_s11  ;;  %v3155_v19 = vcombine.low %v5992_v33, %v6004_v29 }
 0x30e   :  { %v3147_v4 = vrot.slane %v3139_v12, %v5150_v34 }
 0x30f   :  { %2571 = vrot.lane.b32.xlu1 %v5927_v47, %s4802_s6  ;;  %v3163_v43 = vrot.slane %v3155_v19, %v5150_v34 }
 0x311   :  { %2277 = vrot.lane.b32.xlu0 %v2197_v62, %s4810_s12  ;;  %v6099_v62 = vpop.permute.xlu1 %2110  ;;  %v3171_v41 = vcombine.low %v3147_v4, %v3163_v43 }
 0x312   :  { %7524 = vst [vmem:[#allocation19_spill] sm:$0xff] %v6099_v62 }
 0x313   :  { %2579 = vrot.lane.b32.xlu1 %v5933_v48, %s4802_s6  ;;  %v6114_v5 = vrot.slane %v3171_v41, %v5168_v53  ;;  %v3172_v41 = vcombine.high %v3147_v4, %v3163_v43  ;;  %v2437_v4 = vcombine.low %v5937_v44, %v5945_v39 }
 0x315   :  { %2575 = vrot.lane.b32.xlu0 %v5937_v44, %s4802_s6  ;;  %v6109_v37 = vpop.permute.xlu1 %2114  ;;  %7526 = vst [vmem:[#allocation21_spill] sm:$0xff] %v6114_v5  ;;  %v3203_v38 = vcombine.high %v6114_v5, %v7485_v0 }
 0x316   :  { %7525 = vst [vmem:[#allocation20_spill] sm:$0xff] %v6109_v37 }
 0x317   :  { %2569 = vrot.lane.b32.xlu1 %v5941_v46, %s4802_s6 }
 0x319   :  { %2583 = vrot.lane.b32.xlu0 %v5945_v39, %s4802_s6  ;;  %v6118_v55 = vpop.permute.xlu1 %2118 }
 0x31a   :  { %7527 = vst [vmem:[#allocation22_spill] sm:$0xff] %v6118_v55 }
 0x31b   :  { %2577 = vrot.lane.b32.xlu1 %v5949_v54, %s4802_s6 }
 0x31d   :  { %2573 = vrot.lane.b32.xlu0 %v5953_v25, %s4802_s6  ;;  %v6123_v11 = vpop.permute.xlu1 %2122 }
 0x31e   :  { %7528 = vst [vmem:[#allocation23_spill] sm:$0xff] %v6123_v11 }
 0x31f   :  { %2809 = vrot.lane.b32.xlu1 %v5927_v47, %s4803_s7 }
 0x321   :  { %2581 = vrot.lane.b32.xlu0 %v5959_v13, %s4802_s6 }
 0x323   :  { %2817 = vrot.lane.b32.xlu1 %v5933_v48, %s4803_s7 }
 0x325   :  { %2813 = vrot.lane.b32.xlu0 %v5937_v44, %s4803_s7 }
 0x327   :  { %2807 = vrot.lane.b32.xlu1 %v5941_v46, %s4803_s7 }
 0x329   :  { %2821 = vrot.lane.b32.xlu0 %v5945_v39, %s4803_s7 }
 0x32b   :  { %2815 = vrot.lane.b32.xlu1 %v5949_v54, %s4803_s7 }
 0x32d   :  { %2811 = vrot.lane.b32.xlu0 %v5953_v25, %s4803_s7 }
 0x32f   :  { %3519 = vrot.lane.b32.xlu1 %v5977_v42, %s4803_s7 }
 0x331   :  { %2819 = vrot.lane.b32.xlu0 %v5959_v13, %s4803_s7 }
 0x333   :  { %3527 = vrot.lane.b32.xlu1 %v5986_v49, %s4803_s7 }
 0x335   :  { %3523 = vrot.lane.b32.xlu0 %v5992_v33, %s4803_s7 }
 0x337   :  { %3993 = vrot.lane.b32.xlu1 %v5998_v9, %s4802_s6 }
 0x339   :  { %3531 = vrot.lane.b32.xlu0 %v6004_v29, %s4803_s7 }
 0x33b   :  { %4001 = vrot.lane.b32.xlu1 %v6010_v2, %s4802_s6 }
 0x33d   :  { %3997 = vrot.lane.b32.xlu0 %v6016_v36, %s4802_s6 }
 0x33f   :  { %3517 = vrot.lane.b32.xlu1 %v6022_v14, %s4803_s7 }
 0x341   :  { %4005 = vrot.lane.b32.xlu0 %v6028_v16, %s4802_s6 }
 0x343   :  { %3525 = vrot.lane.b32.xlu1 %v6034_v1, %s4803_s7 }
 0x345   :  { %3521 = vrot.lane.b32.xlu0 %v6040_v7, %s4803_s7 }
 0x347   :  { %3991 = vrot.lane.b32.xlu1 %v6046_v50, %s4802_s6 }
 0x349   :  { %3529 = vrot.lane.b32.xlu0 %v6052_v21, %s4803_s7 }
 0x34b   :  { %3999 = vrot.lane.b32.xlu1 %v6058_v57, %s4802_s6 }
 0x34d   :  { %3995 = vrot.lane.b32.xlu0 %v6063_v35, %s4802_s6 }
 0x34f   :  { %3287 = vrot.lane.b32.xlu1 %v5977_v42, %s4802_s6 }
 0x351   :  { %4003 = vrot.lane.b32.xlu0 %v6071_v63, %s4802_s6 }
 0x353   :  { %3295 = vrot.lane.b32.xlu1 %v5986_v49, %s4802_s6 }
 0x355   :  { %3291 = vrot.lane.b32.xlu0 %v5992_v33, %s4802_s6 }
 0x357   :  { %3285 = vrot.lane.b32.xlu1 %v6022_v14, %s4802_s6 }
 0x359   :  { %3299 = vrot.lane.b32.xlu0 %v6004_v29, %s4802_s6 }
 0x35b   :  { %3293 = vrot.lane.b32.xlu1 %v6034_v1, %s4802_s6 }
 0x35d   :  { %3289 = vrot.lane.b32.xlu0 %v6040_v7, %s4802_s6 }
 0x35f   :  { %4231 = vrot.lane.b32.xlu1 %v5998_v9, %s4803_s7 }
 0x361   :  { %3297 = vrot.lane.b32.xlu0 %v6052_v21, %s4802_s6 }
 0x363   :  { %4239 = vrot.lane.b32.xlu1 %v6010_v2, %s4803_s7 }
 0x365   :  { %4235 = vrot.lane.b32.xlu0 %v6016_v36, %s4803_s7 }
 0x367   :  { %4229 = vrot.lane.b32.xlu1 %v6046_v50, %s4803_s7 }
 0x369   :  { %4243 = vrot.lane.b32.xlu0 %v6028_v16, %s4803_s7 }
 0x36b   :  { %4237 = vrot.lane.b32.xlu1 %v6058_v57, %s4803_s7 }
 0x36d   :  { %4233 = vrot.lane.b32.xlu0 %v6063_v35, %s4803_s7 }
 0x371   :  { %4241 = vrot.lane.b32.xlu0 %v6071_v63, %s4803_s7 }
 0x375   :  { %3236 = vrot.lane.b32.xlu0 %v3203_v38, %s4809_s11  ;;  %v6164_v38 = vrot.slane %v3071_v20, %v5150_v34 }
 0x37d   :  { %v6125_v52 = vpop.permute.xlu1 %2273 }
 0x37e   :  { %7529 = vst [vmem:[#allocation24_spill] sm:$0xff] %v6125_v52 }
 0x37f   :  { %v6127_v59 = vpop.permute.xlu0 %2269 }
 0x380   :  { %7530 = vst [vmem:[#allocation25_spill] sm:$0xff] %v6127_v59 }
 0x381   :  { %v6129_v56 = vpop.permute.xlu1 %2571 }
 0x383   :  { %v6131_v58 = vpop.permute.xlu0 %2277 }
 0x384   :  { %7531 = vst [vmem:[#allocation26_spill] sm:$0xff] %v6131_v58 }
 0x385   :  { %v6133_v8 = vpop.permute.xlu1 %2579 }
 0x386   :  { %v2661_v51 = vcombine.low %v6129_v56, %v6133_v8 }
 0x387   :  { %v6135_v61 = vpop.permute.xlu0 %2575 }
 0x388   :  { %v2669_v40 = vrot.slane %v2661_v51, %v5150_v34  ;;  %v6167_v51 = vrot.slane %v3087_v31, %v5150_v34  ;;  %v3186_v31 = vrot.slane %v3172_v41, %v5168_v53 }
 0x389   :  { %v6137_v30 = vpop.permute.xlu1 %2569 }
 0x38b   :  { %v6141_v24 = vpop.permute.xlu0 %2583 }
 0x38c   :  { %v2677_v32 = vcombine.low %v6135_v61, %v6141_v24 }
 0x38d   :  { %v6145_v23 = vpop.permute.xlu1 %2577 }
 0x38e   :  { %v2685_v26 = vrot.slane %v2677_v32, %v5150_v34  ;;  %v2593_v27 = vcombine.low %v6137_v30, %v6145_v23 }
 0x38f   :  { %v6153_v22 = vpop.permute.xlu0 %2573 }
 0x390   :  { %v2693_v17 = vcombine.low %v2669_v40, %v2685_v26  ;;  %v2694_v10 = vcombine.high %v2669_v40, %v2685_v26  ;;  %v2601_v43 = vrot.slane %v2593_v27, %v5150_v34  ;;  %v2445_v27 = vrot.slane %v2437_v4, %v5150_v34 }
 0x391   :  { %v6155_v6 = vpop.permute.xlu1 %2809 }
 0x392   :  { %v2708_v12 = vrot.slane %v2694_v10, %v5168_v53  ;;  %v6161_v19 = vrot.slane %v2693_v17, %v5168_v53  ;;  %v2421_v17 = vcombine.low %v5927_v47, %v5933_v48 }
 0x393   :  { %v6169_v32 = vpop.permute.xlu0 %2581 }
 0x394   :  { %7532 = vst [vmem:[#allocation27_spill] sm:$0xff] %v6161_v19  ;;  %v2609_v40 = vcombine.low %v6153_v22, %v6169_v32  ;;  %2762 = vrot.lane.b32.xlu0 %v2708_v12, %s4806_s8  ;;  %v2725_v26 = vcombine.high %v6161_v19, %v7485_v0  ;;  %v3103_v0 = vcombine.low %v6164_v38, %v6167_v51 }
 0x395   :  { %v6184_v10 = vpop.permute.xlu1 %2817  ;;  %v2429_v45 = vrot.slane %v2421_v17, %v5150_v34  ;;  %v7534_v17 = vmov 0.0  }
 0x396   :  { %v2617_v20 = vrot.slane %v2609_v40, %v5150_v34  ;;  %2758 = vrot.lane.b32.xlu1 %v2725_v26, %s4809_s11  ;;  %v2899_v40 = vcombine.low %v6155_v6, %v6184_v10 }
 0x397   :  { %v6186_v18 = vpop.permute.xlu0 %2813  ;;  %v2453_v15 = vcombine.low %v2429_v45, %v2445_v27 }
 0x398   :  { %v2625_v58 = vcombine.low %v2601_v43, %v2617_v20  ;;  %v2626_v52 = vcombine.high %v2601_v43, %v2617_v20  ;;  %3240 = vrot.lane.b32.xlu0 %v3186_v31, %s4806_s8  ;;  %v6210_v20 = vrot.slane %v3103_v0, %v5168_v53 }
 0x399   :  { %v6213_v28 = vpop.permute.xlu1 %2807  ;;  %v6224_v0 = vrot.slane %v2453_v15, %v5168_v53  ;;  %v6241_v15 = vrot.slane %v2353_v3, %v5150_v34  ;;  %v2726_v3 = vcombine.high %v2708_v12, %v7534_v17 }
 0x39a   :  { %v6196_v41 = vrot.slane %v2626_v52, %v5168_v53  ;;  %v6199_v26 = vrot.slane %v2625_v58, %v5168_v53  ;;  %7535 = vst [vmem:[#allocation29_spill] sm:$0xff] %v6210_v20  ;;  %v2907_v52 = vrot.slane %v2899_v40, %v5150_v34  ;;  %v2369_v40 = vcombine.low %v5953_v25, %v5959_v13 }
 0x39b   :  { %v6201_v59 = vpop.permute.xlu0 %2821  ;;  %7536 = vst [vmem:[#allocation30_spill] sm:$0xff] %v6224_v0  ;;  %v2485_v55 = vcombine.high %v6224_v0, %v7534_v17 }
 0x39c   :  { %7533 = vst [vmem:[#allocation28_spill] sm:$0xff] %v6199_v26  ;;  %v2915_v43 = vcombine.low %v6186_v18, %v6201_v59  ;;  %2734 = vrot.lane.b32.xlu0 %v6196_v41, %s4806_s8  ;;  %v2657_v4 = vcombine.high %v6199_v26, %v7534_v17  ;;  %v3135_v26 = vcombine.high %v6210_v20, %v7534_v17 }
 0x39d   :  { %v6234_v62 = vpop.permute.xlu1 %2815  ;;  %v6244_v37 = vrot.slane %v2369_v40, %v5150_v34  ;;  %v3104_v40 = vcombine.high %v6164_v38, %v6167_v51 }
 0x39e   :  { %v2923_v58 = vrot.slane %v2915_v43, %v5150_v34  ;;  %2730 = vrot.lane.b32.xlu1 %v2657_v4, %s4809_s11 }
 0x39f   :  { %v6217_v60 = vpop.permute.xlu0 %2811 }
 0x3a0   :  { %v2931_v5 = vcombine.low %v2907_v52, %v2923_v58 }
 0x3a2   :  { %3208 = vrot.lane.b32.xlu1 %v3135_v26, %s4809_s11  ;;  %v6230_v43 = vrot.slane %v2931_v5, %v5168_v53  ;;  %v2678_v5 = vcombine.high %v6135_v61, %v6141_v24  ;;  %v2662_v26 = vcombine.high %v6129_v56, %v6133_v8  ;;  %v2385_v61 = vcombine.low %v6241_v15, %v6244_v37 }
 0x3a3   :  { %v6232_v4 = vpop.permute.xlu0 %2819  ;;  %v3204_v56 = vcombine.high %v3186_v31, %v7534_v17  ;;  %v2454_v8 = vcombine.high %v2429_v45, %v2445_v27  ;;  %v2831_v24 = vcombine.low %v6213_v28, %v6234_v62  ;;  %v3118_v31 = vrot.slane %v3104_v40, %v5168_v53 }
 0x3a4   :  { %7537 = vst [vmem:[#allocation31_spill] sm:$0xff] %v6230_v43  ;;  %v2963_v20 = vcombine.high %v6230_v43, %v7534_v17  ;;  %v2847_v43 = vcombine.low %v6217_v60, %v6232_v4  ;;  %v6271_v12 = vrot.slane %v2662_v26, %v5150_v34  ;;  %v6281_v45 = vrot.slane %v2385_v61, %v5168_v53 }
 0x3a5   :  { %v3140_v27 = vcombine.high %v5977_v42, %v5986_v49  ;;  %v3136_v11 = vcombine.high %v3118_v31, %v7534_v17 }
 0x3a6   :  { %2518 = vrot.lane.b32.xlu1 %v2485_v55, %s4809_s11  ;;  %2996 = vrot.lane.b32.xlu0 %v2963_v20, %s4809_s11  ;;  %v6262_v55 = vrot.slane %v2678_v5, %v5150_v34  ;;  %v6267_v20 = vpop.permute.xlu1 %3519  ;;  %v6277_v51 = vrot.slane %v2847_v43, %v5150_v34  ;;  %7538 = vst [vmem:[#allocation32_spill] sm:$0xff] %v6281_v45 }
 0x3a7   :  { %v6252_v0 = vpop.permute.xlu0 %3523  ;;  %v3156_v5 = vcombine.high %v5992_v33, %v6004_v29  ;;  %v2417_v42 = vcombine.high %v6281_v45, %v7534_v17  ;;  %v6302_v49 = vrot.slane %v3140_v27, %v5150_v34  ;;  %v2932_v29 = vcombine.high %v2907_v52, %v2923_v58 }
 0x3a8   :  { %v2709_v26 = vcombine.low %v6271_v12, %v6262_v55 }
 0x3a9   :  { %v6305_v33 = vrot.slane %v3156_v5, %v5150_v34  ;;  %v2946_v27 = vrot.slane %v2932_v29, %v5168_v53 }
 0x3aa   :  { %2766 = vrot.lane.b32.xlu1 %v2726_v3, %s4810_s12  ;;  %3244 = vrot.lane.b32.xlu0 %v3204_v56, %s4810_s12  ;;  %v2468_v3 = vrot.slane %v2454_v8, %v5168_v53  ;;  %v6291_v56 = vrot.slane %v2831_v24, %v5150_v34  ;;  %v6297_v40 = vpop.permute.xlu1 %3527  ;;  %v2717_v8 = vrot.slane %v2709_v26, %v5168_v53 }
 0x3ab   :  { %v6274_v38 = vpop.permute.xlu0 %3531  ;;  %v2658_v24 = vcombine.high %v6196_v41, %v7534_v17  ;;  %v3187_v5 = vcombine.low %v6302_v49, %v6305_v33  ;;  %v2610_v26 = vcombine.high %v6153_v22, %v6169_v32  ;;  %v2386_v22 = vcombine.high %v6241_v15, %v6244_v37 }
 0x3ac   :  { %v2863_v43 = vcombine.low %v6291_v56, %v6277_v51  ;;  %v3088_v37 = vcombine.high %v6040_v7, %v6052_v21 }
 0x3ad   :  { %v6336_v29 = vrot.slane %v2610_v26, %v5150_v34  ;;  %v3072_v26 = vcombine.high %v6022_v14, %v6034_v1  ;;  %v2727_v14 = vcombine.high %v2717_v8, %v7534_v17  ;;  %v3609_v1 = vcombine.low %v6267_v20, %v6297_v40 }
 0x3ae   :  { %3212 = vrot.lane.b32.xlu1 %v3118_v31, %s4806_s8  ;;  %2522 = vrot.lane.b32.xlu0 %v2468_v3, %s4806_s8  ;;  %v6315_v45 = vrot.slane %v2863_v43, %v5168_v53  ;;  %v6320_v52 = vpop.permute.xlu1 %3993  ;;  %v3195_v43 = vrot.slane %v3187_v5, %v5168_v53 }
 0x3af   :  { %v6307_v61 = vpop.permute.xlu0 %3997  ;;  %v6372_v7 = vrot.slane %v3072_v26, %v5150_v34 }
 0x3b0   :  { %7539 = vst [vmem:[#allocation33_spill] sm:$0xff] %v6315_v45  ;;  %v2895_v41 = vcombine.high %v6315_v45, %v7534_v17  ;;  %v2964_v45 = vcombine.high %v2946_v27, %v7534_v17 }
 0x3b2   :  { %2490 = vrot.lane.b32.xlu1 %v2417_v42, %s4809_s11  ;;  %2770 = vrot.lane.b32.xlu0 %v2717_v8, %s4807_s9  ;;  %v2594_v42 = vcombine.high %v6137_v30, %v6145_v23  ;;  %v2486_v30 = vcombine.high %v2468_v3, %v7534_v17  ;;  %v3625_v3 = vcombine.low %v6252_v0, %v6274_v38 }
 0x3b3   :  { %v6323_v58 = vpop.permute.xlu0 %4005  ;;  %v2864_v8 = vcombine.high %v6291_v56, %v6277_v51  ;;  %v6399_v51 = vrot.slane %v3609_v1, %v5150_v34 }
 0x3b4   :  { %v4099_v32 = vcombine.low %v6307_v61, %v6323_v58  ;;  %v6349_v23 = vrot.slane %v2594_v42, %v5150_v34 }
 0x3b6   :  { %2738 = vrot.lane.b32.xlu1 %v2658_v24, %s4810_s12  ;;  %3000 = vrot.lane.b32.xlu0 %v2946_v27, %s4806_s8  ;;  %v6338_v24 = vpop.permute.xlu1 %4001  ;;  %v2641_v15 = vcombine.low %v6349_v23, %v6336_v29 }
 0x3b7   :  { %v6345_v5 = vpop.permute.xlu0 %3521  ;;  %v4083_v31 = vcombine.low %v6320_v52, %v6338_v24 }
 0x3b9   :  { %v6375_v21 = vrot.slane %v4083_v31, %v5150_v34 }
 0x3ba   :  { %2968 = vrot.lane.b32.xlu1 %v2895_v41, %s4809_s11  ;;  %3248 = vrot.lane.b32.xlu0 %v3195_v43, %s4807_s9  ;;  %v2400_v41 = vrot.slane %v2386_v22, %v5168_v53  ;;  %v6381_v22 = vrot.slane %v3088_v37, %v5150_v34  ;;  %v6389_v26 = vpop.permute.xlu1 %3517  ;;  %v2438_v37 = vcombine.high %v5937_v44, %v5945_v39 }
 0x3bb   :  { %v6377_v42 = vpop.permute.xlu0 %3529  ;;  %7540 = vst [vmem:[#allocation34_spill] sm:$0xff] %v6389_v26 }
 0x3bc   :  { %v3119_v27 = vcombine.low %v6372_v7, %v6381_v22  ;;  %v6418_v39 = vrot.slane %v2438_v37, %v5150_v34  ;;  %v2900_v37 = vcombine.high %v6155_v6, %v6184_v10  ;;  %v3557_v10 = vcombine.low %v6345_v5, %v6377_v42 }
 0x3be   :  { %3216 = vrot.lane.b32.xlu1 %v3136_v11, %s4810_s12  ;;  %2526 = vrot.lane.b32.xlu0 %v2486_v30, %s4810_s12  ;;  %v6365_v11 = vrot.slane %v4099_v32, %v5150_v34  ;;  %v6386_v32 = vrot.slane %v3625_v3, %v5150_v34  ;;  %v2649_v30 = vrot.slane %v2641_v15, %v5168_v53 }
 0x3bf   :  { %v2878_v15 = vrot.slane %v2864_v8, %v5168_v53  ;;  %v6408_v3 = vpop.permute.xlu0 %3995  ;;  %v3127_v1 = vrot.slane %v3119_v27, %v5168_v53  ;;  %v6452_v6 = vrot.slane %v2900_v37, %v5150_v34 }
 0x3c0   :  { %v4115_v31 = vcombine.low %v6375_v21, %v6365_v11  ;;  %v3641_v56 = vcombine.low %v6399_v51, %v6386_v32 }
 0x3c2   :  { %2494 = vrot.lane.b32.xlu1 %v2400_v41, %s4806_s8  ;;  %2774 = vrot.lane.b32.xlu0 %v2727_v14, %s4811_s13  ;;  %v2422_v14 = vcombine.high %v5927_v47, %v5933_v48  ;;  %v3205_v47 = vcombine.high %v3195_v43, %v7534_v17  ;;  %v6412_v48 = vrot.slane %v4115_v31, %v5168_v53 }
 0x3c3   :  { %v6426_v8 = vrot.slane %v3641_v56, %v5168_v53  ;;  %v2916_v43 = vcombine.high %v6186_v18, %v6201_v59  ;;  %v2710_v18 = vcombine.high %v6271_v12, %v6262_v55 }
 0x3c4   :  { %7541 = vst [vmem:[#allocation35_spill] sm:$0xff] %v6412_v48  ;;  %v6415_v44 = vrot.slane %v2422_v14, %v5150_v34  ;;  %v4147_v31 = vcombine.high %v6412_v48, %v7534_v17 }
 0x3c5   :  { %7542 = vst [vmem:[#allocation36_spill] sm:$0xff] %v6426_v8  ;;  %v3673_v56 = vcombine.high %v6426_v8, %v7534_v17  ;;  %v6445_v59 = vrot.slane %v2916_v43, %v5150_v34  ;;  %v2724_v43 = vrot.slane %v2710_v18, %v5168_v53  ;;  %v2659_v8 = vcombine.high %v2649_v30, %v7534_v17 }
 0x3c6   :  { %2742 = vrot.lane.b32.xlu1 %v2649_v30, %s4807_s9  ;;  %3004 = vrot.lane.b32.xlu0 %v2964_v45, %s4810_s12  ;;  %v6421_v45 = vpop.permute.xlu1 %3525  ;;  %v2469_v14 = vcombine.low %v6415_v44, %v6418_v39  ;;  %v3188_v18 = vcombine.high %v6302_v49, %v6305_v33  ;;  %v2896_v49 = vcombine.high %v2878_v15, %v7534_v17 }
 0x3c7   :  { %v2947_v55 = vcombine.low %v6452_v6, %v6445_v59  ;;  %v3642_v33 = vcombine.high %v6399_v51, %v6386_v32  ;;  %v2354_v32 = vcombine.high %v5941_v46, %v5949_v54  ;;  %v2370_v51 = vcombine.high %v5953_v25, %v5959_v13 }
 0x3c8   :  { %v2477_v48 = vrot.slane %v2469_v14, %v5168_v53  ;;  %v3541_v14 = vcombine.low %v6389_v26, %v6421_v45 }
 0x3c9   :  { %v2955_v19 = vrot.slane %v2947_v55, %v5168_v53  ;;  %v6531_v25 = vrot.slane %v2354_v32, %v5150_v34  ;;  %v6534_v13 = vrot.slane %v2370_v51, %v5150_v34  ;;  %v2832_v32 = vcombine.high %v6213_v28, %v6234_v62 }
 0x3ca   :  { %2972 = vrot.lane.b32.xlu1 %v2878_v15, %s4806_s8  ;;  %3252 = vrot.lane.b32.xlu0 %v3205_v47, %s4811_s13  ;;  %v6437_v47 = vpop.permute.xlu0 %4003  ;;  %v6447_v27 = vpop.permute.xlu1 %3991  ;;  %v6479_v26 = vrot.slane %v3541_v14, %v5150_v34  ;;  %v3202_v14 = vrot.slane %v3188_v18, %v5168_v53  ;;  %v4116_v18 = vcombine.high %v6375_v21, %v6365_v11 }
 0x3cb   :  { %7543 = vst [vmem:[#allocation37_spill] sm:$0xff] %v6447_v27  ;;  %v3851_v28 = vcombine.low %v5998_v9, %v6010_v2  ;;  %v3867_v62 = vcombine.low %v6016_v36, %v6028_v16 }
 0x3cc   :  { %v4130_v11 = vrot.slane %v4116_v18, %v5168_v53 }
 0x3ce   :  { %3220 = vrot.lane.b32.xlu1 %v3127_v1, %s4807_s9  ;;  %4180 = vrot.lane.b32.xlu0 %v4147_v31, %s4809_s11  ;;  %v2418_v31 = vcombine.high %v2400_v41, %v7534_v17  ;;  %v6460_v12 = vpop.permute.xlu0 %3291  ;;  %v6466_v37 = vpop.permute.xlu1 %3999  ;;  %v4031_v41 = vcombine.low %v6408_v3, %v6437_v47 }
 0x3cf   :  { %7544 = vst [vmem:[#allocation38_spill] sm:$0xff] %v6466_v37 }
 0x3d0   :  { %v6490_v55 = vrot.slane %v4031_v41, %v5150_v34 }
 0x3d2   :  { %3706 = vrot.lane.b32.xlu1 %v3673_v56, %s4809_s11  ;;  %2530 = vrot.lane.b32.xlu0 %v2477_v48, %s4807_s9  ;;  %v6470_v56 = vrot.slane %v3557_v10, %v5150_v34  ;;  %v6484_v10 = vpop.permute.xlu0 %3299 }
 0x3d3   :  { %v3393_v18 = vcombine.low %v6460_v12, %v6484_v10 }
 0x3d4   :  { %v3573_v30 = vcombine.low %v6479_v26, %v6470_v56 }
 0x3d6   :  { %2498 = vrot.lane.b32.xlu1 %v2418_v31, %s4810_s12  ;;  %2778 = vrot.lane.b32.xlu0 %v2724_v43, %s4808_s10  ;;  %v4015_v31 = vcombine.low %v6447_v27, %v6466_v37  ;;  %v3137_v37 = vcombine.high %v3127_v1, %v7534_v17  ;;  %v6507_v15 = vrot.slane %v3573_v30, %v5168_v53 }
 0x3d8   :  { %v6497_v27 = vrot.slane %v4015_v31, %v5150_v34  ;;  %7545 = vst [vmem:[#allocation39_spill] sm:$0xff] %v6507_v15  ;;  %v6515_v31 = vpop.permute.xlu0 %3289  ;;  %v3605_v46 = vcombine.high %v6507_v15, %v7534_v17  ;;  %v6588_v15 = vrot.slane %v3867_v62, %v5150_v34  ;;  %v3206_v62 = vcombine.high %v3202_v14, %v7534_v17 }
 0x3da   :  { %2746 = vrot.lane.b32.xlu1 %v2659_v8, %s4811_s13  ;;  %3008 = vrot.lane.b32.xlu0 %v2955_v19, %s4807_s9  ;;  %v6499_v8 = vpop.permute.xlu1 %3287  ;;  %v4047_v41 = vcombine.low %v6497_v27, %v6490_v55 }
 0x3dc   :  { %v6528_v54 = vrot.slane %v4047_v41, %v5168_v53  ;;  %v6538_v21 = vpop.permute.xlu0 %3297  ;;  %v2487_v41 = vcombine.high %v2477_v48, %v7534_v17 }
 0x3de   :  { %2976 = vrot.lane.b32.xlu1 %v2896_v49, %s4810_s12  ;;  %3256 = vrot.lane.b32.xlu0 %v3202_v14, %s4808_s10  ;;  %v6518_v49 = vrot.slane %v3642_v33, %v5168_v53  ;;  %v6523_v1 = vpop.permute.xlu1 %3295  ;;  %7546 = vst [vmem:[#allocation40_spill] sm:$0xff] %v6528_v54  ;;  %v4079_v30 = vcombine.high %v6528_v54, %v7534_v17 }
 0x3df   :  { %v2401_v33 = vcombine.low %v6531_v25, %v6534_v13  ;;  %v2965_v54 = vcombine.high %v2955_v19, %v7534_v17  ;;  %v3574_v19 = vcombine.high %v6479_v26, %v6470_v56 }
 0x3e1   :  { %v2409_v48 = vrot.slane %v2401_v33, %v5168_v53  ;;  %v6579_v33 = vrot.slane %v3393_v18, %v5150_v34 }
 0x3e2   :  { %3224 = vrot.lane.b32.xlu1 %v3137_v37, %s4811_s13  ;;  %3710 = vrot.lane.b32.xlu0 %v6518_v49, %s4806_s8  ;;  %v2848_v37 = vcombine.high %v6217_v60, %v6232_v4  ;;  %v6550_v51 = vpop.permute.xlu1 %3285  ;;  %v2642_v60 = vcombine.high %v6349_v23, %v6336_v29  ;;  %v6570_v29 = vrot.slane %v2832_v32, %v5150_v34 }
 0x3e3   :  { %v3377_v23 = vcombine.low %v6499_v8, %v6523_v1  ;;  %v6585_v32 = vrot.slane %v3851_v28, %v5150_v34  ;;  %v3120_v28 = vcombine.high %v6372_v7, %v6381_v22  ;;  %v6619_v22 = vrot.slane %v3574_v19, %v5168_v53 }
 0x3e4   :  { %v6557_v4 = vrot.slane %v2848_v37, %v5150_v34  ;;  %v4048_v19 = vcombine.high %v6497_v27, %v6490_v55 }
 0x3e6   :  { %3678 = vrot.lane.b32.xlu1 %v3605_v46, %s4809_s11  ;;  %4184 = vrot.lane.b32.xlu0 %v4130_v11, %s4806_s8  ;;  %v6566_v46 = vpop.permute.xlu0 %4235  ;;  %v2879_v37 = vcombine.low %v6570_v29, %v6557_v4 }
 0x3e7   :  { %7547 = vst [vmem:[#allocation41_spill] sm:$0xff] %v6566_v46 }
 0x3e8   :  { %v2887_v18 = vrot.slane %v2879_v37, %v5168_v53 }
 0x3ea   :  { %4152 = vrot.lane.b32.xlu1 %v4079_v30, %s4809_s11  ;;  %2534 = vrot.lane.b32.xlu0 %v2487_v41, %s4811_s13  ;;  %v2728_v30 = vcombine.high %v2724_v43, %v7534_v17  ;;  %v6581_v41 = vpop.permute.xlu1 %3293  ;;  %v2656_v43 = vrot.slane %v2642_v60, %v5168_v53  ;;  %v6595_v46 = vpop.permute.xlu0 %4243 }
 0x3ee   :  { %2502 = vrot.lane.b32.xlu1 %v2409_v48, %s4807_s9  ;;  %2782 = vrot.lane.b32.xlu0 %v2728_v30, %s4812_s14  ;;  %v6592_v30 = vrot.slane %v3377_v23, %v5150_v34  ;;  %v3883_v23 = vcombine.low %v6585_v32, %v6588_v15  ;;  %v6608_v36 = vpop.permute.xlu1 %4231  ;;  %v6616_v7 = vpop.permute.xlu0 %4233 }
 0x3ef   :  { %7549 = vst [vmem:[#allocation43_spill] sm:$0xff] %v6616_v7 }
 0x3f0   :  { %v3409_v60 = vcombine.low %v6592_v30, %v6579_v33  ;;  %v6622_v26 = vrot.slane %v3883_v23, %v5168_v53  ;;  %v4148_v23 = vcombine.high %v4130_v11, %v7534_v17  ;;  %v2419_v11 = vcombine.high %v2409_v48, %v7534_v17 }
 0x3f2   :  { %2750 = vrot.lane.b32.xlu1 %v2656_v43, %s4808_s10  ;;  %3012 = vrot.lane.b32.xlu0 %v2965_v54, %s4811_s13  ;;  %v3134_v54 = vrot.slane %v3120_v28, %v5168_v53  ;;  %v6614_v37 = vrot.slane %v3409_v60, %v5168_v53  ;;  %7550 = vst [vmem:[#allocation44_spill] sm:$0xff] %v6622_v26  ;;  %v6627_v56 = vpop.permute.xlu1 %4239  ;;  %v6634_v28 = vpop.permute.xlu0 %4241 }
 0x3f3   :  { %v3915_v60 = vcombine.high %v6622_v26, %v7534_v17  ;;  %v3610_v26 = vcombine.high %v6267_v20, %v6297_v40  ;;  %v3410_v20 = vcombine.high %v6592_v30, %v6579_v33 }
 0x3f4   :  { %7548 = vst [vmem:[#allocation42_spill] sm:$0xff] %v6614_v37  ;;  %v3441_v14 = vcombine.high %v6614_v37, %v7534_v17  ;;  %v2470_v37 = vcombine.high %v6415_v44, %v6418_v39  ;;  %v3309_v44 = vcombine.low %v6550_v51, %v6581_v41  ;;  %v3138_v40 = vcombine.high %v3134_v54, %v7534_v17 }
 0x3f6   :  { %2980 = vrot.lane.b32.xlu1 %v2887_v18, %s4807_s9  ;;  %3260 = vrot.lane.b32.xlu0 %v3206_v62, %s4812_s14  ;;  %v3674_v62 = vcombine.high %v6518_v49, %v7534_v17  ;;  %v6644_v7 = vpop.permute.xlu1 %4229  ;;  %v6653_v27 = vpop.permute.xlu0 %3236  ;;  %v6656_v55 = vrot.slane %v2470_v37, %v5168_v53  ;;  %v3626_v37 = vcombine.high %v6252_v0, %v6274_v38 }
 0x3f7   :  { %v3799_v0 = vcombine.low %v6063_v35, %v6071_v63  ;;  %v2948_v38 = vcombine.high %v6452_v6, %v6445_v59 }
 0x3f9   :  { %v2962_v33 = vrot.slane %v2948_v38, %v5168_v53 }
 0x3fa   :  { %3228 = vrot.lane.b32.xlu1 %v3134_v54, %s4808_s10  ;;  %3682 = vrot.lane.b32.xlu0 %v6619_v22, %s4806_s8  ;;  %v6667_v49 = vpop.permute.xlu1 %4237 }
 0x3fe   :  { %3474 = vrot.lane.b32.xlu1 %v3441_v14, %s4809_s11  ;;  %3948 = vrot.lane.b32.xlu0 %v3915_v60, %s4809_s11  ;;  %v3325_v14 = vcombine.low %v6515_v31, %v6538_v21  ;;  %v6651_v60 = vrot.slane %v4048_v19, %v5168_v53 }
 0x400   :  { %v6665_v39 = vrot.slane %v3325_v14, %v5150_v34  ;;  %v3783_v14 = vcombine.low %v6046_v50, %v6058_v57 }
 0x402   :  { %3714 = vrot.lane.b32.xlu1 %v3674_v62, %s4810_s12  ;;  %4188 = vrot.lane.b32.xlu0 %v4148_v23, %s4810_s12  ;;  %v2897_v62 = vcombine.high %v2887_v18, %v7534_v17  ;;  %v6676_v23 = vrot.slane %v3309_v44, %v5150_v34  ;;  %v2660_v44 = vcombine.high %v2656_v43, %v7534_v17 }
 0x403   :  { %v6707_v6 = vrot.slane %v3783_v14, %v5150_v34  ;;  %v6710_v43 = vrot.slane %v3799_v0, %v5150_v34  ;;  %v4084_v14 = vcombine.high %v6320_v52, %v6338_v24  ;;  %v3884_v52 = vcombine.high %v6585_v32, %v6588_v15 }
 0x404   :  { %v3341_v48 = vcombine.low %v6676_v23, %v6665_v39 }
 0x405   :  { %v6743_v24 = vrot.slane %v4084_v14, %v5150_v34  ;;  %v3898_v15 = vrot.slane %v3884_v52, %v5168_v53  ;;  %v4080_v52 = vcombine.high %v6651_v60, %v7534_v17 }
 0x406   :  { %4156 = vrot.lane.b32.xlu1 %v6651_v60, %s4806_s8  ;;  %2538 = vrot.lane.b32.xlu0 %v6656_v55, %s4808_s10  ;;  %v6672_v19 = vpop.permute.xlu0 %2762  ;;  %v6716_v30 = vrot.slane %v3341_v48, %v5168_v53  ;;  %v3815_v48 = vcombine.low %v6707_v6, %v6710_v43 }
 0x408   :  { %v6690_v18 = vpop.permute.xlu1 %2758  ;;  %7551 = vst [vmem:[#allocation45_spill] sm:$0xff] %v6716_v30  ;;  %v3373_v38 = vcombine.high %v6716_v30, %v7534_v17  ;;  %v6751_v30 = vrot.slane %v3815_v48, %v5168_v53 }
 0x40a   :  { %2506 = vrot.lane.b32.xlu1 %v2419_v11, %s4811_s13  ;;  %2984 = vrot.lane.b32.xlu0 %v2897_v62, %s4811_s13  ;;  %v6694_v11 = vrot.slane %v3626_v37, %v5150_v34  ;;  %v6701_v62 = vrot.slane %v3610_v26, %v5150_v34  ;;  %v6703_v59 = vpop.permute.xlu0 %3240  ;;  %v4100_v26 = vcombine.high %v6307_v61, %v6323_v58 }
 0x40b   :  { %7554 = vst [vmem:[#allocation48_spill] sm:$0xff] %v6751_v30  ;;  %v3847_v14 = vcombine.high %v6751_v30, %v7534_v17  ;;  %v2488_v30 = vcombine.high %v6656_v55, %v7534_v17  ;;  %v7558_v55 = vld [vmem:[#allocation34_spill] sm:$0xff] }
 0x40c   :  { %v3657_v54 = vcombine.low %v6701_v62, %v6694_v11 }
 0x40e   :  { %2754 = vrot.lane.b32.xlu1 %v2660_v44, %s4812_s14  ;;  %3232 = vrot.lane.b32.xlu0 %v3138_v40, %s4812_s14  ;;  %v3424_v44 = vrot.slane %v3410_v20, %v5168_v53  ;;  %v6734_v40 = vrot.slane %v4100_v26, %v5150_v34  ;;  %v6736_v61 = vpop.permute.xlu0 %2734  ;;  %v3665_v58 = vrot.slane %v3657_v54, %v5168_v53 }
 0x40f   :  { %7552 = vst [vmem:[#allocation46_spill] sm:$0xff] %v6736_v61  ;;  %v3606_v26 = vcombine.high %v6619_v22, %v7534_v17 }
 0x410   :  { %v6712_v37 = vpop.permute.xlu1 %2730  ;;  %v4131_v54 = vcombine.low %v6743_v24, %v6734_v40 }
 0x412   :  { %3016 = vrot.lane.b32.xlu1 %v2962_v33, %s4808_s10  ;;  %3478 = vrot.lane.b32.xlu0 %v3424_v44, %s4806_s8 }
 0x414   :  { %v6727_v0 = vpop.permute.xlu1 %3208 }
 0x416   :  { %3446 = vrot.lane.b32.xlu1 %v3373_v38, %s4809_s11  ;;  %3718 = vrot.lane.b32.xlu0 %v3665_v58, %s4807_s9  ;;  %v4139_v38 = vrot.slane %v4131_v54, %v5168_v53  ;;  %v2880_v54 = vcombine.high %v6570_v29, %v6557_v4 }
 0x418   :  { %v6746_v20 = vpop.permute.xlu1 %2518  ;;  %v6755_v61 = vpop.permute.xlu0 %2996  ;;  %v2894_v29 = vrot.slane %v2880_v54, %v5168_v53 }
 0x419   :  { %7553 = vst [vmem:[#allocation47_spill] sm:$0xff] %v6746_v20  ;;  %7555 = vst [vmem:[#allocation49_spill] sm:$0xff] %v6755_v61 }
 0x41a   :  { %3686 = vrot.lane.b32.xlu1 %v3606_v26, %s4810_s12  ;;  %3952 = vrot.lane.b32.xlu0 %v3898_v15, %s4806_s8  ;;  %v2402_v26 = vcombine.high %v6531_v25, %v6534_v13  ;;  %v2966_v13 = vcombine.high %v2962_v33, %v7534_v17  ;;  %v3442_v33 = vcombine.high %v3424_v44, %v7534_v17 }
 0x41b   :  { %v3675_v44 = vcombine.high %v3665_v58, %v7534_v17  ;;  %v3394_v58 = vcombine.high %v6460_v12, %v6484_v10 }
 0x41c   :  { %v6760_v32 = vpop.permute.xlu1 %2766  ;;  %v6764_v22 = vpop.permute.xlu0 %3244  ;;  %v2416_v60 = vrot.slane %v2402_v26, %v5168_v53 }
 0x41d   :  { %v6851_v10 = vrot.slane %v3394_v58, %v5150_v34 }
 0x41e   :  { %3920 = vrot.lane.b32.xlu1 %v3847_v14, %s4809_s11  ;;  %4192 = vrot.lane.b32.xlu0 %v4139_v38, %s4807_s9  ;;  %v3558_v14 = vcombine.high %v6345_v5, %v6377_v42  ;;  %v3342_v5 = vcombine.high %v6676_v23, %v6665_v39  ;;  %v4032_v39 = vcombine.high %v6408_v3, %v6437_v47 }
 0x41f   :  { %v3816_v47 = vcombine.high %v6707_v6, %v6710_v43 }
 0x420   :  { %v6769_v48 = vpop.permute.xlu1 %3212  ;;  %v6775_v61 = vpop.permute.xlu0 %2522  ;;  %v6796_v4 = vrot.slane %v3558_v14, %v5150_v34  ;;  %v3356_v26 = vrot.slane %v3342_v5, %v5168_v53  ;;  %v7561_v14 = vld [vmem:[#allocation37_spill] sm:$0xff] }
 0x421   :  { %7556 = vst [vmem:[#allocation50_spill] sm:$0xff] %v6775_v61  ;;  %v3542_v61 = vcombine.high %v7558_v55, %v6421_v45  ;;  %v6826_v55 = vrot.slane %v4032_v39, %v5150_v34  ;;  %v3378_v39 = vcombine.high %v6499_v8, %v6523_v1  ;;  %v3830_v12 = vrot.slane %v3816_v47, %v5168_v53  ;;  %v7563_v47 = vld [vmem:[#allocation18_spill] sm:$0xff] }
 0x422   :  { %4160 = vrot.lane.b32.xlu1 %v4080_v52, %s4810_s12  ;;  %2542 = vrot.lane.b32.xlu0 %v2488_v30, %s4812_s14  ;;  %v3868_v58 = vcombine.high %v7563_v47, %v6028_v16  ;;  %v3658_v16 = vcombine.high %v6701_v62, %v6694_v11  ;;  %v3326_v11 = vcombine.high %v6515_v31, %v6538_v21 }
 0x423   :  { %v6807_v45 = vrot.slane %v3542_v61, %v5150_v34  ;;  %v7560_v61 = vld [vmem:[#allocation38_spill] sm:$0xff]  ;;  %v6858_v8 = vrot.slane %v3378_v39, %v5150_v34  ;;  %v2898_v39 = vcombine.high %v2894_v29, %v7534_v17 }
 0x424   :  { %v6785_v20 = vpop.permute.xlu1 %2490  ;;  %v6788_v25 = vpop.permute.xlu0 %2770  ;;  %v6916_v31 = vrot.slane %v3326_v11, %v5150_v34 }
 0x425   :  { %7557 = vst [vmem:[#allocation51_spill] sm:$0xff] %v6785_v20  ;;  %v3589_v52 = vcombine.low %v6807_v45, %v6796_v4  ;;  %v3310_v20 = vcombine.high %v6550_v51, %v6581_v41  ;;  %v3784_v51 = vcombine.high %v6046_v50, %v6058_v57  ;;  %v3800_v41 = vcombine.high %v6063_v35, %v6071_v63 }
 0x426   :  { %2510 = vrot.lane.b32.xlu1 %v2416_v60, %s4808_s10  ;;  %3020 = vrot.lane.b32.xlu0 %v2966_v13, %s4812_s14  ;;  %v4016_v13 = vcombine.high %v7561_v14, %v7560_v61  ;;  %v3916_v61 = vcombine.high %v3898_v15, %v7534_v17  ;;  %v3590_v35 = vcombine.high %v6807_v45, %v6796_v4 }
 0x427   :  { %v3597_v3 = vrot.slane %v3589_v52, %v5168_v53  ;;  %v4149_v52 = vcombine.high %v4139_v38, %v7534_v17  ;;  %v3425_v38 = vcombine.low %v6858_v8, %v6851_v10  ;;  %v6942_v50 = vrot.slane %v3784_v51, %v5150_v34 }
 0x428   :  { %v6800_v42 = vpop.permute.xlu1 %2738  ;;  %v6803_v30 = vpop.permute.xlu0 %3000  ;;  %v6839_v14 = vrot.slane %v4016_v13, %v5150_v34  ;;  %v3852_v13 = vcombine.high %v5998_v9, %v6010_v2  ;;  %v6882_v2 = vrot.slane %v3868_v58, %v5150_v34  ;;  %v3672_v58 = vrot.slane %v3658_v16, %v5168_v53 }
 0x429   :  { %v6945_v57 = vrot.slane %v3800_v41, %v5150_v34  ;;  %v3604_v51 = vrot.slane %v3590_v35, %v5168_v53 }
 0x42a   :  { %2988 = vrot.lane.b32.xlu1 %v2894_v29, %s4808_s10  ;;  %3482 = vrot.lane.b32.xlu0 %v3442_v33, %s4810_s12  ;;  %v4063_v6 = vcombine.low %v6839_v14, %v6826_v55  ;;  %v6879_v9 = vrot.slane %v3852_v13, %v5150_v34  ;;  %v3433_v29 = vrot.slane %v3425_v38, %v5168_v53 }
 0x42b   :  { %v3607_v38 = vcombine.high %v3597_v3, %v7534_v17  ;;  %v3831_v41 = vcombine.low %v6942_v50, %v6945_v57 }
 0x42c   :  { %v6815_v23 = vpop.permute.xlu1 %2968  ;;  %v6818_v54 = vpop.permute.xlu0 %3248 }
 0x42d   :  { %7559 = vst [vmem:[#allocation34_spill] sm:$0xff] %v6815_v23 }
 0x42e   :  { %3450 = vrot.lane.b32.xlu1 %v3356_v26, %s4806_s8  ;;  %3722 = vrot.lane.b32.xlu0 %v3675_v44, %s4811_s13  ;;  %v4071_v44 = vrot.slane %v4063_v6, %v5168_v53  ;;  %v2420_v6 = vcombine.high %v2416_v60, %v7534_v17  ;;  %v3374_v60 = vcombine.high %v3356_v26, %v7534_v17 }
 0x42f   :  { %v4132_v26 = vcombine.high %v6743_v24, %v6734_v40  ;;  %v6923_v24 = vrot.slane %v3310_v20, %v5150_v34  ;;  %v3443_v20 = vcombine.high %v3433_v29, %v7534_v17 }
 0x430   :  { %v6828_v33 = vpop.permute.xlu1 %3216  ;;  %v6835_v5 = vpop.permute.xlu0 %2526  ;;  %v4081_v11 = vcombine.high %v4071_v44, %v7534_v17 }
 0x431   :  { %v4146_v40 = vrot.slane %v4132_v26, %v5168_v53 }
 0x432   :  { %3690 = vrot.lane.b32.xlu1 %v3597_v3, %s4807_s9  ;;  %3956 = vrot.lane.b32.xlu0 %v3916_v61, %s4810_s12  ;;  %v3848_v3 = vcombine.high %v3830_v12, %v7534_v17 }
 0x434   :  { %v6847_v43 = vpop.permute.xlu1 %2494  ;;  %v6853_v15 = vpop.permute.xlu0 %2774 }
 0x435   :  { %7562 = vst [vmem:[#allocation38_spill] sm:$0xff] %v6847_v43  ;;  %v3899_v43 = vcombine.low %v6879_v9, %v6882_v2 }
 0x436   :  { %3924 = vrot.lane.b32.xlu1 %v3830_v12, %s4806_s8  ;;  %4196 = vrot.lane.b32.xlu0 %v4149_v52, %s4811_s13 }
 0x437   :  { %v3907_v16 = vrot.slane %v3899_v43, %v5168_v53  ;;  %v3357_v43 = vcombine.low %v6923_v24, %v6916_v31 }
 0x438   :  { %v6861_v1 = vpop.permute.xlu1 %2742  ;;  %v6870_v61 = vpop.permute.xlu0 %3004 }
 0x439   :  { %7564 = vst [vmem:[#allocation37_spill] sm:$0xff] %v6870_v61  ;;  %v3917_v45 = vcombine.high %v3907_v16, %v7534_v17 }
 0x43a   :  { %4164 = vrot.lane.b32.xlu1 %v4071_v44, %s4807_s9  ;;  %2992 = vrot.lane.b32.xlu0 %v2898_v39, %s4812_s14  ;;  %v3365_v44 = vrot.slane %v3357_v43, %v5168_v53 }
 0x43c   :  { %v6875_v52 = vpop.permute.xlu1 %2972  ;;  %v6886_v47 = vpop.permute.xlu0 %3252 }
 0x43d   :  { %7565 = vst [vmem:[#allocation18_spill] sm:$0xff] %v6875_v52  ;;  %v7572_v52 = vld [vmem:[#allocation22_spill] sm:$0xff] }
 0x43e   :  { %2514 = vrot.lane.b32.xlu1 %v2420_v6, %s4812_s14  ;;  %3486 = vrot.lane.b32.xlu0 %v3433_v29, %s4807_s9  ;;  %v3676_v29 = vcombine.high %v3672_v58, %v7534_v17 }
 0x440   :  { %v6891_v39 = vpop.permute.xlu1 %3220  ;;  %v6894_v13 = vpop.permute.xlu0 %4180 }
 0x442   :  { %3454 = vrot.lane.b32.xlu1 %v3374_v60, %s4810_s12  ;;  %3726 = vrot.lane.b32.xlu0 %v3672_v58, %s4808_s10  ;;  %v4064_v58 = vcombine.high %v6839_v14, %v6826_v55  ;;  %v7570_v55 = vld [vmem:[#allocation23_spill] sm:$0xff]  ;;  %v7571_v14 = vld [vmem:[#allocation20_spill] sm:$0xff] }
 0x444   :  { %v6903_v62 = vpop.permute.xlu1 %3706  ;;  %v6908_v6 = vpop.permute.xlu0 %2530 }
 0x446   :  { %3694 = vrot.lane.b32.xlu1 %v3607_v38, %s4811_s13  ;;  %3960 = vrot.lane.b32.xlu0 %v3907_v16, %s4807_s9  ;;  %v7569_v16 = vld [vmem:[#allocation27_spill] sm:$0xff] }
 0x448   :  { %v6918_v21 = vpop.permute.xlu1 %2498  ;;  %v2779_v60 = vpop.permute.xlu0 %2778 }
 0x449   :  { %7566 = vst [vmem:[#allocation52_spill] sm:$0xff] %v6918_v21  ;;  %v2792_v21 = vsel %vm415_vm8, %v7569_v16, %v6690_v18  ;;  %v7573_v18 = vld [vmem:[#allocation19_spill] sm:$0xff] }
 0x44a   :  { %3928 = vrot.lane.b32.xlu1 %v3848_v3, %s4810_s12  ;;  %4200 = vrot.lane.b32.xlu0 %v4146_v40, %s4808_s10  ;;  %v2200_v16 = vcombine.low %v7573_v18, %v7572_v52 }
 0x44c   :  { %v6933_v12 = vpop.permute.xlu1 %2746  ;;  %v6936_v38 = vpop.permute.xlu0 %3008 }
 0x44d   :  { %7567 = vst [vmem:[#allocation53_spill] sm:$0xff] %v6936_v38  ;;  %v7574_v38 = vld [vmem:[#allocation41_spill] sm:$0xff] }
 0x44e   :  { %4168 = vrot.lane.b32.xlu1 %v4081_v11, %s4811_s13  ;;  %3490 = vrot.lane.b32.xlu0 %v3443_v20, %s4811_s13  ;;  %v3839_v11 = vrot.slane %v3831_v41, %v5168_v53  ;;  %v3426_v20 = vcombine.high %v6858_v8, %v6851_v10  ;;  %v4078_v41 = vrot.slane %v4064_v58, %v5168_v53 }
 0x44f   :  { %v2793_v10 = vsel %vm417_vm9, %v2792_v21, %v6672_v19 }
 0x450   :  { %v6949_v63 = vpop.permute.xlu1 %2976  ;;  %v6952_v26 = vpop.permute.xlu0 %3256 }
 0x451   :  { %7568 = vst [vmem:[#allocation54_spill] sm:$0xff] %v6949_v63 }
 0x452   :  { %3458 = vrot.lane.b32.xlu1 %v3365_v44, %s4807_s9  ;;  %3730 = vrot.lane.b32.xlu0 %v3676_v29, %s4812_s14  ;;  %v4150_v29 = vcombine.high %v4146_v40, %v7534_v17  ;;  %v3440_v40 = vrot.slane %v3426_v20, %v5168_v53  ;;  %v3375_v20 = vcombine.high %v3365_v44, %v7534_v17 }
 0x454   :  { %v6957_v3 = vpop.permute.xlu1 %3224  ;;  %v6962_v4 = vpop.permute.xlu0 %3710 }
 0x456   :  { %3698 = vrot.lane.b32.xlu1 %v3604_v51, %s4808_s10  ;;  %3964 = vrot.lane.b32.xlu0 %v3917_v45, %s4811_s13  ;;  %v2216_v45 = vcombine.low %v7571_v14, %v7570_v55 }
 0x458   :  { %v6969_v43 = vpop.permute.xlu1 %3678  ;;  %v6974_v35 = vpop.permute.xlu0 %4184  ;;  %v7001_v58 = vrot.slane %v2216_v45, %v5150_v34 }
 0x45a   :  { %3932 = vrot.lane.b32.xlu1 %v3839_v11, %s4807_s9  ;;  %4204 = vrot.lane.b32.xlu0 %v4150_v29, %s4812_s14  ;;  %v2794_v29 = vsel %vm419_vm10, %v2793_v10, %v6760_v32  ;;  %v4337_v32 = vcombine.low %v7574_v38, %v6595_v46 }
 0x45b   :  { %v2795_v23 = vsel %vm421_vm11, %v2794_v29, %v6788_v25  ;;  %v3849_v25 = vcombine.high %v3839_v11, %v7534_v17  ;;  %v7013_v29 = vrot.slane %v2200_v16, %v5150_v34  ;;  %v3608_v16 = vcombine.high %v3604_v51, %v7534_v17 }
 0x45c   :  { %v6984_v63 = vpop.permute.xlu1 %4152  ;;  %v6989_v8 = vpop.permute.xlu0 %2534  ;;  %v2796_v19 = vsel %vm423_vm12, %v2795_v23, %v6853_v15  ;;  %v4321_v23 = vcombine.low %v6608_v36, %v6627_v56 }
 0x45d   :  { %v2797_v10 = vsel %vm425_vm13, %v2796_v19, %v2779_v60  ;;  %v2232_v44 = vcombine.low %v7013_v29, %v7001_v58  ;;  %v7575_v60 = vld [vmem:[#allocation21_spill] sm:$0xff] }
 0x45e   :  { %4172 = vrot.lane.b32.xlu1 %v4078_v41, %s4808_s10  ;;  %3494 = vrot.lane.b32.xlu0 %v3440_v40, %s4808_s10  ;;  %v3270_v11 = vsel %vm415_vm8, %v7575_v60, %v6653_v27  ;;  %v4082_v27 = vcombine.high %v4078_v41, %v7534_v17 }
 0x45f   :  { %v7055_v41 = vrot.slane %v2232_v44, %v5168_v53  ;;  %v4253_v44 = vcombine.low %v6644_v7, %v6667_v49 }
 0x460   :  { %v7005_v21 = vpop.permute.xlu1 %2502  ;;  %v2783_v61 = vpop.permute.xlu0 %2782 }
 0x461   :  { %v2798_v45 = vsel %vm427_vm14, %v2797_v10, %v2783_v61  ;;  %v3900_v61 = vcombine.high %v6879_v9, %v6882_v2  ;;  %v7033_v10 = vrot.slane %v4337_v32, %v5150_v34  ;;  %v7044_v9 = vrot.slane %v4321_v23, %v5150_v34 }
 0x462   :  { %3462 = vrot.lane.b32.xlu1 %v3375_v20, %s4811_s13  ;;  %v2802_v15 = vrot.slane %v2798_v45, 4  ;;  %3936 = vrot.lane.b32.xlu0 %v3849_v25, %s4811_s13  ;;  %v3358_v20 = vcombine.high %v6923_v24, %v6916_v31  ;;  %v3271_v25 = vsel %vm417_vm9, %v3270_v11, %v6703_v59 }
 0x463   :  { %v3272_v51 = vsel %vm419_vm10, %v3271_v25, %v6764_v22  ;;  %v3914_v24 = vrot.slane %v3900_v61, %v5168_v53  ;;  %v3832_v22 = vcombine.high %v6942_v50, %v6945_v57  ;;  %v4353_v32 = vcombine.low %v7044_v9, %v7033_v10 }
 0x464   :  { %v7025_v19 = vpop.permute.xlu1 %2750  ;;  %2806 = vst [vmem:[#allocation3 + $0x18] sm:$0xf0] %v2802_v15  ;;  %v7037_v45 = vpop.permute.xlu0 %3012  ;;  %v3273_v2 = vsel %vm421_vm11, %v3272_v51, %v6818_v54  ;;  %v7576_v54 = vld [vmem:[#allocation43_spill] sm:$0xff]  ;;  %v3372_v60 = vrot.slane %v3358_v20, %v5168_v53 }
 0x465   :  { %v3274_v59 = vsel %vm423_vm12, %v3273_v2, %v6886_v47  ;;  %v4269_v23 = vcombine.low %v7576_v54, %v6634_v28  ;;  %v3846_v20 = vrot.slane %v3832_v22, %v5168_v53  ;;  %v7082_v25 = vrot.slane %v4353_v32, %v5168_v53  ;;  %v7577_v32 = vld [vmem:[#allocation36_spill] sm:$0xff] }
 0x466   :  { %3702 = vrot.lane.b32.xlu1 %v3608_v16, %s4812_s14  ;;  %4176 = vrot.lane.b32.xlu0 %v4082_v27, %s4812_s14  ;;  %v3275_v15 = vsel %vm425_vm13, %v3274_v59, %v6952_v26  ;;  %v2264_v16 = vcombine.high %v7055_v41, %v7534_v17  ;;  %v7086_v27 = vrot.slane %v4253_v44, %v5150_v34 }
 0x467   :  { %v7076_v26 = vrot.slane %v4269_v23, %v5150_v34  ;;  %v3444_v2 = vcombine.high %v3440_v40, %v7534_v17  ;;  %v4385_v22 = vcombine.high %v7082_v25, %v7534_v17  ;;  %v7578_v40 = vld [vmem:[#allocation35_spill] sm:$0xff] }
 0x468   :  { %v7051_v31 = vpop.permute.xlu1 %2980  ;;  %v3261_v47 = vpop.permute.xlu0 %3260 }
 0x469   :  { %v3276_v11 = vsel %vm427_vm14, %v3275_v15, %v3261_v47  ;;  %v4285_v59 = vcombine.low %v7086_v27, %v7076_v26  ;;  %v3740_v15 = vsel %vm415_vm8, %v7577_v32, %v6903_v62  ;;  %v2233_v47 = vcombine.high %v7013_v29, %v7001_v58 }
 0x46a   :  { %3968 = vrot.lane.b32.xlu1 %v3914_v24, %s4808_s10  ;;  %v3280_v50 = vrot.slane %v3276_v11, 4  ;;  %3466 = vrot.lane.b32.xlu0 %v3372_v60, %s4808_s10  ;;  %v4214_v11 = vsel %vm415_vm8, %v7578_v40, %v6894_v13  ;;  %v3741_v44 = vsel %vm417_vm9, %v3740_v15, %v6962_v4  ;;  %v3376_v32 = vcombine.high %v3372_v60, %v7534_v17  ;;  %v7579_v4 = vld [vmem:[#allocation40_spill] sm:$0xff] }
 0x46b   :  { %v7118_v58 = vrot.slane %v4285_v59, %v5168_v53  ;;  %v4354_v60 = vcombine.high %v7044_v9, %v7033_v10  ;;  %v7580_v59 = vld [vmem:[#allocation28_spill] sm:$0xff] }
 0x46c   :  { %v7071_v57 = vpop.permute.xlu1 %3228  ;;  %3284 = vst [vmem:[#allocation3 + $0x38] sm:$0xf0] %v3280_v50  ;;  %v7078_v61 = vpop.permute.xlu0 %3682  ;;  %v2785_v15 = vsel %vm415_vm8, %v7580_v59, %v6712_v37  ;;  %v7583_v37 = vld [vmem:[#allocation29_spill] sm:$0xff]  ;;  %v2201_v59 = vcombine.high %v7573_v18, %v7572_v52 }
 0x46d   :  { %v3263_v9 = vsel %vm415_vm8, %v7583_v37, %v6727_v0  ;;  %v4368_v0 = vrot.slane %v4354_v60, %v5168_v53 }
 0x46e   :  { %2297 = vrot.lane.b32.xlu1 %v2264_v16, %s4809_s11  ;;  %3940 = vrot.lane.b32.xlu0 %v3846_v20, %s4808_s10  ;;  %v3918_v16 = vcombine.high %v3914_v24, %v7534_v17  ;;  %v2247_v24 = vrot.slane %v2233_v47, %v5168_v53  ;;  %v7581_v47 = vld [vmem:[#allocation16_spill] sm:$0xff] }
 0x470   :  { %v7089_v51 = vpop.permute.xlu1 %3474  ;;  %v7094_v23 = vpop.permute.xlu0 %3948 }
 0x472   :  { %3498 = vrot.lane.b32.xlu1 %v3444_v2, %s4812_s14  ;;  %4418 = vrot.lane.b32.xlu0 %v4385_v22, %s4809_s11  ;;  %v4215_v2 = vsel %vm417_vm9, %v4214_v11, %v6974_v35  ;;  %v4207_v35 = vsel %vm415_vm8, %v7579_v4, %v6984_v63  ;;  %v2217_v63 = vcombine.high %v7571_v14, %v7570_v55 }
 0x473   :  { %v2265_v4 = vcombine.high %v2247_v24, %v7534_v17  ;;  %v4286_v55 = vcombine.high %v7086_v27, %v7076_v26  ;;  %v3264_v14 = vsel %vm417_vm9, %v3263_v9, %v6769_v48 }
 0x474   :  { %v3715_v50 = vpop.permute.xlu1 %3714  ;;  %v4189_v22 = vpop.permute.xlu0 %4188  ;;  %v7175_v48 = vrot.slane %v2217_v63, %v5150_v34 }
 0x475   :  { %v7114_v62 = vsel %vm419_vm10, %v3741_v44, %v3715_v50  ;;  %v7121_v13 = vsel %vm419_vm10, %v4215_v2, %v4189_v22  ;;  %v4317_v44 = vcombine.high %v7118_v58, %v7534_v17  ;;  %v7582_v50 = vld [vmem:[#allocation14_spill] sm:$0xff] }
 0x476   :  { %3972 = vrot.lane.b32.xlu1 %v3918_v16, %s4812_s14  ;;  %3470 = vrot.lane.b32.xlu0 %v3376_v32, %s4812_s14  ;;  %v2149_v10 = vcombine.high %v7582_v50, %v7581_v47  ;;  %v7584_v16 = vld [vmem:[#allocation46_spill] sm:$0xff]  ;;  %v3850_v32 = vcombine.high %v3846_v20, %v7534_v17  ;;  %v7586_v20 = vld [vmem:[#allocation13_spill] sm:$0xff]  ;;  %v4386_v50 = vcombine.high %v4368_v0, %v7534_v17 }
 0x477   :  { %v2786_v2 = vsel %vm417_vm9, %v2785_v15, %v7584_v16  ;;  %v7585_v15 = vld [vmem:[#allocation15_spill] sm:$0xff] }
 0x478   :  { %v4157_v29 = vpop.permute.xlu1 %4156  ;;  %v7137_v11 = vpop.permute.xlu0 %2538 }
 0x479   :  { %v7135_v40 = vsel %vm417_vm9, %v4207_v35, %v4157_v29  ;;  %v2787_v35 = vsel %vm419_vm10, %v2786_v2, %v6800_v42  ;;  %v7178_v42 = vrot.slane %v2149_v10, %v5150_v34 }
 0x47a   :  { %2301 = vrot.lane.b32.xlu1 %v2247_v24, %s4806_s8  ;;  %4390 = vrot.lane.b32.xlu0 %v4317_v44, %s4809_s11  ;;  %v2133_v44 = vcombine.high %v7586_v20, %v7585_v15  ;;  %v3265_v24 = vsel %vm419_vm10, %v3264_v14, %v6828_v33  ;;  %v2788_v26 = vsel %vm421_vm11, %v2787_v35, %v6861_v1 }
 0x47b   :  { %v3266_v52 = vsel %vm421_vm11, %v3265_v24, %v6891_v39  ;;  %v2789_v18 = vsel %vm423_vm12, %v2788_v26, %v6933_v12  ;;  %v4338_v33 = vcombine.high %v7574_v38, %v6595_v46  ;;  %v4270_v1 = vcombine.high %v7576_v54, %v6634_v28 }
 0x47c   :  { %v7152_v22 = vpop.permute.xlu1 %2506  ;;  %v7162_v29 = vpop.permute.xlu0 %2984  ;;  %v3267_v27 = vsel %vm423_vm12, %v3266_v52, %v6957_v3  ;;  %v2790_v60 = vsel %vm425_vm13, %v2789_v18, %v7025_v19  ;;  %v4300_v46 = vrot.slane %v4286_v55, %v5168_v53  ;;  %v7199_v38 = vrot.slane %v2201_v59, %v5150_v34  ;;  %v7589_v18 = vld [vmem:[#allocation44_spill] sm:$0xff] }
 0x47d   :  { %v3268_v39 = vsel %vm425_vm13, %v3267_v27, %v7071_v57  ;;  %v4322_v28 = vcombine.high %v6608_v36, %v6627_v56  ;;  %v7206_v54 = vrot.slane %v2133_v44, %v5150_v34  ;;  %v4254_v57 = vcombine.high %v6644_v7, %v6667_v49  ;;  %v7587_v7 = vld [vmem:[#allocation42_spill] sm:$0xff] }
 0x47e   :  { %3944 = vrot.lane.b32.xlu1 %v3850_v32, %s4812_s14  ;;  %2305 = vrot.lane.b32.xlu0 %v2265_v4, %s4810_s12  ;;  %v2248_v37 = vcombine.low %v7199_v38, %v7175_v48  ;;  %v7214_v9 = vrot.slane %v4338_v33, %v5150_v34  ;;  %v7221_v16 = vrot.slane %v4270_v1, %v5150_v34 }
 0x47f   :  { %v2180_v56 = vcombine.low %v7206_v54, %v7178_v42  ;;  %v3508_v49 = vsel %vm415_vm8, %v7587_v7, %v7089_v51  ;;  %v4318_v32 = vcombine.high %v4300_v46, %v7534_v17  ;;  %v7228_v4 = vrot.slane %v4322_v28, %v5150_v34 }
 0x480   :  { %v2755_v63 = vpop.permute.xlu1 %2754  ;;  %v3233_v47 = vpop.permute.xlu0 %3232  ;;  %v7235_v14 = vrot.slane %v4254_v57, %v5150_v34  ;;  %v7588_v34 = vld [vmem:[#allocation39_spill] sm:$0xff]  ;;  %v3982_v33 = vsel %vm415_vm8, %v7589_v18, %v7094_v23 }
 0x481   :  { %v2791_v12 = vsel %vm427_vm14, %v2790_v60, %v2755_v63  ;;  %v3269_v19 = vsel %vm427_vm14, %v3268_v39, %v3233_v47  ;;  %v4369_v51 = vcombine.low %v7228_v4, %v7214_v9  ;;  %v2188_v20 = vrot.slane %v2180_v56, %v5168_v53  ;;  %v7591_v63 = vld [vmem:[#allocation30_spill] sm:$0xff]  ;;  %v7594_v56 = vld [vmem:[#allocation31_spill] sm:$0xff] }
 0x482   :  { %v2801_v3 = vrot.slane %v2791_v12, 4  ;;  %4422 = vrot.lane.b32.xlu1 %v4368_v0, %s4806_s8  ;;  %v3279_v10 = vrot.slane %v3269_v19, 4  ;;  %4426 = vrot.lane.b32.xlu0 %v4386_v50, %s4810_s12  ;;  %v2256_v0 = vrot.slane %v2248_v37, %v5168_v53  ;;  %v4301_v59 = vcombine.low %v7235_v14, %v7221_v16  ;;  %v7592_v47 = vld [vmem:[#allocation50_spill] sm:$0xff]  ;;  %v7593_v37 = vld [vmem:[#allocation49_spill] sm:$0xff] }
 0x483   :  { %v3733_v44 = vsel %vm415_vm8, %v7588_v34, %v6969_v43  ;;  %v4377_v52 = vrot.slane %v4369_v51, %v5168_v53  ;;  %v2198_v28 = vcombine.high %v2188_v20, %v7534_v17  ;;  %v2249_v19 = vcombine.high %v7199_v38, %v7175_v48 }
 0x484   :  { %2805 = vst [vmem:[#allocation3 + $0x10] sm:$0xf0] %v2801_v3  ;;  %v7216_v36 = vpop.permute.xlu1 %3016  ;;  %3283 = vst [vmem:[#allocation3 + $0x30] sm:$0xf0] %v3279_v10  ;;  %v3479_v2 = vpop.permute.xlu0 %3478  ;;  %v3734_v24 = vsel %vm417_vm9, %v3733_v44, %v7078_v61  ;;  %v4309_v60 = vrot.slane %v4301_v59, %v5168_v53  ;;  %v7590_v61 = vld [vmem:[#allocation47_spill] sm:$0xff]  ;;  %v2266_v23 = vcombine.high %v2256_v0, %v7534_v17 }
 0x485   :  { %v7231_v55 = vsel %vm417_vm9, %v3508_v49, %v3479_v2  ;;  %v2552_v39 = vsel %vm415_vm8, %v7591_v63, %v7590_v61  ;;  %v2181_v10 = vcombine.high %v7206_v54, %v7178_v42  ;;  %v3030_v7 = vsel %vm415_vm8, %v7594_v56, %v7593_v37 }
 0x486   :  { %4394 = vrot.lane.b32.xlu1 %v4300_v46, %s4806_s8  ;;  %4398 = vrot.lane.b32.xlu0 %v4318_v32, %s4810_s12  ;;  %v2553_v50 = vsel %vm417_vm9, %v2552_v39, %v7592_v47  ;;  %v4387_v2 = vcombine.high %v4377_v52, %v7534_v17  ;;  %v3031_v48 = vsel %vm417_vm9, %v3030_v7, %v6803_v30  ;;  %v7595_v32 = vld [vmem:[#allocation37_spill] sm:$0xff] }
 0x487   :  { %v2554_v3 = vsel %vm419_vm10, %v2553_v50, %v6835_v5  ;;  %v4319_v54 = vcombine.high %v4309_v60, %v7534_v17  ;;  %v3032_v51 = vsel %vm419_vm10, %v3031_v48, %v7595_v32  ;;  %v4302_v34 = vcombine.high %v7235_v14, %v7221_v16  ;;  %v7605_v32 = vld [vmem:[#allocation32_spill] sm:$0xff] }
 0x488   :  { %v7240_v35 = vpop.permute.xlu1 %3446  ;;  %v7245_v15 = vpop.permute.xlu0 %3718  ;;  %v2555_v57 = vsel %vm421_vm11, %v2554_v3, %v6908_v6  ;;  %v4813_v14 = vmov 1.0   ;;  %v7599_v3 = vld [vmem:[#allocation34_spill] sm:$0xff] }
 0x489   :  { %v2556_v5 = vsel %vm423_vm12, %v2555_v57, %v6989_v8  ;;  %v4316_v18 = vrot.slane %v4302_v34, %v5168_v53 }
 0x48a   :  { %2309 = vrot.lane.b32.xlu1 %v2256_v0, %s4807_s9  ;;  %2281 = vrot.lane.b32.xlu0 %v2188_v20, %s4807_s9  ;;  %v2557_v6 = vsel %vm425_vm13, %v2556_v5, %v7137_v11  ;;  %v7596_v0 = vld [vmem:[#allocation53_spill] sm:$0xff]  ;;  %v2263_v20 = vrot.slane %v2249_v19, %v5168_v53  ;;  %v7602_v5 = vld [vmem:[#allocation18_spill] sm:$0xff] }
 0x48b   :  { %v3033_v30 = vsel %vm421_vm11, %v3032_v51, %v7596_v0  ;;  %v7600_v19 = vld [vmem:[#allocation33_spill] sm:$0xff]  ;;  %v4320_v7 = vcombine.high %v4316_v18, %v7534_v17 }
 0x48c   :  { %v3687_v26 = vpop.permute.xlu1 %3686  ;;  %v3953_v27 = vpop.permute.xlu0 %3952  ;;  %v3034_v11 = vsel %vm423_vm12, %v3033_v30, %v7037_v45  ;;  %v2267_v61 = vcombine.high %v2263_v20, %v7534_v17  ;;  %v3023_v57 = vsel %vm415_vm8, %v7600_v19, %v7599_v3 }
 0x48d   :  { %v7260_v1 = vsel %vm419_vm10, %v3734_v24, %v3687_v26  ;;  %v7264_v43 = vsel %vm417_vm9, %v3982_v33, %v3953_v27  ;;  %v3035_v44 = vsel %vm425_vm13, %v3034_v11, %v7216_v36  ;;  %v2195_v26 = vrot.slane %v2181_v10, %v5168_v53  ;;  %v7598_v33 = vld [vmem:[#allocation45_spill] sm:$0xff]  ;;  %v7601_v10 = vld [vmem:[#allocation48_spill] sm:$0xff] }
 0x48e   :  { %4430 = vrot.lane.b32.xlu1 %v4377_v52, %s4807_s9  ;;  %4402 = vrot.lane.b32.xlu0 %v4309_v60, %s4807_s9  ;;  %v7597_v36 = vlaneseq  ;;  %v3501_v27 = vsel %vm415_vm8, %v7598_v33, %v7240_v35 }
 0x48f   :  { %v2199_v63 = vcombine.high %v2195_v26, %v7534_v17 }
 0x490   :  { %v7271_v12 = vpop.permute.xlu1 %3920  ;;  %v7276_v46 = vpop.permute.xlu0 %4192  ;;  %vm206_vm15 = vcmp.lt.s32.totalorder %v7597_v36, 512 }
 0x491   :  { %209 = vst.msk [vmem:[#allocation3 + $0x84] ss:$8 sm:$0xf] %vm206_vm15, %v4813_v14  ;;  %v3975_v37 = vsel %vm415_vm8, %v7601_v10, %v7271_v12  ;;  %v4217_v10 = vsel %vm421_vm11, %v7121_v13, %v7276_v46 }
 0x492   :  { %2313 = vrot.lane.b32.xlu1 %v2266_v23, %s4811_s13  ;;  %2285 = vrot.lane.b32.xlu0 %v2198_v28, %s4811_s13 }
 0x494   :  { %v4161_v49 = vpop.permute.xlu1 %4160  ;;  %v2543_v42 = vpop.permute.xlu0 %2542 }
 0x495   :  { %v7301_v38 = vsel %vm419_vm10, %v7135_v40, %v4161_v49  ;;  %v2558_v8 = vsel %vm427_vm14, %v2557_v6, %v2543_v42  ;;  %v4370_v40 = vcombine.high %v7228_v4, %v7214_v9  ;;  %v3024_v49 = vsel %vm417_vm9, %v3023_v57, %v7602_v5  ;;  %v7603_v6 = vld [vmem:[#allocation54_spill] sm:$0xff] }
 0x496   :  { %4434 = vrot.lane.b32.xlu1 %v4387_v2, %s4811_s13  ;;  %2560 = vst [vmem:[#allocation3 + $0x18] sm:$0xf] %v2558_v8  ;;  %4406 = vrot.lane.b32.xlu0 %v4319_v54, %s4811_s13  ;;  %v3025_v42 = vsel %vm419_vm10, %v3024_v49, %v7603_v6  ;;  %v7604_v54 = vld [vmem:[#allocation51_spill] sm:$0xff] }
 0x497   :  { %v4384_v9 = vrot.slane %v4370_v40, %v5168_v53  ;;  %v2545_v51 = vsel %vm415_vm8, %v7605_v32, %v7604_v54  ;;  %v3026_v12 = vsel %vm421_vm11, %v3025_v42, %v7051_v31  ;;  %v7607_v40 = vld [vmem:[#allocation52_spill] sm:$0xff] }
 0x498   :  { %v2511_v59 = vpop.permute.xlu1 %2510  ;;  %v3021_v24 = vpop.permute.xlu0 %3020  ;;  %v3027_v0 = vsel %vm423_vm12, %v3026_v12, %v7162_v29 }
 0x499   :  { %v3036_v52 = vsel %vm427_vm14, %v3035_v44, %v3021_v24  ;;  %v4388_v35 = vcombine.high %v4384_v9, %v7534_v17  ;;  %v7606_v17 = vld [vmem:[#allocation38_spill] sm:$0xff] }
 0x49a   :  { %2317 = vrot.lane.b32.xlu1 %v2263_v20, %s4808_s10  ;;  %3038 = vst [vmem:[#allocation3 + $0x38] sm:$0xf] %v3036_v52  ;;  %2289 = vrot.lane.b32.xlu0 %v2195_v26, %s4808_s10  ;;  %v2546_v8 = vsel %vm417_vm9, %v2545_v51, %v7606_v17 }
 0x49b   :  { %v2547_v11 = vsel %vm419_vm10, %v2546_v8, %v7607_v40 }
 0x49c   :  { %v2989_v45 = vpop.permute.xlu1 %2988  ;;  %v3483_v4 = vpop.permute.xlu0 %3482  ;;  %v2548_v44 = vsel %vm421_vm11, %v2547_v11, %v7005_v21 }
 0x49d   :  { %v7328_v16 = vsel %vm419_vm10, %v7231_v55, %v3483_v4  ;;  %v4465_v39 = vld [vmem:[#allocation3 + $0x18] sm:$0xff]  ;;  %v3028_v20 = vsel %vm425_vm13, %v3027_v0, %v2989_v45  ;;  %v2549_v31 = vsel %vm423_vm12, %v2548_v44, %v7152_v22 }
 0x49e   :  { %4438 = vrot.lane.b32.xlu1 %v4384_v9, %s4808_s10  ;;  %4410 = vrot.lane.b32.xlu0 %v4316_v18, %s4808_s10  ;;  %v2550_v26 = vsel %vm425_vm13, %v2549_v31, %v2511_v59  ;;  %v3743_v59 = vsel %vm421_vm11, %v7114_v62, %v7245_v15 }
 0x4a0   :  { %v3451_v60 = vpop.permute.xlu1 %3450  ;;  %v3723_v55 = vpop.permute.xlu0 %3722 }
 0x4a1   :  { %v7338_v53 = vsel %vm417_vm9, %v3501_v27, %v3451_v60  ;;  %v4469_v23 = vld [vmem:[#allocation3 + $0x38] sm:$0xff] }
 0x4a2   :  { %2321 = vrot.lane.b32.xlu1 %v2267_v61, %s4812_s14  ;;  %2293 = vrot.lane.b32.xlu0 %v2199_v63, %s4812_s14  ;;  %v4682_v47 = vpack.c.bf16 %v4469_v23, %v4465_v39  ;;  %v3744_v63 = vsel %vm423_vm12, %v3743_v59, %v3723_v55 }
 0x4a4   :  { %v7343_v50 = vpop.permute.xlu1 %3690  ;;  %4683 = vmatprep.subr.bf16.mxu1 %v4682_v47  ;;  %v7346_v28 = vpop.permute.xlu0 %3956 }
 0x4a5   :  { %v3736_v54 = vsel %vm421_vm11, %v7260_v1, %v7343_v50  ;;  %v3984_v31 = vsel %vm419_vm10, %v7264_v43, %v7346_v28 }
 0x4a6   :  { %4442 = vrot.lane.b32.xlu1 %v4388_v35, %s4812_s14 }
 0x4a8   :  { %v3925_v56 = vpop.permute.xlu1 %3924  ;;  %v4197_v48 = vpop.permute.xlu0 %4196 }
 0x4a9   :  { %v7359_v2 = vsel %vm417_vm9, %v3975_v37, %v3925_v56  ;;  %v4218_v37 = vsel %vm423_vm12, %v4217_v10, %v4197_v48 }
 0x4aa   :  { %4414 = vrot.lane.b32.xlu1 %v4320_v7, %s4812_s14 }
 0x4ac   :  { %v4165_v30 = vpop.permute.xlu1 %4164  ;;  %v2993_v34 = vpop.permute.xlu0 %2992 }
 0x4ad   :  { %v3029_v24 = vsel %vm427_vm14, %v3028_v20, %v2993_v34  ;;  %v4210_v13 = vsel %vm421_vm11, %v7301_v38, %v4165_v30 }
 0x4ae   :  { %3037 = vst [vmem:[#allocation3 + $0x30] sm:$0xf] %v3029_v24 }
 0x4b0   :  { %v2515_v52 = vpop.permute.xlu1 %2514  ;;  %v3487_v9 = vpop.permute.xlu0 %3486 }
 0x4b1   :  { %v2551_v29 = vsel %vm427_vm14, %v2550_v26, %v2515_v52  ;;  %v3511_v20 = vsel %vm421_vm11, %v7328_v16, %v3487_v9 }
 0x4b2   :  { %2559 = vst [vmem:[#allocation3 + $0x10] sm:$0xf] %v2551_v29 }
 0x4b4   :  { %v3455_v4 = vpop.permute.xlu1 %3454  ;;  %v3727_v18 = vpop.permute.xlu0 %3726 }
 0x4b5   :  { %v4468_v33 = vld [vmem:[#allocation3 + $0x30] sm:$0xff]  ;;  %v3745_v23 = vsel %vm425_vm13, %v3744_v63, %v3727_v18  ;;  %v3503_v29 = vsel %vm419_vm10, %v7338_v53, %v3455_v4 }
 0x4b8   :  { %v3695_v45 = vpop.permute.xlu1 %3694  ;;  %v3961_v36 = vpop.permute.xlu0 %3960 }
 0x4b9   :  { %v4464_v14 = vld [vmem:[#allocation3 + $0x10] sm:$0xff]  ;;  %v3737_v46 = vsel %vm423_vm12, %v3736_v54, %v3695_v45  ;;  %v3985_v18 = vsel %vm421_vm11, %v3984_v31, %v3961_v36 }
 0x4ba   :  { %v4684_v21 = vpack.c.bf16 %v4468_v33, %v4464_v14 }
 0x4bc   :  { %v7383_v27 = vpop.permute.xlu1 %3928  ;;  %4685 = vmatpush1.bf16.msra.mxu1 %v4684_v21  ;;  %v4201_v60 = vpop.permute.xlu0 %4200 }
 0x4bd   :  { %v4219_v62 = vsel %vm425_vm13, %v4218_v37, %v4201_v60  ;;  %v3977_v36 = vsel %vm419_vm10, %v7359_v2, %v7383_v27 }
 0x4c0   :  { %v4169_v22 = vpop.permute.xlu1 %4168  ;;  %v3491_v61 = vpop.permute.xlu0 %3490 }
 0x4c1   :  { %v4211_v48 = vsel %vm423_vm12, %v4210_v13, %v4169_v22  ;;  %v3512_v34 = vsel %vm423_vm12, %v3511_v20, %v3491_v61 }
 0x4c4   :  { %v3459_v39 = vpop.permute.xlu1 %3458  ;;  %v3731_v47 = vpop.permute.xlu0 %3730 }
 0x4c5   :  { %v3746_v35 = vsel %vm427_vm14, %v3745_v23, %v3731_v47  ;;  %v3504_v16 = vsel %vm421_vm11, %v3503_v29, %v3459_v39 }
 0x4c6   :  { %v3750_v3 = vrot.slane %v3746_v35, 4 }
 0x4c8   :  { %v3699_v19 = vpop.permute.xlu1 %3698  ;;  %3754 = vst [vmem:[#allocation3 + $0x58] sm:$0xf0] %v3750_v3  ;;  %v3965_v57 = vpop.permute.xlu0 %3964 }
 0x4c9   :  { %v3738_v32 = vsel %vm425_vm13, %v3737_v46, %v3699_v19  ;;  %v3986_v9 = vsel %vm423_vm12, %v3985_v18, %v3965_v57  ;;  %v7608_v46 = vld [vmem:[#allocation25_spill] sm:$0xff] }
 0x4cc   :  { %v3933_v56 = vpop.permute.xlu1 %3932  ;;  %v4205_v15 = vpop.permute.xlu0 %4204 }
 0x4cd   :  { %v4220_v55 = vsel %vm427_vm14, %v4219_v62, %v4205_v15  ;;  %v3978_v22 = vsel %vm421_vm11, %v3977_v36, %v3933_v56 }
 0x4ce   :  { %v4224_v7 = vrot.slane %v4220_v55, 4 }
 0x4d0   :  { %v4173_v5 = vpop.permute.xlu1 %4172  ;;  %4228 = vst [vmem:[#allocation3 + $0x78] sm:$0xf0] %v4224_v7  ;;  %v3495_v49 = vpop.permute.xlu0 %3494 }
 0x4d1   :  { %v4212_v12 = vsel %vm425_vm13, %v4211_v48, %v4173_v5  ;;  %v3513_v44 = vsel %vm425_vm13, %v3512_v34, %v3495_v49  ;;  %v7609_v48 = vld [vmem:[#allocation17_spill] sm:$0xff] }
 0x4d4   :  { %v3463_v6 = vpop.permute.xlu1 %3462  ;;  %v3937_v42 = vpop.permute.xlu0 %3936 }
 0x4d5   :  { %v3505_v45 = vsel %vm423_vm12, %v3504_v16, %v3463_v6  ;;  %v3979_v61 = vsel %vm423_vm12, %v3978_v22, %v3937_v42 }
 0x4d8   :  { %v3703_v51 = vpop.permute.xlu1 %3702  ;;  %v4177_v8 = vpop.permute.xlu0 %4176 }
 0x4d9   :  { %v3739_v17 = vsel %vm427_vm14, %v3738_v32, %v3703_v51  ;;  %v4213_v40 = vsel %vm427_vm14, %v4212_v12, %v4177_v8  ;;  %v2324_v32 = vsel %vm415_vm8, %v7609_v48, %v7608_v46  ;;  %v7610_v8 = vld [vmem:[#allocation24_spill] sm:$0xff] }
 0x4da   :  { %v3749_v0 = vrot.slane %v3739_v17, 4  ;;  %v4223_v11 = vrot.slane %v4213_v40, 4 }
 0x4dc   :  { %3753 = vst [vmem:[#allocation3 + $0x50] sm:$0xf0] %v3749_v0  ;;  %v3969_v1 = vpop.permute.xlu1 %3968  ;;  %4227 = vst [vmem:[#allocation3 + $0x70] sm:$0xf0] %v4223_v11  ;;  %v3467_v38 = vpop.permute.xlu0 %3466  ;;  %v2325_v0 = vsel %vm417_vm9, %v2324_v32, %v7610_v8 }
 0x4dd   :  { %v3987_v14 = vsel %vm425_vm13, %v3986_v9, %v3969_v1  ;;  %v3506_v43 = vsel %vm425_vm13, %v3505_v45, %v3467_v38  ;;  %v7611_v38 = vld [vmem:[#allocation26_spill] sm:$0xff] }
 0x4e0   :  { %v2298_v50 = vpop.permute.xlu1 %2297  ;;  %v3941_v30 = vpop.permute.xlu0 %3940 }
 0x4e1   :  { %v3980_v59 = vsel %vm425_vm13, %v3979_v61, %v3941_v30  ;;  %v2331_v51 = vsel %vm415_vm8, %v7055_v41, %v2298_v50  ;;  %v2326_v30 = vsel %vm419_vm10, %v2325_v0, %v7611_v38  ;;  %v4461_v61 = vld [vmem:[#allocation7] sm:$0xff] }
 0x4e4   :  { %v3499_v24 = vpop.permute.xlu1 %3498  ;;  %v4419_v52 = vpop.permute.xlu0 %4418 }
 0x4e5   :  { %v3514_v26 = vsel %vm427_vm14, %v3513_v44, %v3499_v24  ;;  %v4452_v40 = vsel %vm415_vm8, %v7082_v25, %v4419_v52 }
 0x4e6   :  { %3516 = vst [vmem:[#allocation3 + $0x58] sm:$0xf] %v3514_v26 }
 0x4e8   :  { %v3973_v33 = vpop.permute.xlu1 %3972  ;;  %v3471_v21 = vpop.permute.xlu0 %3470 }
 0x4e9   :  { %v3988_v28 = vsel %vm427_vm14, %v3987_v14, %v3973_v33  ;;  %v3507_v53 = vsel %vm427_vm14, %v3506_v43, %v3471_v21 }
 0x4ea   :  { %3990 = vst [vmem:[#allocation3 + $0x78] sm:$0xf] %v3988_v28  ;;  %3515 = vst [vmem:[#allocation3 + $0x50] sm:$0xf] %v3507_v53 }
 0x4ec   :  { %v2302_v4 = vpop.permute.xlu1 %2301  ;;  %v4391_v60 = vpop.permute.xlu0 %4390 }
 0x4ed   :  { %v4473_v47 = vld [vmem:[#allocation3 + $0x58] sm:$0xff]  ;;  %v2332_v12 = vsel %vm417_vm9, %v2331_v51, %v2302_v4  ;;  %v4445_v25 = vsel %vm415_vm8, %v7118_v58, %v4391_v60 }
 0x4f0   :  { %v3945_v63 = vpop.permute.xlu1 %3944  ;;  %v2306_v23 = vpop.permute.xlu0 %2305 }
 0x4f1   :  { %v3981_v39 = vsel %vm427_vm14, %v3980_v59, %v3945_v63  ;;  %v4477_v35 = vld [vmem:[#allocation3 + $0x78] sm:$0xff]  ;;  %v4472_v27 = vld [vmem:[#allocation3 + $0x50] sm:$0xff]  ;;  %v2333_v11 = vsel %vm419_vm10, %v2332_v12, %v2306_v23 }
 0x4f2   :  { %3989 = vst [vmem:[#allocation3 + $0x70] sm:$0xf] %v3981_v39  ;;  %v4686_v3 = vpack.c.bf16 %v4477_v35, %v4473_v47 }
 0x4f4   :  { %v4423_v19 = vpop.permute.xlu1 %4422  ;;  %4687 = vmatprep.subr.bf16.mxu1 %v4686_v3  ;;  %v4427_v57 = vpop.permute.xlu0 %4426 }
 0x4f5   :  { %v4453_v20 = vsel %vm417_vm9, %v4452_v40, %v4423_v19 }
 0x4f6   :  { %v4454_v26 = vsel %vm419_vm10, %v4453_v20, %v4427_v57 }
 0x4f8   :  { %v4395_v10 = vpop.permute.xlu1 %4394  ;;  %v4399_v2 = vpop.permute.xlu0 %4398 }
 0x4f9   :  { %v4476_v37 = vld [vmem:[#allocation3 + $0x70] sm:$0xff]  ;;  %v4446_v16 = vsel %vm417_vm9, %v4445_v25, %v4395_v10 }
 0x4fa   :  { %v4688_v56 = vpack.c.bf16 %v4476_v37, %v4472_v27  ;;  %v4447_v43 = vsel %vm419_vm10, %v4446_v16, %v4399_v2 }
 0x4fc   :  { %v2310_v62 = vpop.permute.xlu1 %2309  ;;  %4689 = vmatpush1.bf16.msra.mxu1 %v4688_v56  ;;  %v2282_v15 = vpop.permute.xlu0 %2281 }
 0x4fd   :  { %v2334_v34 = vsel %vm421_vm11, %v2333_v11, %v2310_v62  ;;  %v2327_v41 = vsel %vm421_vm11, %v2326_v30, %v2282_v15 }
 0x500   :  { %v4431_v55 = vpop.permute.xlu1 %4430  ;;  %v4403_v7 = vpop.permute.xlu0 %4402 }
 0x501   :  { %v4455_v9 = vsel %vm421_vm11, %v4454_v26, %v4431_v55  ;;  %v4448_v21 = vsel %vm421_vm11, %v4447_v43, %v4403_v7 }
 0x504   :  { %v2314_v5 = vpop.permute.xlu1 %2313  ;;  %v2286_v49 = vpop.permute.xlu0 %2285 }
 0x505   :  { %v2335_v50 = vsel %vm423_vm12, %v2334_v34, %v2314_v5  ;;  %v2328_v44 = vsel %vm423_vm12, %v2327_v41, %v2286_v49 }
 0x508   :  { %v4435_v6 = vpop.permute.xlu1 %4434  ;;  %v4407_v42 = vpop.permute.xlu0 %4406 }
 0x509   :  { %v4456_v14 = vsel %vm423_vm12, %v4455_v9, %v4435_v6  ;;  %v4449_v53 = vsel %vm423_vm12, %v4448_v21, %v4407_v42 }
 0x50c   :  { %v2318_v54 = vpop.permute.xlu1 %2317  ;;  %v2290_v13 = vpop.permute.xlu0 %2289 }
 0x50d   :  { %v2336_v24 = vsel %vm425_vm13, %v2335_v50, %v2318_v54  ;;  %v2329_v52 = vsel %vm425_vm13, %v2328_v44, %v2290_v13 }
 0x510   :  { %v4439_v17 = vpop.permute.xlu1 %4438  ;;  %v4411_v1 = vpop.permute.xlu0 %4410 }
 0x511   :  { %v4457_v33 = vsel %vm425_vm13, %v4456_v14, %v4439_v17  ;;  %v4450_v4 = vsel %vm425_vm13, %v4449_v53, %v4411_v1 }
 0x514   :  { %v2322_v31 = vpop.permute.xlu1 %2321  ;;  %v2294_v18 = vpop.permute.xlu0 %2293 }
 0x515   :  { %v2337_v29 = vsel %vm427_vm14, %v2336_v24, %v2322_v31  ;;  %v2330_v45 = vsel %vm427_vm14, %v2329_v52, %v2294_v18 }
 0x516   :  { %2339 = vst [vmem:[#allocation3 + $0x88] sm:$0xf] %v2337_v29  ;;  %2338 = vst [vmem:[#allocation3 + $0x80] sm:$0xf] %v2330_v45 }
 0x518   :  { %v4443_v58 = vpop.permute.xlu1 %4442 }
 0x519   :  { %v4458_v28 = vsel %vm427_vm14, %v4457_v33, %v4443_v58 }
 0x51a   :  { %4460 = vst [vmem:[#allocation3 + $0x98] sm:$0xf] %v4458_v28 }
 0x51c   :  { %v4415_v36 = vpop.permute.xlu1 %4414 }
 0x51d   :  { %v4451_v60 = vsel %vm427_vm14, %v4450_v4, %v4415_v36  ;;  %v4479_v22 = vld [vmem:[#allocation3 + $0x88] sm:$0x1f]  ;;  %v4478_v59 = vld [vmem:[#allocation3 + $0x80] sm:$0x1f] }
 0x51e   :  { %4459 = vst [vmem:[#allocation3 + $0x90] sm:$0xf] %v4451_v60  ;;  %4668 = vmatprep.subr.msk.mxu0 %vm4486_vm0, %v4479_v22 }
 0x51f   :  { %4669 = vmatpush1.msk.msra.mxu0 %vm4486_vm0, %v4478_v59 }
 0x520   :  { %4670 = vmatmul.mubr.msk.f32.vlgmr.msra.gmra.mrb[0].mxu0 %vm4482_vm1, %v4461_v61 }
 0x521   :  { %v4481_v63 = vld [vmem:[#allocation3 + $0x98] sm:$0x1f] }
 0x522   :  { %4671 = vmatprep.subr.msk.mxu1 %vm4486_vm0, %v4481_v63 }
 0x525   :  { %v4480_v39 = vld [vmem:[#allocation3 + $0x90] sm:$0x1f] }
 0x526   :  { %4672 = vmatpush1.msk.msra.mxu1 %vm4486_vm0, %v4480_v39 }
 0x527   :  { %4673 = vmatmul.mubr.msk.f32.vlgmr.msra.gmra.mrb[0].mxu1 %vm4482_vm1, %v4461_v61 }
 0x5f3   :  { %v4565_v23 = vpop.f32.mrb[0].mxu0 }
 0x5f4   :  { %v4641_v47 = vmax.f32 %v4565_v23, 0.0  ;;  %v4567_v35 = vpop.f32.mrb[1].mxu0 }
 0x5f5   :  { %v4642_v3 = vmax.f32 %v4567_v35, 0.0 }
 0x5f6   :  { %4645 = vst [vmem:[#allocation9] sm:$0xff] %v4641_v47 }
 0x5f7   :  { %4646 = vst [vmem:[#allocation9 + $0x8] sm:$0xff] %v4642_v3 }
 0x5fa   :  { %v4636_v19 = vpop.f32.mrb[0].mxu1 }
 0x5fb   :  { %v4643_v57 = vmax.f32 %v4636_v19, 0.0  ;;  %v4638_v10 = vpop.f32.mrb[1].mxu1 }
 0x5fc   :  { %v4644_v2 = vmax.f32 %v4638_v10, 0.0 }
 0x5fd   :  { %4648 = vst [vmem:[#allocation9 + $0x10] sm:$0xff] %v4643_v57 }
 0x5fe   :  { %4649 = vst [vmem:[#allocation9 + $0x18] sm:$0xff] %v4644_v2 }
 0x5ff   :  { %4779 = shalt.err (!%p4776_p6)
}
 0x600   :  { %s4780_s20 = scalar_lea.hbm %s7483_s2, 512 }
 0x601   :  { %p4781_p7 = scmp.ne.s32.totalorder %s7483_s2, %s4780_s20  ;;  %p4784_p8 = scmp.lt.u32.totalorder %s4780_s20, %s7483_s2 }
 0x603   :  { %p4786_p9 = pnand %p4784_p8, %p4781_p7 }
 0x605   :  { %4789 = shalt.err (!%p4786_p9)
}
 0x606   :  { %s4815_s25 = smov 256  }
 0x607   :  { %4661 = dma.vmem_to_hbm [thread:$0]  %s4656_s16, 512, %s7483_s2, [#allocation6], %s4815_s25, %s4815_s25, %s4809_s11  }
 0x608   :  { %4794 = dma.done.wait [#allocation6], 512  }
 0x609   :  { %4795 = vsyncadd [#allocation6], 4294966784 }
 0x60a   :  { %4665 = vsyncpa [#allocation5], 1 }
 0x60b   :  { %4666 = vsyncpa [#allocation8], 1 }
 0x60c   :  { %4667 = vsyncpa [#allocation6], 1 }

</bundles_post_ra>
